<compile_context>
chip_gen: v6e
topology: v6e:2x2x1
jax: 0.10.0
libtpu: 0.0.40
codegen_flags: <defaults>
</compile_context>

<pallas_src>
import functools

import jax
import jax.numpy as jnp
from jax.experimental import pallas as pl
from jax.experimental.pallas import tpu as pltpu


_HALO = 8          # zero halo (in time steps) each side of the conv scratch (>= pad, keeps stores 8-row aligned)
_NEG_SLOPE = 0.01  # nn.LeakyReLU() default negative_slope


# ----------------------------------------------------------------------------
# Fully fused forward kernel (single grid step, everything resident in VMEM)
# ----------------------------------------------------------------------------
def _fused_kernel(inp_ref,
                  cw1_ref, cb1_ref, cw2_ref, cb2_ref, cw3_ref, cb3_ref,
                  wih0_ref, whh0_ref, bih0_ref, bhh0_ref,
                  wih1_ref, whh1_ref, bih1_ref, bhh1_ref,
                  wm_ref, bm_ref, wv_ref, bv_ref, eps_ref,
                  z_ref, kl_ref,
                  xpad_ref,
                  *, B, P, K, H, sample_rate):
    # inp_ref : (P*B, C0)   time-major flattened conv input (embedding + intensity)
    # cw*_ref : (K, Cin, Cout)  BN-folded conv weights ; cb*_ref : (1, Cout)
    # wih*/whh*: (I, 3H)/(H, 3H) GRU weights (PyTorch gate order r|z|n), b*: (1, 3H)
    # wm/wv   : (H, O) sampling linears ; eps_ref : (B, O) reparam noise
    # z_ref   : (B, O) VMEM out ; kl_ref : (1, 1) SMEM scalar out
    # xpad_ref: ((P + 2*HALO)*B, CMAX) VMEM scratch, zero-haloed conv buffer
    pad = (K - 1) // 2
    PB = P * B
    row0 = _HALO * B                                  # aligned start row of the live region

    # -------- conv stack: 3x (Conv1d same-pad + folded BN + LeakyReLU) --------
    xpad_ref[...] = jnp.zeros_like(xpad_ref)          # halo rows stay zero for all layers
    act = inp_ref[...]                                # (P*B, C0)
    for cw_ref, cb_ref in ((cw1_ref, cb1_ref), (cw2_ref, cb2_ref), (cw3_ref, cb3_ref)):
        _, cin, cout = cw_ref.shape
        xpad_ref[row0:row0 + PB, :cin] = act          # aligned-row, lane-masked store
        xp = xpad_ref[...]                            # ((P+2*HALO)*B, CMAX)
        acc = jnp.zeros((PB, cout), jnp.float32)
        for k in range(K):                            # K is tiny and static
            r0 = (_HALO + k - pad) * B                # shifting by k time steps == k*B rows
            acc += jnp.dot(xp[r0:r0 + PB, :cin], cw_ref[k],
                           preferred_element_type=jnp.float32)
        acc = acc + cb_ref[...]                       # broadcast (1, Cout)
        act = jnp.where(acc >= 0.0, acc, _NEG_SLOPE * acc)   # LeakyReLU
    # dropout1: identity (inference)                  # TODO(synk): train-mode dropout RNG

    # -------- 2-layer GRU (PyTorch gate order r|z|n) --------
    # Layer-1 input projection hoisted out of the recurrence: one big matmul.
    gi1 = jnp.dot(act, wih0_ref[...],
                  preferred_element_type=jnp.float32) + bih0_ref[...]   # (P*B, 3H)
    whh0 = whh0_ref[...]; bhh0 = bhh0_ref[...]
    wih1 = wih1_ref[...]; bih1 = bih1_ref[...]
    whh1 = whh1_ref[...]; bhh1 = bhh1_ref[...]

    def gru_cell(gi, h, whh, bhh):
        gh = jnp.dot(h, whh, preferred_element_type=jnp.float32) + bhh
        r = jax.nn.sigmoid(gi[:, 0:H] + gh[:, 0:H])
        z = jax.nn.sigmoid(gi[:, H:2 * H] + gh[:, H:2 * H])
        n = jnp.tanh(gi[:, 2 * H:3 * H] + r * gh[:, 2 * H:3 * H])
        return (1.0 - z) * n + z * h

    h1 = jnp.zeros((B, H), jnp.float32)
    h2 = jnp.zeros((B, H), jnp.float32)
    for t in range(P):                                # static, fully unrolled (T small)
        h1 = gru_cell(gi1[t * B:(t + 1) * B, :], h1, whh0, bhh0)
        gi2 = jnp.dot(h1, wih1, preferred_element_type=jnp.float32) + bih1
        h2 = gru_cell(gi2, h2, whh1, bhh1)
    # GRUOutput (unidirectional): last timestep of last layer == h2
    # dropout2: identity (inference)

    # -------- Sampling head (mean / -|var| linears, KL, reparam) --------
    zm = jnp.dot(h2, wm_ref[...], preferred_element_type=jnp.float32) + bm_ref[...]
    zlv = -jnp.abs(jnp.dot(h2, wv_ref[...],
                           preferred_element_type=jnp.float32) + bv_ref[...])
    kl = -0.5 * jnp.sum(1.0 + zlv - zm * zm - jnp.exp(zlv)) / B
    z_ref[...] = zm + jnp.exp(0.5 * zlv) * eps_ref[...] * sample_rate
    kl_ref[0, 0] = kl


# ----------------------------------------------------------------------------
# Full forward pass. Only the embedding gather / intensity concat / layout
# flatten (tiny ops on the raw input) stay in XLA; everything else is fused.
# ----------------------------------------------------------------------------
def ms_peak_encoder_cnn_forward(x_idx, y, params, eps, sample_rate=1.0):
    # x_idx: (B, P) int32 peak m/z bins; y: (B, P) float intensities
    B, P = x_idx.shape
    emb = params["embedding"][x_idx]                                  # (B, P, E) gather
    inp = jnp.concatenate([emb, y[..., None].astype(jnp.float32)], axis=2)
    inp_tm = jnp.transpose(inp, (1, 0, 2)).reshape(P * B, inp.shape[2])  # time-major 2-D slab

    (cw1, cb1), (cw2, cb2), (cw3, cb3) = params["convs"]
    assert len(params["gru"]) == 2, "fused kernel is specialized for num_rnn_layers=2"
    (wih0, whh0, bih0, bhh0), (wih1, whh1, bih1, bhh1) = params["gru"]
    wm, bm, wv, bv = params["w_mean"], params["b_mean"], params["w_var"], params["b_var"]

    K = cw1.shape[0]
    H = whh0.shape[0]
    O = wm.shape[1]
    CMAX = max(cw1.shape[1], cw2.shape[1], cw3.shape[1])
    assert (K - 1) // 2 <= _HALO

    args = (inp_tm, cw1, cb1, cw2, cb2, cw3, cb3,
            wih0, whh0, bih0, bhh0, wih1, whh1, bih1, bhh1,
            wm, bm, wv, bv, eps)

    kern = functools.partial(_fused_kernel, B=B, P=P, K=K, H=H,
                             sample_rate=float(sample_rate))

    z, kl = pl.pallas_call(
        kern,
        out_shape=(jax.ShapeDtypeStruct((B, O), jnp.float32),
                   jax.ShapeDtypeStruct((1, 1), jnp.float32)),
        grid=(1,),
        in_specs=[pl.BlockSpec(a.shape, lambda i, nd=a.ndim: (0,) * nd) for a in args],
        out_specs=(pl.BlockSpec((B, O), lambda i: (0, 0)),
                   pl.BlockSpec((1, 1), lambda i: (0, 0), memory_space=pltpu.SMEM)),
        scratch_shapes=[pltpu.VMEM(((P + 2 * _HALO) * B, CMAX), jnp.float32)],
        # Single fused step; on v7x a leading 'parallel' batch axis could shard
        # across the 2 TensorCores if the batch ever grows.
        compiler_params=pltpu.CompilerParams(dimension_semantics=("arbitrary",)),
    )(*args)
    return z, kl[0, 0]


# ----------------------------------------------------------------------------
# Deterministic parameter construction (shapes implied by __init__)
# ----------------------------------------------------------------------------
def build_params(key, *, max_mpz, emb_size, conv_channel, kernel_width,
                 hidden_size, num_rnn_layers, output_size):
    keys = iter(jax.random.split(key, 64))

    def nrm(shape, scale=0.1):
        return scale * jax.random.normal(next(keys), shape, jnp.float32)

    params = {"embedding": nrm((max_mpz, emb_size), 0.5)}

    # Three conv_set blocks (Conv1d + BatchNorm1d folded), weights as (K, Cin, Cout).
    convs = []
    last = emb_size + 1
    bn_eps = 1e-5
    for _ in range(3):
        w = nrm((kernel_width, last, conv_channel), 0.2)
        b = nrm((conv_channel,), 0.1)
        gamma = 1.0 + nrm((conv_channel,), 0.1)
        beta = nrm((conv_channel,), 0.1)
        mu = nrm((conv_channel,), 0.1)
        var = jnp.abs(nrm((conv_channel,), 0.1)) + 0.5
        s = gamma / jnp.sqrt(var + bn_eps)                 # fold eval-mode BN
        w_f = w * s[None, None, :]
        b_f = (b - mu) * s + beta
        convs.append((w_f, b_f[None, :]))
        last = conv_channel
    params["convs"] = convs

    # GRU (2 layers, PyTorch gate order r|z|n), stored transposed: (I, 3H)/(H, 3H).
    gru = []
    in_size = conv_channel
    for _ in range(num_rnn_layers):
        wih = nrm((in_size, 3 * hidden_size), 0.2)
        whh = nrm((hidden_size, 3 * hidden_size), 0.2)
        bih = nrm((1, 3 * hidden_size), 0.1)
        bhh = nrm((1, 3 * hidden_size), 0.1)
        gru.append((wih, whh, bih, bhh))
        in_size = hidden_size
    params["gru"] = gru

    # Sampling head linears (mean / var), stored as (H, O).
    params["w_mean"] = nrm((hidden_size, output_size), 0.2)
    params["b_mean"] = nrm((1, output_size), 0.1)
    params["w_var"] = nrm((hidden_size, output_size), 0.2)
    params["b_var"] = nrm((1, output_size), 0.1)
    return params


if __name__ == "__main__":
    B, P = 2, 16                 # batch, number of peaks
    MAX_MPZ = 64
    EMB = 10                     # embedding_size (default 10) -> conv input channels = 11
    CONV_CH = 16                 # conv1_channel
    KW = 3                       # kernel1_width (odd -> 'same' padding)
    HIDDEN = 32                  # hidden_size
    NUM_RNN_LAYERS = 2
    OUT = 8                      # output_size
    # TODO(synk): even kernel_width / bidirectional GRU / sample=False path not covered.

    key = jax.random.PRNGKey(0)
    k_params, k_x, k_y, k_eps = jax.random.split(key, 4)

    params = build_params(k_params, max_mpz=MAX_MPZ, emb_size=EMB,
                          conv_channel=CONV_CH, kernel_width=KW,
                          hidden_size=HIDDEN, num_rnn_layers=NUM_RNN_LAYERS,
                          output_size=OUT)

    x = jax.random.randint(k_x, (B, P), 0, MAX_MPZ, dtype=jnp.int32)  # peak m/z bins
    y = jax.random.uniform(k_y, (B, P), jnp.float32)                  # peak intensities
    eps = jax.random.normal(k_eps, (B, OUT), jnp.float32)             # reparam noise

    z_vecs, kl_loss = ms_peak_encoder_cnn_forward(x, y, params, eps, sample_rate=1.0)
    jax.block_until_ready((z_vecs, kl_loss))

    assert z_vecs.shape == (B, OUT) and z_vecs.dtype == jnp.float32
    assert kl_loss.shape == ()
    print("KERNEL_OK")
</pallas_src>

<mosaic_0001>
module attributes {stable_mosaic.version = 11 : i64} {
  func.func @_fused_kernel(%arg0: i32, %arg1: memref<32x11xf32, #tpu.memory_space<vmem>>, %arg2: memref<3x11x16xf32, #tpu.memory_space<vmem>>, %arg3: memref<1x16xf32, #tpu.memory_space<vmem>>, %arg4: memref<3x16x16xf32, #tpu.memory_space<vmem>>, %arg5: memref<1x16xf32, #tpu.memory_space<vmem>>, %arg6: memref<3x16x16xf32, #tpu.memory_space<vmem>>, %arg7: memref<1x16xf32, #tpu.memory_space<vmem>>, %arg8: memref<16x96xf32, #tpu.memory_space<vmem>>, %arg9: memref<32x96xf32, #tpu.memory_space<vmem>>, %arg10: memref<1x96xf32, #tpu.memory_space<vmem>>, %arg11: memref<1x96xf32, #tpu.memory_space<vmem>>, %arg12: memref<32x96xf32, #tpu.memory_space<vmem>>, %arg13: memref<32x96xf32, #tpu.memory_space<vmem>>, %arg14: memref<1x96xf32, #tpu.memory_space<vmem>>, %arg15: memref<1x96xf32, #tpu.memory_space<vmem>>, %arg16: memref<32x8xf32, #tpu.memory_space<vmem>>, %arg17: memref<1x8xf32, #tpu.memory_space<vmem>>, %arg18: memref<32x8xf32, #tpu.memory_space<vmem>>, %arg19: memref<1x8xf32, #tpu.memory_space<vmem>>, %arg20: memref<2x8xf32, #tpu.memory_space<vmem>>, %arg21: memref<2x8xf32, #tpu.memory_space<vmem>>, %arg22: memref<1x1xf32, #tpu.memory_space<smem>>, %arg23: memref<64x16xf32, #tpu.memory_space<vmem>>) attributes {dimension_semantics = [#tpu.dimension_semantics<arbitrary>], iteration_bounds = array<i64: 1>, scalar_prefetch = 0 : i64, scratch_operands = 1 : i64, tpu.core_type = #tpu.core_type<tc>, window_params = [{pipeline_mode = #tpu.pipeline_mode<synchronous>, transform_indices = @transform_0, window_bounds = array<i64: 32, 11>}, {pipeline_mode = #tpu.pipeline_mode<synchronous>, transform_indices = @transform_1, window_bounds = array<i64: 3, 11, 16>}, {pipeline_mode = #tpu.pipeline_mode<synchronous>, transform_indices = @transform_2, window_bounds = array<i64: 1, 16>}, {pipeline_mode = #tpu.pipeline_mode<synchronous>, transform_indices = @transform_3, window_bounds = array<i64: 3, 16, 16>}, {pipeline_mode = #tpu.pipeline_mode<synchronous>, transform_indices = @transform_4, window_bounds = array<i64: 1, 16>}, {pipeline_mode = #tpu.pipeline_mode<synchronous>, transform_indices = @transform_5, window_bounds = array<i64: 3, 16, 16>}, {pipeline_mode = #tpu.pipeline_mode<synchronous>, transform_indices = @transform_6, window_bounds = array<i64: 1, 16>}, {pipeline_mode = #tpu.pipeline_mode<synchronous>, transform_indices = @transform_7, window_bounds = array<i64: 16, 96>}, {pipeline_mode = #tpu.pipeline_mode<synchronous>, transform_indices = @transform_8, window_bounds = array<i64: 32, 96>}, {pipeline_mode = #tpu.pipeline_mode<synchronous>, transform_indices = @transform_9, window_bounds = array<i64: 1, 96>}, {pipeline_mode = #tpu.pipeline_mode<synchronous>, transform_indices = @transform_10, window_bounds = array<i64: 1, 96>}, {pipeline_mode = #tpu.pipeline_mode<synchronous>, transform_indices = @transform_11, window_bounds = array<i64: 32, 96>}, {pipeline_mode = #tpu.pipeline_mode<synchronous>, transform_indices = @transform_12, window_bounds = array<i64: 32, 96>}, {pipeline_mode = #tpu.pipeline_mode<synchronous>, transform_indices = @transform_13, window_bounds = array<i64: 1, 96>}, {pipeline_mode = #tpu.pipeline_mode<synchronous>, transform_indices = @transform_14, window_bounds = array<i64: 1, 96>}, {pipeline_mode = #tpu.pipeline_mode<synchronous>, transform_indices = @transform_15, window_bounds = array<i64: 32, 8>}, {pipeline_mode = #tpu.pipeline_mode<synchronous>, transform_indices = @transform_16, window_bounds = array<i64: 1, 8>}, {pipeline_mode = #tpu.pipeline_mode<synchronous>, transform_indices = @transform_17, window_bounds = array<i64: 32, 8>}, {pipeline_mode = #tpu.pipeline_mode<synchronous>, transform_indices = @transform_18, window_bounds = array<i64: 1, 8>}, {pipeline_mode = #tpu.pipeline_mode<synchronous>, transform_indices = @transform_19, window_bounds = array<i64: 2, 8>}, {pipeline_mode = #tpu.pipeline_mode<synchronous>, transform_indices = @transform_20, window_bounds = array<i64: 2, 8>}, {transform_indices = @transform_21, window_bounds = array<i64: 1, 1>}]} {
    %cst = arith.constant 0.000000e+00 : f32
    %0 = vector.broadcast %cst : f32 to vector<64x16xf32>
    %c0 = arith.constant 0 : index
    %c0_0 = arith.constant 0 : index
    %1 = vector.load %arg23[%c0, %c0_0] : memref<64x16xf32, #tpu.memory_space<vmem>>, vector<64x16xf32>
    tpu.vector_store %arg23[%c0, %c0_0], %0 {strides = array<i32>} : memref<64x16xf32, #tpu.memory_space<vmem>>, vector<64x16xf32>,
    %c0_1 = arith.constant 0 : index
    %c0_2 = arith.constant 0 : index
    %2 = vector.load %arg1[%c0_1, %c0_2] : memref<32x11xf32, #tpu.memory_space<vmem>>, vector<32x11xf32>
    %c16 = arith.constant 16 : index
    %c0_3 = arith.constant 0 : index
    %3 = vector.load %arg23[%c16, %c0_3] : memref<64x16xf32, #tpu.memory_space<vmem>>, vector<32x11xf32>
    tpu.vector_store %arg23[%c16, %c0_3], %2 {strides = array<i32>} : memref<64x16xf32, #tpu.memory_space<vmem>>, vector<32x11xf32>,
    %c0_4 = arith.constant 0 : index
    %c0_5 = arith.constant 0 : index
    %4 = vector.load %arg23[%c0_4, %c0_5] : memref<64x16xf32, #tpu.memory_space<vmem>>, vector<64x16xf32>
    %cst_6 = arith.constant 0.000000e+00 : f32
    %5 = vector.broadcast %cst_6 : f32 to vector<32x16xf32>
    %6 = vector.extract_strided_slice %4 {offsets = [14, 0], sizes = [32, 11], strides = [1, 1]} : vector<64x16xf32> to vector<32x11xf32>
    %c0_7 = arith.constant 0 : index
    %c0_8 = arith.constant 0 : index
    %c0_9 = arith.constant 0 : index
    %7 = vector.load %arg2[%c0_7, %c0_8, %c0_9] : memref<3x11x16xf32, #tpu.memory_space<vmem>>, vector<1x11x16xf32>
    %8 = vector.shape_cast %7 : vector<1x11x16xf32> to vector<11x16xf32>
    %cst_10 = arith.constant dense<0.000000e+00> : vector<32x16xf32>
    %9 = tpu.matmul %6, %8, %cst_10 {dimension_numbers = #tpu.dot_dimension_numbers<[1], [0], [0], [1], [0, 0, 1, 1], [], []>} : vector<32x11xf32>, vector<11x16xf32>, vector<32x16xf32> -> vector<32x16xf32>
    %10 = arith.addf %5, %9 : vector<32x16xf32>
    %11 = vector.extract_strided_slice %4 {offsets = [16, 0], sizes = [32, 11], strides = [1, 1]} : vector<64x16xf32> to vector<32x11xf32>
    %c1 = arith.constant 1 : index
    %c0_11 = arith.constant 0 : index
    %c0_12 = arith.constant 0 : index
    %12 = vector.load %arg2[%c1, %c0_11, %c0_12] : memref<3x11x16xf32, #tpu.memory_space<vmem>>, vector<1x11x16xf32>
    %13 = vector.shape_cast %12 : vector<1x11x16xf32> to vector<11x16xf32>
    %cst_13 = arith.constant dense<0.000000e+00> : vector<32x16xf32>
    %14 = tpu.matmul %11, %13, %cst_13 {dimension_numbers = #tpu.dot_dimension_numbers<[1], [0], [0], [1], [0, 0, 1, 1], [], []>} : vector<32x11xf32>, vector<11x16xf32>, vector<32x16xf32> -> vector<32x16xf32>
    %15 = arith.addf %10, %14 : vector<32x16xf32>
    %16 = vector.extract_strided_slice %4 {offsets = [18, 0], sizes = [32, 11], strides = [1, 1]} : vector<64x16xf32> to vector<32x11xf32>
    %c2 = arith.constant 2 : index
    %c0_14 = arith.constant 0 : index
    %c0_15 = arith.constant 0 : index
    %17 = vector.load %arg2[%c2, %c0_14, %c0_15] : memref<3x11x16xf32, #tpu.memory_space<vmem>>, vector<1x11x16xf32>
    %18 = vector.shape_cast %17 : vector<1x11x16xf32> to vector<11x16xf32>
    %cst_16 = arith.constant dense<0.000000e+00> : vector<32x16xf32>
    %19 = tpu.matmul %16, %18, %cst_16 {dimension_numbers = #tpu.dot_dimension_numbers<[1], [0], [0], [1], [0, 0, 1, 1], [], []>} : vector<32x11xf32>, vector<11x16xf32>, vector<32x16xf32> -> vector<32x16xf32>
    %20 = arith.addf %15, %19 : vector<32x16xf32>
    %c0_17 = arith.constant 0 : index
    %c0_18 = arith.constant 0 : index
    %21 = vector.load %arg3[%c0_17, %c0_18] : memref<1x16xf32, #tpu.memory_space<vmem>>, vector<1x16xf32>
    %22 = vector.broadcast %21 : vector<1x16xf32> to vector<32x16xf32>
    %23 = arith.addf %20, %22 : vector<32x16xf32>
    %cst_19 = arith.constant 0.000000e+00 : f32
    %24 = vector.broadcast %cst_19 : f32 to vector<32x16xf32>
    %25 = arith.cmpf oge, %23, %24 : vector<32x16xf32>
    %cst_20 = arith.constant 0.00999999977 : f32
    %26 = vector.broadcast %cst_20 : f32 to vector<32x16xf32>
    %27 = arith.mulf %26, %23 : vector<32x16xf32>
    %28 = arith.select %25, %23, %27 : vector<32x16xi1>, vector<32x16xf32>
    %c16_21 = arith.constant 16 : index
    %c0_22 = arith.constant 0 : index
    %29 = vector.load %arg23[%c16_21, %c0_22] : memref<64x16xf32, #tpu.memory_space<vmem>>, vector<32x16xf32>
    tpu.vector_store %arg23[%c16_21, %c0_22], %28 {strides = array<i32>} : memref<64x16xf32, #tpu.memory_space<vmem>>, vector<32x16xf32>,
    %c0_23 = arith.constant 0 : index
    %c0_24 = arith.constant 0 : index
    %30 = vector.load %arg23[%c0_23, %c0_24] : memref<64x16xf32, #tpu.memory_space<vmem>>, vector<64x16xf32>
    %cst_25 = arith.constant 0.000000e+00 : f32
    %31 = vector.broadcast %cst_25 : f32 to vector<32x16xf32>
    %32 = vector.extract_strided_slice %30 {offsets = [14, 0], sizes = [32, 16], strides = [1, 1]} : vector<64x16xf32> to vector<32x16xf32>
    %c0_26 = arith.constant 0 : index
    %c0_27 = arith.constant 0 : index
    %c0_28 = arith.constant 0 : index
    %33 = vector.load %arg4[%c0_26, %c0_27, %c0_28] : memref<3x16x16xf32, #tpu.memory_space<vmem>>, vector<1x16x16xf32>
    %34 = vector.shape_cast %33 : vector<1x16x16xf32> to vector<16x16xf32>
    %cst_29 = arith.constant dense<0.000000e+00> : vector<32x16xf32>
    %35 = tpu.matmul %32, %34, %cst_29 {dimension_numbers = #tpu.dot_dimension_numbers<[1], [0], [0], [1], [0, 0, 1, 1], [], []>} : vector<32x16xf32>, vector<16x16xf32>, vector<32x16xf32> -> vector<32x16xf32>
    %36 = arith.addf %31, %35 : vector<32x16xf32>
    %37 = vector.extract_strided_slice %30 {offsets = [16, 0], sizes = [32, 16], strides = [1, 1]} : vector<64x16xf32> to vector<32x16xf32>
    %c1_30 = arith.constant 1 : index
    %c0_31 = arith.constant 0 : index
    %c0_32 = arith.constant 0 : index
    %38 = vector.load %arg4[%c1_30, %c0_31, %c0_32] : memref<3x16x16xf32, #tpu.memory_space<vmem>>, vector<1x16x16xf32>
    %39 = vector.shape_cast %38 : vector<1x16x16xf32> to vector<16x16xf32>
    %cst_33 = arith.constant dense<0.000000e+00> : vector<32x16xf32>
    %40 = tpu.matmul %37, %39, %cst_33 {dimension_numbers = #tpu.dot_dimension_numbers<[1], [0], [0], [1], [0, 0, 1, 1], [], []>} : vector<32x16xf32>, vector<16x16xf32>, vector<32x16xf32> -> vector<32x16xf32>
    %41 = arith.addf %36, %40 : vector<32x16xf32>
    %42 = vector.extract_strided_slice %30 {offsets = [18, 0], sizes = [32, 16], strides = [1, 1]} : vector<64x16xf32> to vector<32x16xf32>
    %c2_34 = arith.constant 2 : index
    %c0_35 = arith.constant 0 : index
    %c0_36 = arith.constant 0 : index
    %43 = vector.load %arg4[%c2_34, %c0_35, %c0_36] : memref<3x16x16xf32, #tpu.memory_space<vmem>>, vector<1x16x16xf32>
    %44 = vector.shape_cast %43 : vector<1x16x16xf32> to vector<16x16xf32>
    %cst_37 = arith.constant dense<0.000000e+00> : vector<32x16xf32>
    %45 = tpu.matmul %42, %44, %cst_37 {dimension_numbers = #tpu.dot_dimension_numbers<[1], [0], [0], [1], [0, 0, 1, 1], [], []>} : vector<32x16xf32>, vector<16x16xf32>, vector<32x16xf32> -> vector<32x16xf32>
    %46 = arith.addf %41, %45 : vector<32x16xf32>
    %c0_38 = arith.constant 0 : index
    %c0_39 = arith.constant 0 : index
    %47 = vector.load %arg5[%c0_38, %c0_39] : memref<1x16xf32, #tpu.memory_space<vmem>>, vector<1x16xf32>
    %48 = vector.broadcast %47 : vector<1x16xf32> to vector<32x16xf32>
    %49 = arith.addf %46, %48 : vector<32x16xf32>
    %cst_40 = arith.constant 0.000000e+00 : f32
    %50 = vector.broadcast %cst_40 : f32 to vector<32x16xf32>
    %51 = arith.cmpf oge, %49, %50 : vector<32x16xf32>
    %cst_41 = arith.constant 0.00999999977 : f32
    %52 = vector.broadcast %cst_41 : f32 to vector<32x16xf32>
    %53 = arith.mulf %52, %49 : vector<32x16xf32>
    %54 = arith.select %51, %49, %53 : vector<32x16xi1>, vector<32x16xf32>
    %c16_42 = arith.constant 16 : index
    %c0_43 = arith.constant 0 : index
    %55 = vector.load %arg23[%c16_42, %c0_43] : memref<64x16xf32, #tpu.memory_space<vmem>>, vector<32x16xf32>
    tpu.vector_store %arg23[%c16_42, %c0_43], %54 {strides = array<i32>} : memref<64x16xf32, #tpu.memory_space<vmem>>, vector<32x16xf32>,
    %c0_44 = arith.constant 0 : index
    %c0_45 = arith.constant 0 : index
    %56 = vector.load %arg23[%c0_44, %c0_45] : memref<64x16xf32, #tpu.memory_space<vmem>>, vector<64x16xf32>
    %cst_46 = arith.constant 0.000000e+00 : f32
    %57 = vector.broadcast %cst_46 : f32 to vector<32x16xf32>
    %58 = vector.extract_strided_slice %56 {offsets = [14, 0], sizes = [32, 16], strides = [1, 1]} : vector<64x16xf32> to vector<32x16xf32>
    %c0_47 = arith.constant 0 : index
    %c0_48 = arith.constant 0 : index
    %c0_49 = arith.constant 0 : index
    %59 = vector.load %arg6[%c0_47, %c0_48, %c0_49] : memref<3x16x16xf32, #tpu.memory_space<vmem>>, vector<1x16x16xf32>
    %60 = vector.shape_cast %59 : vector<1x16x16xf32> to vector<16x16xf32>
    %cst_50 = arith.constant dense<0.000000e+00> : vector<32x16xf32>
    %61 = tpu.matmul %58, %60, %cst_50 {dimension_numbers = #tpu.dot_dimension_numbers<[1], [0], [0], [1], [0, 0, 1, 1], [], []>} : vector<32x16xf32>, vector<16x16xf32>, vector<32x16xf32> -> vector<32x16xf32>
    %62 = arith.addf %57, %61 : vector<32x16xf32>
    %63 = vector.extract_strided_slice %56 {offsets = [16, 0], sizes = [32, 16], strides = [1, 1]} : vector<64x16xf32> to vector<32x16xf32>
    %c1_51 = arith.constant 1 : index
    %c0_52 = arith.constant 0 : index
    %c0_53 = arith.constant 0 : index
    %64 = vector.load %arg6[%c1_51, %c0_52, %c0_53] : memref<3x16x16xf32, #tpu.memory_space<vmem>>, vector<1x16x16xf32>
    %65 = vector.shape_cast %64 : vector<1x16x16xf32> to vector<16x16xf32>
    %cst_54 = arith.constant dense<0.000000e+00> : vector<32x16xf32>
    %66 = tpu.matmul %63, %65, %cst_54 {dimension_numbers = #tpu.dot_dimension_numbers<[1], [0], [0], [1], [0, 0, 1, 1], [], []>} : vector<32x16xf32>, vector<16x16xf32>, vector<32x16xf32> -> vector<32x16xf32>
    %67 = arith.addf %62, %66 : vector<32x16xf32>
    %68 = vector.extract_strided_slice %56 {offsets = [18, 0], sizes = [32, 16], strides = [1, 1]} : vector<64x16xf32> to vector<32x16xf32>
    %c2_55 = arith.constant 2 : index
    %c0_56 = arith.constant 0 : index
    %c0_57 = arith.constant 0 : index
    %69 = vector.load %arg6[%c2_55, %c0_56, %c0_57] : memref<3x16x16xf32, #tpu.memory_space<vmem>>, vector<1x16x16xf32>
    %70 = vector.shape_cast %69 : vector<1x16x16xf32> to vector<16x16xf32>
    %cst_58 = arith.constant dense<0.000000e+00> : vector<32x16xf32>
    %71 = tpu.matmul %68, %70, %cst_58 {dimension_numbers = #tpu.dot_dimension_numbers<[1], [0], [0], [1], [0, 0, 1, 1], [], []>} : vector<32x16xf32>, vector<16x16xf32>, vector<32x16xf32> -> vector<32x16xf32>
    %72 = arith.addf %67, %71 : vector<32x16xf32>
    %c0_59 = arith.constant 0 : index
    %c0_60 = arith.constant 0 : index
    %73 = vector.load %arg7[%c0_59, %c0_60] : memref<1x16xf32, #tpu.memory_space<vmem>>, vector<1x16xf32>
    %74 = vector.broadcast %73 : vector<1x16xf32> to vector<32x16xf32>
    %75 = arith.addf %72, %74 : vector<32x16xf32>
    %cst_61 = arith.constant 0.000000e+00 : f32
    %76 = vector.broadcast %cst_61 : f32 to vector<32x16xf32>
    %77 = arith.cmpf oge, %75, %76 : vector<32x16xf32>
    %cst_62 = arith.constant 0.00999999977 : f32
    %78 = vector.broadcast %cst_62 : f32 to vector<32x16xf32>
    %79 = arith.mulf %78, %75 : vector<32x16xf32>
    %80 = arith.select %77, %75, %79 : vector<32x16xi1>, vector<32x16xf32>
    %c0_63 = arith.constant 0 : index
    %c0_64 = arith.constant 0 : index
    %81 = vector.load %arg8[%c0_63, %c0_64] : memref<16x96xf32, #tpu.memory_space<vmem>>, vector<16x96xf32>
    %cst_65 = arith.constant dense<0.000000e+00> : vector<32x96xf32>
    %82 = tpu.matmul %80, %81, %cst_65 {dimension_numbers = #tpu.dot_dimension_numbers<[1], [0], [0], [1], [0, 0, 1, 1], [], []>} : vector<32x16xf32>, vector<16x96xf32>, vector<32x96xf32> -> vector<32x96xf32>
    %c0_66 = arith.constant 0 : index
    %c0_67 = arith.constant 0 : index
    %83 = vector.load %arg10[%c0_66, %c0_67] : memref<1x96xf32, #tpu.memory_space<vmem>>, vector<1x96xf32>
    %84 = vector.broadcast %83 : vector<1x96xf32> to vector<32x96xf32>
    %85 = arith.addf %82, %84 : vector<32x96xf32>
    %c0_68 = arith.constant 0 : index
    %c0_69 = arith.constant 0 : index
    %86 = vector.load %arg9[%c0_68, %c0_69] : memref<32x96xf32, #tpu.memory_space<vmem>>, vector<32x96xf32>
    %c0_70 = arith.constant 0 : index
    %c0_71 = arith.constant 0 : index
    %87 = vector.load %arg11[%c0_70, %c0_71] : memref<1x96xf32, #tpu.memory_space<vmem>>, vector<1x96xf32>
    %c0_72 = arith.constant 0 : index
    %c0_73 = arith.constant 0 : index
    %88 = vector.load %arg12[%c0_72, %c0_73] : memref<32x96xf32, #tpu.memory_space<vmem>>, vector<32x96xf32>
    %c0_74 = arith.constant 0 : index
    %c0_75 = arith.constant 0 : index
    %89 = vector.load %arg14[%c0_74, %c0_75] : memref<1x96xf32, #tpu.memory_space<vmem>>, vector<1x96xf32>
    %c0_76 = arith.constant 0 : index
    %c0_77 = arith.constant 0 : index
    %90 = vector.load %arg13[%c0_76, %c0_77] : memref<32x96xf32, #tpu.memory_space<vmem>>, vector<32x96xf32>
    %c0_78 = arith.constant 0 : index
    %c0_79 = arith.constant 0 : index
    %91 = vector.load %arg15[%c0_78, %c0_79] : memref<1x96xf32, #tpu.memory_space<vmem>>, vector<1x96xf32>
    %cst_80 = arith.constant 0.000000e+00 : f32
    %92 = vector.broadcast %cst_80 : f32 to vector<2x32xf32>
    %cst_81 = arith.constant 0.000000e+00 : f32
    %93 = vector.broadcast %cst_81 : f32 to vector<2x32xf32>
    %94 = vector.extract_strided_slice %85 {offsets = [0, 0], sizes = [2, 96], strides = [1, 1]} : vector<32x96xf32> to vector<2x96xf32>
    %cst_82 = arith.constant dense<0.000000e+00> : vector<2x96xf32>
    %95 = tpu.matmul %92, %86, %cst_82 {dimension_numbers = #tpu.dot_dimension_numbers<[1], [0], [0], [1], [0, 0, 1, 1], [], []>} : vector<2x32xf32>, vector<32x96xf32>, vector<2x96xf32> -> vector<2x96xf32>
    %96 = vector.broadcast %87 : vector<1x96xf32> to vector<2x96xf32>
    %97 = arith.addf %95, %96 : vector<2x96xf32>
    %98 = vector.extract_strided_slice %94 {offsets = [0, 0], sizes = [2, 32], strides = [1, 1]} : vector<2x96xf32> to vector<2x32xf32>
    %99 = vector.extract_strided_slice %97 {offsets = [0, 0], sizes = [2, 32], strides = [1, 1]} : vector<2x96xf32> to vector<2x32xf32>
    %100 = arith.addf %98, %99 : vector<2x32xf32>
    %101 = arith.negf %100 : vector<2x32xf32>
    %102 = math.exp %101 : vector<2x32xf32>
    %cst_83 = arith.constant 1.000000e+00 : f32
    %103 = vector.broadcast %cst_83 : f32 to vector<2x32xf32>
    %104 = arith.addf %103, %102 : vector<2x32xf32>
    %105 = arith.divf %103, %104 : vector<2x32xf32>
    %106 = vector.extract_strided_slice %94 {offsets = [0, 32], sizes = [2, 32], strides = [1, 1]} : vector<2x96xf32> to vector<2x32xf32>
    %107 = vector.extract_strided_slice %97 {offsets = [0, 32], sizes = [2, 32], strides = [1, 1]} : vector<2x96xf32> to vector<2x32xf32>
    %108 = arith.addf %106, %107 : vector<2x32xf32>
    %109 = arith.negf %108 : vector<2x32xf32>
    %110 = math.exp %109 : vector<2x32xf32>
    %cst_84 = arith.constant 1.000000e+00 : f32
    %111 = vector.broadcast %cst_84 : f32 to vector<2x32xf32>
    %112 = arith.addf %111, %110 : vector<2x32xf32>
    %113 = arith.divf %111, %112 : vector<2x32xf32>
    %114 = vector.extract_strided_slice %94 {offsets = [0, 64], sizes = [2, 32], strides = [1, 1]} : vector<2x96xf32> to vector<2x32xf32>
    %115 = vector.extract_strided_slice %97 {offsets = [0, 64], sizes = [2, 32], strides = [1, 1]} : vector<2x96xf32> to vector<2x32xf32>
    %116 = arith.mulf %105, %115 : vector<2x32xf32>
    %117 = arith.addf %114, %116 : vector<2x32xf32>
    %118 = math.tanh %117 : vector<2x32xf32>
    %cst_85 = arith.constant 1.000000e+00 : f32
    %119 = vector.broadcast %cst_85 : f32 to vector<2x32xf32>
    %120 = arith.subf %119, %113 : vector<2x32xf32>
    %121 = arith.mulf %120, %118 : vector<2x32xf32>
    %122 = arith.mulf %113, %92 : vector<2x32xf32>
    %123 = arith.addf %121, %122 : vector<2x32xf32>
    %cst_86 = arith.constant dense<0.000000e+00> : vector<2x96xf32>
    %124 = tpu.matmul %123, %88, %cst_86 {dimension_numbers = #tpu.dot_dimension_numbers<[1], [0], [0], [1], [0, 0, 1, 1], [], []>} : vector<2x32xf32>, vector<32x96xf32>, vector<2x96xf32> -> vector<2x96xf32>
    %125 = vector.broadcast %89 : vector<1x96xf32> to vector<2x96xf32>
    %126 = arith.addf %124, %125 : vector<2x96xf32>
    %cst_87 = arith.constant dense<0.000000e+00> : vector<2x96xf32>
    %127 = tpu.matmul %93, %90, %cst_87 {dimension_numbers = #tpu.dot_dimension_numbers<[1], [0], [0], [1], [0, 0, 1, 1], [], []>} : vector<2x32xf32>, vector<32x96xf32>, vector<2x96xf32> -> vector<2x96xf32>
    %128 = vector.broadcast %91 : vector<1x96xf32> to vector<2x96xf32>
    %129 = arith.addf %127, %128 : vector<2x96xf32>
    %130 = vector.extract_strided_slice %126 {offsets = [0, 0], sizes = [2, 32], strides = [1, 1]} : vector<2x96xf32> to vector<2x32xf32>
    %131 = vector.extract_strided_slice %129 {offsets = [0, 0], sizes = [2, 32], strides = [1, 1]} : vector<2x96xf32> to vector<2x32xf32>
    %132 = arith.addf %130, %131 : vector<2x32xf32>
    %133 = arith.negf %132 : vector<2x32xf32>
    %134 = math.exp %133 : vector<2x32xf32>
    %cst_88 = arith.constant 1.000000e+00 : f32
    %135 = vector.broadcast %cst_88 : f32 to vector<2x32xf32>
    %136 = arith.addf %135, %134 : vector<2x32xf32>
    %137 = arith.divf %135, %136 : vector<2x32xf32>
    %138 = vector.extract_strided_slice %126 {offsets = [0, 32], sizes = [2, 32], strides = [1, 1]} : vector<2x96xf32> to vector<2x32xf32>
    %139 = vector.extract_strided_slice %129 {offsets = [0, 32], sizes = [2, 32], strides = [1, 1]} : vector<2x96xf32> to vector<2x32xf32>
    %140 = arith.addf %138, %139 : vector<2x32xf32>
    %141 = arith.negf %140 : vector<2x32xf32>
    %142 = math.exp %141 : vector<2x32xf32>
    %cst_89 = arith.constant 1.000000e+00 : f32
    %143 = vector.broadcast %cst_89 : f32 to vector<2x32xf32>
    %144 = arith.addf %143, %142 : vector<2x32xf32>
    %145 = arith.divf %143, %144 : vector<2x32xf32>
    %146 = vector.extract_strided_slice %126 {offsets = [0, 64], sizes = [2, 32], strides = [1, 1]} : vector<2x96xf32> to vector<2x32xf32>
    %147 = vector.extract_strided_slice %129 {offsets = [0, 64], sizes = [2, 32], strides = [1, 1]} : vector<2x96xf32> to vector<2x32xf32>
    %148 = arith.mulf %137, %147 : vector<2x32xf32>
    %149 = arith.addf %146, %148 : vector<2x32xf32>
    %150 = math.tanh %149 : vector<2x32xf32>
    %cst_90 = arith.constant 1.000000e+00 : f32
    %151 = vector.broadcast %cst_90 : f32 to vector<2x32xf32>
    %152 = arith.subf %151, %145 : vector<2x32xf32>
    %153 = arith.mulf %152, %150 : vector<2x32xf32>
    %154 = arith.mulf %145, %93 : vector<2x32xf32>
    %155 = arith.addf %153, %154 : vector<2x32xf32>
    %156 = vector.extract_strided_slice %85 {offsets = [2, 0], sizes = [2, 96], strides = [1, 1]} : vector<32x96xf32> to vector<2x96xf32>
    %cst_91 = arith.constant dense<0.000000e+00> : vector<2x96xf32>
    %157 = tpu.matmul %123, %86, %cst_91 {dimension_numbers = #tpu.dot_dimension_numbers<[1], [0], [0], [1], [0, 0, 1, 1], [], []>} : vector<2x32xf32>, vector<32x96xf32>, vector<2x96xf32> -> vector<2x96xf32>
    %158 = vector.broadcast %87 : vector<1x96xf32> to vector<2x96xf32>
    %159 = arith.addf %157, %158 : vector<2x96xf32>
    %160 = vector.extract_strided_slice %156 {offsets = [0, 0], sizes = [2, 32], strides = [1, 1]} : vector<2x96xf32> to vector<2x32xf32>
    %161 = vector.extract_strided_slice %159 {offsets = [0, 0], sizes = [2, 32], strides = [1, 1]} : vector<2x96xf32> to vector<2x32xf32>
    %162 = arith.addf %160, %161 : vector<2x32xf32>
    %163 = arith.negf %162 : vector<2x32xf32>
    %164 = math.exp %163 : vector<2x32xf32>
    %cst_92 = arith.constant 1.000000e+00 : f32
    %165 = vector.broadcast %cst_92 : f32 to vector<2x32xf32>
    %166 = arith.addf %165, %164 : vector<2x32xf32>
    %167 = arith.divf %165, %166 : vector<2x32xf32>
    %168 = vector.extract_strided_slice %156 {offsets = [0, 32], sizes = [2, 32], strides = [1, 1]} : vector<2x96xf32> to vector<2x32xf32>
    %169 = vector.extract_strided_slice %159 {offsets = [0, 32], sizes = [2, 32], strides = [1, 1]} : vector<2x96xf32> to vector<2x32xf32>
    %170 = arith.addf %168, %169 : vector<2x32xf32>
    %171 = arith.negf %170 : vector<2x32xf32>
    %172 = math.exp %171 : vector<2x32xf32>
    %cst_93 = arith.constant 1.000000e+00 : f32
    %173 = vector.broadcast %cst_93 : f32 to vector<2x32xf32>
    %174 = arith.addf %173, %172 : vector<2x32xf32>
    %175 = arith.divf %173, %174 : vector<2x32xf32>
    %176 = vector.extract_strided_slice %156 {offsets = [0, 64], sizes = [2, 32], strides = [1, 1]} : vector<2x96xf32> to vector<2x32xf32>
    %177 = vector.extract_strided_slice %159 {offsets = [0, 64], sizes = [2, 32], strides = [1, 1]} : vector<2x96xf32> to vector<2x32xf32>
    %178 = arith.mulf %167, %177 : vector<2x32xf32>
    %179 = arith.addf %176, %178 : vector<2x32xf32>
    %180 = math.tanh %179 : vector<2x32xf32>
    %cst_94 = arith.constant 1.000000e+00 : f32
    %181 = vector.broadcast %cst_94 : f32 to vector<2x32xf32>
    %182 = arith.subf %181, %175 : vector<2x32xf32>
    %183 = arith.mulf %182, %180 : vector<2x32xf32>
    %184 = arith.mulf %175, %123 : vector<2x32xf32>
    %185 = arith.addf %183, %184 : vector<2x32xf32>
    %cst_95 = arith.constant dense<0.000000e+00> : vector<2x96xf32>
    %186 = tpu.matmul %185, %88, %cst_95 {dimension_numbers = #tpu.dot_dimension_numbers<[1], [0], [0], [1], [0, 0, 1, 1], [], []>} : vector<2x32xf32>, vector<32x96xf32>, vector<2x96xf32> -> vector<2x96xf32>
    %187 = vector.broadcast %89 : vector<1x96xf32> to vector<2x96xf32>
    %188 = arith.addf %186, %187 : vector<2x96xf32>
    %cst_96 = arith.constant dense<0.000000e+00> : vector<2x96xf32>
    %189 = tpu.matmul %155, %90, %cst_96 {dimension_numbers = #tpu.dot_dimension_numbers<[1], [0], [0], [1], [0, 0, 1, 1], [], []>} : vector<2x32xf32>, vector<32x96xf32>, vector<2x96xf32> -> vector<2x96xf32>
    %190 = vector.broadcast %91 : vector<1x96xf32> to vector<2x96xf32>
    %191 = arith.addf %189, %190 : vector<2x96xf32>
    %192 = vector.extract_strided_slice %188 {offsets = [0, 0], sizes = [2, 32], strides = [1, 1]} : vector<2x96xf32> to vector<2x32xf32>
    %193 = vector.extract_strided_slice %191 {offsets = [0, 0], sizes = [2, 32], strides = [1, 1]} : vector<2x96xf32> to vector<2x32xf32>
    %194 = arith.addf %192, %193 : vector<2x32xf32>
    %195 = arith.negf %194 : vector<2x32xf32>
    %196 = math.exp %195 : vector<2x32xf32>
    %cst_97 = arith.constant 1.000000e+00 : f32
    %197 = vector.broadcast %cst_97 : f32 to vector<2x32xf32>
    %198 = arith.addf %197, %196 : vector<2x32xf32>
    %199 = arith.divf %197, %198 : vector<2x32xf32>
    %200 = vector.extract_strided_slice %188 {offsets = [0, 32], sizes = [2, 32], strides = [1, 1]} : vector<2x96xf32> to vector<2x32xf32>
    %201 = vector.extract_strided_slice %191 {offsets = [0, 32], sizes = [2, 32], strides = [1, 1]} : vector<2x96xf32> to vector<2x32xf32>
    %202 = arith.addf %200, %201 : vector<2x32xf32>
    %203 = arith.negf %202 : vector<2x32xf32>
    %204 = math.exp %203 : vector<2x32xf32>
    %cst_98 = arith.constant 1.000000e+00 : f32
    %205 = vector.broadcast %cst_98 : f32 to vector<2x32xf32>
    %206 = arith.addf %205, %204 : vector<2x32xf32>
    %207 = arith.divf %205, %206 : vector<2x32xf32>
    %208 = vector.extract_strided_slice %188 {offsets = [0, 64], sizes = [2, 32], strides = [1, 1]} : vector<2x96xf32> to vector<2x32xf32>
    %209 = vector.extract_strided_slice %191 {offsets = [0, 64], sizes = [2, 32], strides = [1, 1]} : vector<2x96xf32> to vector<2x32xf32>
    %210 = arith.mulf %199, %209 : vector<2x32xf32>
    %211 = arith.addf %208, %210 : vector<2x32xf32>
    %212 = math.tanh %211 : vector<2x32xf32>
    %cst_99 = arith.constant 1.000000e+00 : f32
    %213 = vector.broadcast %cst_99 : f32 to vector<2x32xf32>
    %214 = arith.subf %213, %207 : vector<2x32xf32>
    %215 = arith.mulf %214, %212 : vector<2x32xf32>
    %216 = arith.mulf %207, %155 : vector<2x32xf32>
    %217 = arith.addf %215, %216 : vector<2x32xf32>
    %218 = vector.extract_strided_slice %85 {offsets = [4, 0], sizes = [2, 96], strides = [1, 1]} : vector<32x96xf32> to vector<2x96xf32>
    %cst_100 = arith.constant dense<0.000000e+00> : vector<2x96xf32>
    %219 = tpu.matmul %185, %86, %cst_100 {dimension_numbers = #tpu.dot_dimension_numbers<[1], [0], [0], [1], [0, 0, 1, 1], [], []>} : vector<2x32xf32>, vector<32x96xf32>, vector<2x96xf32> -> vector<2x96xf32>
    %220 = vector.broadcast %87 : vector<1x96xf32> to vector<2x96xf32>
    %221 = arith.addf %219, %220 : vector<2x96xf32>
    %222 = vector.extract_strided_slice %218 {offsets = [0, 0], sizes = [2, 32], strides = [1, 1]} : vector<2x96xf32> to vector<2x32xf32>
    %223 = vector.extract_strided_slice %221 {offsets = [0, 0], sizes = [2, 32], strides = [1, 1]} : vector<2x96xf32> to vector<2x32xf32>
    %224 = arith.addf %222, %223 : vector<2x32xf32>
    %225 = arith.negf %224 : vector<2x32xf32>
    %226 = math.exp %225 : vector<2x32xf32>
    %cst_101 = arith.constant 1.000000e+00 : f32
    %227 = vector.broadcast %cst_101 : f32 to vector<2x32xf32>
    %228 = arith.addf %227, %226 : vector<2x32xf32>
    %229 = arith.divf %227, %228 : vector<2x32xf32>
    %230 = vector.extract_strided_slice %218 {offsets = [0, 32], sizes = [2, 32], strides = [1, 1]} : vector<2x96xf32> to vector<2x32xf32>
    %231 = vector.extract_strided_slice %221 {offsets = [0, 32], sizes = [2, 32], strides = [1, 1]} : vector<2x96xf32> to vector<2x32xf32>
    %232 = arith.addf %230, %231 : vector<2x32xf32>
    %233 = arith.negf %232 : vector<2x32xf32>
    %234 = math.exp %233 : vector<2x32xf32>
    %cst_102 = arith.constant 1.000000e+00 : f32
    %235 = vector.broadcast %cst_102 : f32 to vector<2x32xf32>
    %236 = arith.addf %235, %234 : vector<2x32xf32>
    %237 = arith.divf %235, %236 : vector<2x32xf32>
    %238 = vector.extract_strided_slice %218 {offsets = [0, 64], sizes = [2, 32], strides = [1, 1]} : vector<2x96xf32> to vector<2x32xf32>
    %239 = vector.extract_strided_slice %221 {offsets = [0, 64], sizes = [2, 32], strides = [1, 1]} : vector<2x96xf32> to vector<2x32xf32>
    %240 = arith.mulf %229, %239 : vector<2x32xf32>
    %241 = arith.addf %238, %240 : vector<2x32xf32>
    %242 = math.tanh %241 : vector<2x32xf32>
    %cst_103 = arith.constant 1.000000e+00 : f32
    %243 = vector.broadcast %cst_103 : f32 to vector<2x32xf32>
    %244 = arith.subf %243, %237 : vector<2x32xf32>
    %245 = arith.mulf %244, %242 : vector<2x32xf32>
    %246 = arith.mulf %237, %185 : vector<2x32xf32>
    %247 = arith.addf %245, %246 : vector<2x32xf32>
    %cst_104 = arith.constant dense<0.000000e+00> : vector<2x96xf32>
    %248 = tpu.matmul %247, %88, %cst_104 {dimension_numbers = #tpu.dot_dimension_numbers<[1], [0], [0], [1], [0, 0, 1, 1], [], []>} : vector<2x32xf32>, vector<32x96xf32>, vector<2x96xf32> -> vector<2x96xf32>
    %249 = vector.broadcast %89 : vector<1x96xf32> to vector<2x96xf32>
    %250 = arith.addf %248, %249 : vector<2x96xf32>
    %cst_105 = arith.constant dense<0.000000e+00> : vector<2x96xf32>
    %251 = tpu.matmul %217, %90, %cst_105 {dimension_numbers = #tpu.dot_dimension_numbers<[1], [0], [0], [1], [0, 0, 1, 1], [], []>} : vector<2x32xf32>, vector<32x96xf32>, vector<2x96xf32> -> vector<2x96xf32>
    %252 = vector.broadcast %91 : vector<1x96xf32> to vector<2x96xf32>
    %253 = arith.addf %251, %252 : vector<2x96xf32>
    %254 = vector.extract_strided_slice %250 {offsets = [0, 0], sizes = [2, 32], strides = [1, 1]} : vector<2x96xf32> to vector<2x32xf32>
    %255 = vector.extract_strided_slice %253 {offsets = [0, 0], sizes = [2, 32], strides = [1, 1]} : vector<2x96xf32> to vector<2x32xf32>
    %256 = arith.addf %254, %255 : vector<2x32xf32>
    %257 = arith.negf %256 : vector<2x32xf32>
    %258 = math.exp %257 : vector<2x32xf32>
    %cst_106 = arith.constant 1.000000e+00 : f32
    %259 = vector.broadcast %cst_106 : f32 to vector<2x32xf32>
    %260 = arith.addf %259, %258 : vector<2x32xf32>
    %261 = arith.divf %259, %260 : vector<2x32xf32>
    %262 = vector.extract_strided_slice %250 {offsets = [0, 32], sizes = [2, 32], strides = [1, 1]} : vector<2x96xf32> to vector<2x32xf32>
    %263 = vector.extract_strided_slice %253 {offsets = [0, 32], sizes = [2, 32], strides = [1, 1]} : vector<2x96xf32> to vector<2x32xf32>
    %264 = arith.addf %262, %263 : vector<2x32xf32>
    %265 = arith.negf %264 : vector<2x32xf32>
    %266 = math.exp %265 : vector<2x32xf32>
    %cst_107 = arith.constant 1.000000e+00 : f32
    %267 = vector.broadcast %cst_107 : f32 to vector<2x32xf32>
    %268 = arith.addf %267, %266 : vector<2x32xf32>
    %269 = arith.divf %267, %268 : vector<2x32xf32>
    %270 = vector.extract_strided_slice %250 {offsets = [0, 64], sizes = [2, 32], strides = [1, 1]} : vector<2x96xf32> to vector<2x32xf32>
    %271 = vector.extract_strided_slice %253 {offsets = [0, 64], sizes = [2, 32], strides = [1, 1]} : vector<2x96xf32> to vector<2x32xf32>
    %272 = arith.mulf %261, %271 : vector<2x32xf32>
    %273 = arith.addf %270, %272 : vector<2x32xf32>
    %274 = math.tanh %273 : vector<2x32xf32>
    %cst_108 = arith.constant 1.000000e+00 : f32
    %275 = vector.broadcast %cst_108 : f32 to vector<2x32xf32>
    %276 = arith.subf %275, %269 : vector<2x32xf32>
    %277 = arith.mulf %276, %274 : vector<2x32xf32>
    %278 = arith.mulf %269, %217 : vector<2x32xf32>
    %279 = arith.addf %277, %278 : vector<2x32xf32>
    %280 = vector.extract_strided_slice %85 {offsets = [6, 0], sizes = [2, 96], strides = [1, 1]} : vector<32x96xf32> to vector<2x96xf32>
    %cst_109 = arith.constant dense<0.000000e+00> : vector<2x96xf32>
    %281 = tpu.matmul %247, %86, %cst_109 {dimension_numbers = #tpu.dot_dimension_numbers<[1], [0], [0], [1], [0, 0, 1, 1], [], []>} : vector<2x32xf32>, vector<32x96xf32>, vector<2x96xf32> -> vector<2x96xf32>
    %282 = vector.broadcast %87 : vector<1x96xf32> to vector<2x96xf32>
    %283 = arith.addf %281, %282 : vector<2x96xf32>
    %284 = vector.extract_strided_slice %280 {offsets = [0, 0], sizes = [2, 32], strides = [1, 1]} : vector<2x96xf32> to vector<2x32xf32>
    %285 = vector.extract_strided_slice %283 {offsets = [0, 0], sizes = [2, 32], strides = [1, 1]} : vector<2x96xf32> to vector<2x32xf32>
    %286 = arith.addf %284, %285 : vector<2x32xf32>
    %287 = arith.negf %286 : vector<2x32xf32>
    %288 = math.exp %287 : vector<2x32xf32>
    %cst_110 = arith.constant 1.000000e+00 : f32
    %289 = vector.broadcast %cst_110 : f32 to vector<2x32xf32>
    %290 = arith.addf %289, %288 : vector<2x32xf32>
    %291 = arith.divf %289, %290 : vector<2x32xf32>
    %292 = vector.extract_strided_slice %280 {offsets = [0, 32], sizes = [2, 32], strides = [1, 1]} : vector<2x96xf32> to vector<2x32xf32>
    %293 = vector.extract_strided_slice %283 {offsets = [0, 32], sizes = [2, 32], strides = [1, 1]} : vector<2x96xf32> to vector<2x32xf32>
    %294 = arith.addf %292, %293 : vector<2x32xf32>
    %295 = arith.negf %294 : vector<2x32xf32>
    %296 = math.exp %295 : vector<2x32xf32>
    %cst_111 = arith.constant 1.000000e+00 : f32
    %297 = vector.broadcast %cst_111 : f32 to vector<2x32xf32>
    %298 = arith.addf %297, %296 : vector<2x32xf32>
    %299 = arith.divf %297, %298 : vector<2x32xf32>
    %300 = vector.extract_strided_slice %280 {offsets = [0, 64], sizes = [2, 32], strides = [1, 1]} : vector<2x96xf32> to vector<2x32xf32>
    %301 = vector.extract_strided_slice %283 {offsets = [0, 64], sizes = [2, 32], strides = [1, 1]} : vector<2x96xf32> to vector<2x32xf32>
    %302 = arith.mulf %291, %301 : vector<2x32xf32>
    %303 = arith.addf %300, %302 : vector<2x32xf32>
    %304 = math.tanh %303 : vector<2x32xf32>
    %cst_112 = arith.constant 1.000000e+00 : f32
    %305 = vector.broadcast %cst_112 : f32 to vector<2x32xf32>
    %306 = arith.subf %305, %299 : vector<2x32xf32>
    %307 = arith.mulf %306, %304 : vector<2x32xf32>
    %308 = arith.mulf %299, %247 : vector<2x32xf32>
    %309 = arith.addf %307, %308 : vector<2x32xf32>
    %cst_113 = arith.constant dense<0.000000e+00> : vector<2x96xf32>
    %310 = tpu.matmul %309, %88, %cst_113 {dimension_numbers = #tpu.dot_dimension_numbers<[1], [0], [0], [1], [0, 0, 1, 1], [], []>} : vector<2x32xf32>, vector<32x96xf32>, vector<2x96xf32> -> vector<2x96xf32>
    %311 = vector.broadcast %89 : vector<1x96xf32> to vector<2x96xf32>
    %312 = arith.addf %310, %311 : vector<2x96xf32>
    %cst_114 = arith.constant dense<0.000000e+00> : vector<2x96xf32>
    %313 = tpu.matmul %279, %90, %cst_114 {dimension_numbers = #tpu.dot_dimension_numbers<[1], [0], [0], [1], [0, 0, 1, 1], [], []>} : vector<2x32xf32>, vector<32x96xf32>, vector<2x96xf32> -> vector<2x96xf32>
    %314 = vector.broadcast %91 : vector<1x96xf32> to vector<2x96xf32>
    %315 = arith.addf %313, %314 : vector<2x96xf32>
    %316 = vector.extract_strided_slice %312 {offsets = [0, 0], sizes = [2, 32], strides = [1, 1]} : vector<2x96xf32> to vector<2x32xf32>
    %317 = vector.extract_strided_slice %315 {offsets = [0, 0], sizes = [2, 32], strides = [1, 1]} : vector<2x96xf32> to vector<2x32xf32>
    %318 = arith.addf %316, %317 : vector<2x32xf32>
    %319 = arith.negf %318 : vector<2x32xf32>
    %320 = math.exp %319 : vector<2x32xf32>
    %cst_115 = arith.constant 1.000000e+00 : f32
    %321 = vector.broadcast %cst_115 : f32 to vector<2x32xf32>
    %322 = arith.addf %321, %320 : vector<2x32xf32>
    %323 = arith.divf %321, %322 : vector<2x32xf32>
    %324 = vector.extract_strided_slice %312 {offsets = [0, 32], sizes = [2, 32], strides = [1, 1]} : vector<2x96xf32> to vector<2x32xf32>
    %325 = vector.extract_strided_slice %315 {offsets = [0, 32], sizes = [2, 32], strides = [1, 1]} : vector<2x96xf32> to vector<2x32xf32>
    %326 = arith.addf %324, %325 : vector<2x32xf32>
    %327 = arith.negf %326 : vector<2x32xf32>
    %328 = math.exp %327 : vector<2x32xf32>
    %cst_116 = arith.constant 1.000000e+00 : f32
    %329 = vector.broadcast %cst_116 : f32 to vector<2x32xf32>
    %330 = arith.addf %329, %328 : vector<2x32xf32>
    %331 = arith.divf %329, %330 : vector<2x32xf32>
    %332 = vector.extract_strided_slice %312 {offsets = [0, 64], sizes = [2, 32], strides = [1, 1]} : vector<2x96xf32> to vector<2x32xf32>
    %333 = vector.extract_strided_slice %315 {offsets = [0, 64], sizes = [2, 32], strides = [1, 1]} : vector<2x96xf32> to vector<2x32xf32>
    %334 = arith.mulf %323, %333 : vector<2x32xf32>
    %335 = arith.addf %332, %334 : vector<2x32xf32>
    %336 = math.tanh %335 : vector<2x32xf32>
    %cst_117 = arith.constant 1.000000e+00 : f32
    %337 = vector.broadcast %cst_117 : f32 to vector<2x32xf32>
    %338 = arith.subf %337, %331 : vector<2x32xf32>
    %339 = arith.mulf %338, %336 : vector<2x32xf32>
    %340 = arith.mulf %331, %279 : vector<2x32xf32>
    %341 = arith.addf %339, %340 : vector<2x32xf32>
    %342 = vector.extract_strided_slice %85 {offsets = [8, 0], sizes = [2, 96], strides = [1, 1]} : vector<32x96xf32> to vector<2x96xf32>
    %cst_118 = arith.constant dense<0.000000e+00> : vector<2x96xf32>
    %343 = tpu.matmul %309, %86, %cst_118 {dimension_numbers = #tpu.dot_dimension_numbers<[1], [0], [0], [1], [0, 0, 1, 1], [], []>} : vector<2x32xf32>, vector<32x96xf32>, vector<2x96xf32> -> vector<2x96xf32>
    %344 = vector.broadcast %87 : vector<1x96xf32> to vector<2x96xf32>
    %345 = arith.addf %343, %344 : vector<2x96xf32>
    %346 = vector.extract_strided_slice %342 {offsets = [0, 0], sizes = [2, 32], strides = [1, 1]} : vector<2x96xf32> to vector<2x32xf32>
    %347 = vector.extract_strided_slice %345 {offsets = [0, 0], sizes = [2, 32], strides = [1, 1]} : vector<2x96xf32> to vector<2x32xf32>
    %348 = arith.addf %346, %347 : vector<2x32xf32>
    %349 = arith.negf %348 : vector<2x32xf32>
    %350 = math.exp %349 : vector<2x32xf32>
    %cst_119 = arith.constant 1.000000e+00 : f32
    %351 = vector.broadcast %cst_119 : f32 to vector<2x32xf32>
    %352 = arith.addf %351, %350 : vector<2x32xf32>
    %353 = arith.divf %351, %352 : vector<2x32xf32>
    %354 = vector.extract_strided_slice %342 {offsets = [0, 32], sizes = [2, 32], strides = [1, 1]} : vector<2x96xf32> to vector<2x32xf32>
    %355 = vector.extract_strided_slice %345 {offsets = [0, 32], sizes = [2, 32], strides = [1, 1]} : vector<2x96xf32> to vector<2x32xf32>
    %356 = arith.addf %354, %355 : vector<2x32xf32>
    %357 = arith.negf %356 : vector<2x32xf32>
    %358 = math.exp %357 : vector<2x32xf32>
    %cst_120 = arith.constant 1.000000e+00 : f32
    %359 = vector.broadcast %cst_120 : f32 to vector<2x32xf32>
    %360 = arith.addf %359, %358 : vector<2x32xf32>
    %361 = arith.divf %359, %360 : vector<2x32xf32>
    %362 = vector.extract_strided_slice %342 {offsets = [0, 64], sizes = [2, 32], strides = [1, 1]} : vector<2x96xf32> to vector<2x32xf32>
    %363 = vector.extract_strided_slice %345 {offsets = [0, 64], sizes = [2, 32], strides = [1, 1]} : vector<2x96xf32> to vector<2x32xf32>
    %364 = arith.mulf %353, %363 : vector<2x32xf32>
    %365 = arith.addf %362, %364 : vector<2x32xf32>
    %366 = math.tanh %365 : vector<2x32xf32>
    %cst_121 = arith.constant 1.000000e+00 : f32
    %367 = vector.broadcast %cst_121 : f32 to vector<2x32xf32>
    %368 = arith.subf %367, %361 : vector<2x32xf32>
    %369 = arith.mulf %368, %366 : vector<2x32xf32>
    %370 = arith.mulf %361, %309 : vector<2x32xf32>
    %371 = arith.addf %369, %370 : vector<2x32xf32>
    %cst_122 = arith.constant dense<0.000000e+00> : vector<2x96xf32>
    %372 = tpu.matmul %371, %88, %cst_122 {dimension_numbers = #tpu.dot_dimension_numbers<[1], [0], [0], [1], [0, 0, 1, 1], [], []>} : vector<2x32xf32>, vector<32x96xf32>, vector<2x96xf32> -> vector<2x96xf32>
    %373 = vector.broadcast %89 : vector<1x96xf32> to vector<2x96xf32>
    %374 = arith.addf %372, %373 : vector<2x96xf32>
    %cst_123 = arith.constant dense<0.000000e+00> : vector<2x96xf32>
    %375 = tpu.matmul %341, %90, %cst_123 {dimension_numbers = #tpu.dot_dimension_numbers<[1], [0], [0], [1], [0, 0, 1, 1], [], []>} : vector<2x32xf32>, vector<32x96xf32>, vector<2x96xf32> -> vector<2x96xf32>
    %376 = vector.broadcast %91 : vector<1x96xf32> to vector<2x96xf32>
    %377 = arith.addf %375, %376 : vector<2x96xf32>
    %378 = vector.extract_strided_slice %374 {offsets = [0, 0], sizes = [2, 32], strides = [1, 1]} : vector<2x96xf32> to vector<2x32xf32>
    %379 = vector.extract_strided_slice %377 {offsets = [0, 0], sizes = [2, 32], strides = [1, 1]} : vector<2x96xf32> to vector<2x32xf32>
    %380 = arith.addf %378, %379 : vector<2x32xf32>
    %381 = arith.negf %380 : vector<2x32xf32>
    %382 = math.exp %381 : vector<2x32xf32>
    %cst_124 = arith.constant 1.000000e+00 : f32
    %383 = vector.broadcast %cst_124 : f32 to vector<2x32xf32>
    %384 = arith.addf %383, %382 : vector<2x32xf32>
    %385 = arith.divf %383, %384 : vector<2x32xf32>
    %386 = vector.extract_strided_slice %374 {offsets = [0, 32], sizes = [2, 32], strides = [1, 1]} : vector<2x96xf32> to vector<2x32xf32>
    %387 = vector.extract_strided_slice %377 {offsets = [0, 32], sizes = [2, 32], strides = [1, 1]} : vector<2x96xf32> to vector<2x32xf32>
    %388 = arith.addf %386, %387 : vector<2x32xf32>
    %389 = arith.negf %388 : vector<2x32xf32>
    %390 = math.exp %389 : vector<2x32xf32>
    %cst_125 = arith.constant 1.000000e+00 : f32
    %391 = vector.broadcast %cst_125 : f32 to vector<2x32xf32>
    %392 = arith.addf %391, %390 : vector<2x32xf32>
    %393 = arith.divf %391, %392 : vector<2x32xf32>
    %394 = vector.extract_strided_slice %374 {offsets = [0, 64], sizes = [2, 32], strides = [1, 1]} : vector<2x96xf32> to vector<2x32xf32>
    %395 = vector.extract_strided_slice %377 {offsets = [0, 64], sizes = [2, 32], strides = [1, 1]} : vector<2x96xf32> to vector<2x32xf32>
    %396 = arith.mulf %385, %395 : vector<2x32xf32>
    %397 = arith.addf %394, %396 : vector<2x32xf32>
    %398 = math.tanh %397 : vector<2x32xf32>
    %cst_126 = arith.constant 1.000000e+00 : f32
    %399 = vector.broadcast %cst_126 : f32 to vector<2x32xf32>
    %400 = arith.subf %399, %393 : vector<2x32xf32>
    %401 = arith.mulf %400, %398 : vector<2x32xf32>
    %402 = arith.mulf %393, %341 : vector<2x32xf32>
    %403 = arith.addf %401, %402 : vector<2x32xf32>
    %404 = vector.extract_strided_slice %85 {offsets = [10, 0], sizes = [2, 96], strides = [1, 1]} : vector<32x96xf32> to vector<2x96xf32>
    %cst_127 = arith.constant dense<0.000000e+00> : vector<2x96xf32>
    %405 = tpu.matmul %371, %86, %cst_127 {dimension_numbers = #tpu.dot_dimension_numbers<[1], [0], [0], [1], [0, 0, 1, 1], [], []>} : vector<2x32xf32>, vector<32x96xf32>, vector<2x96xf32> -> vector<2x96xf32>
    %406 = vector.broadcast %87 : vector<1x96xf32> to vector<2x96xf32>
    %407 = arith.addf %405, %406 : vector<2x96xf32>
    %408 = vector.extract_strided_slice %404 {offsets = [0, 0], sizes = [2, 32], strides = [1, 1]} : vector<2x96xf32> to vector<2x32xf32>
    %409 = vector.extract_strided_slice %407 {offsets = [0, 0], sizes = [2, 32], strides = [1, 1]} : vector<2x96xf32> to vector<2x32xf32>
    %410 = arith.addf %408, %409 : vector<2x32xf32>
    %411 = arith.negf %410 : vector<2x32xf32>
    %412 = math.exp %411 : vector<2x32xf32>
    %cst_128 = arith.constant 1.000000e+00 : f32
    %413 = vector.broadcast %cst_128 : f32 to vector<2x32xf32>
    %414 = arith.addf %413, %412 : vector<2x32xf32>
    %415 = arith.divf %413, %414 : vector<2x32xf32>
    %416 = vector.extract_strided_slice %404 {offsets = [0, 32], sizes = [2, 32], strides = [1, 1]} : vector<2x96xf32> to vector<2x32xf32>
    %417 = vector.extract_strided_slice %407 {offsets = [0, 32], sizes = [2, 32], strides = [1, 1]} : vector<2x96xf32> to vector<2x32xf32>
    %418 = arith.addf %416, %417 : vector<2x32xf32>
    %419 = arith.negf %418 : vector<2x32xf32>
    %420 = math.exp %419 : vector<2x32xf32>
    %cst_129 = arith.constant 1.000000e+00 : f32
    %421 = vector.broadcast %cst_129 : f32 to vector<2x32xf32>
    %422 = arith.addf %421, %420 : vector<2x32xf32>
    %423 = arith.divf %421, %422 : vector<2x32xf32>
    %424 = vector.extract_strided_slice %404 {offsets = [0, 64], sizes = [2, 32], strides = [1, 1]} : vector<2x96xf32> to vector<2x32xf32>
    %425 = vector.extract_strided_slice %407 {offsets = [0, 64], sizes = [2, 32], strides = [1, 1]} : vector<2x96xf32> to vector<2x32xf32>
    %426 = arith.mulf %415, %425 : vector<2x32xf32>
    %427 = arith.addf %424, %426 : vector<2x32xf32>
    %428 = math.tanh %427 : vector<2x32xf32>
    %cst_130 = arith.constant 1.000000e+00 : f32
    %429 = vector.broadcast %cst_130 : f32 to vector<2x32xf32>
    %430 = arith.subf %429, %423 : vector<2x32xf32>
    %431 = arith.mulf %430, %428 : vector<2x32xf32>
    %432 = arith.mulf %423, %371 : vector<2x32xf32>
    %433 = arith.addf %431, %432 : vector<2x32xf32>
    %cst_131 = arith.constant dense<0.000000e+00> : vector<2x96xf32>
    %434 = tpu.matmul %433, %88, %cst_131 {dimension_numbers = #tpu.dot_dimension_numbers<[1], [0], [0], [1], [0, 0, 1, 1], [], []>} : vector<2x32xf32>, vector<32x96xf32>, vector<2x96xf32> -> vector<2x96xf32>
    %435 = vector.broadcast %89 : vector<1x96xf32> to vector<2x96xf32>
    %436 = arith.addf %434, %435 : vector<2x96xf32>
    %cst_132 = arith.constant dense<0.000000e+00> : vector<2x96xf32>
    %437 = tpu.matmul %403, %90, %cst_132 {dimension_numbers = #tpu.dot_dimension_numbers<[1], [0], [0], [1], [0, 0, 1, 1], [], []>} : vector<2x32xf32>, vector<32x96xf32>, vector<2x96xf32> -> vector<2x96xf32>
    %438 = vector.broadcast %91 : vector<1x96xf32> to vector<2x96xf32>
    %439 = arith.addf %437, %438 : vector<2x96xf32>
    %440 = vector.extract_strided_slice %436 {offsets = [0, 0], sizes = [2, 32], strides = [1, 1]} : vector<2x96xf32> to vector<2x32xf32>
    %441 = vector.extract_strided_slice %439 {offsets = [0, 0], sizes = [2, 32], strides = [1, 1]} : vector<2x96xf32> to vector<2x32xf32>
    %442 = arith.addf %440, %441 : vector<2x32xf32>
    %443 = arith.negf %442 : vector<2x32xf32>
    %444 = math.exp %443 : vector<2x32xf32>
    %cst_133 = arith.constant 1.000000e+00 : f32
    %445 = vector.broadcast %cst_133 : f32 to vector<2x32xf32>
    %446 = arith.addf %445, %444 : vector<2x32xf32>
    %447 = arith.divf %445, %446 : vector<2x32xf32>
    %448 = vector.extract_strided_slice %436 {offsets = [0, 32], sizes = [2, 32], strides = [1, 1]} : vector<2x96xf32> to vector<2x32xf32>
    %449 = vector.extract_strided_slice %439 {offsets = [0, 32], sizes = [2, 32], strides = [1, 1]} : vector<2x96xf32> to vector<2x32xf32>
    %450 = arith.addf %448, %449 : vector<2x32xf32>
    %451 = arith.negf %450 : vector<2x32xf32>
    %452 = math.exp %451 : vector<2x32xf32>
    %cst_134 = arith.constant 1.000000e+00 : f32
    %453 = vector.broadcast %cst_134 : f32 to vector<2x32xf32>
    %454 = arith.addf %453, %452 : vector<2x32xf32>
    %455 = arith.divf %453, %454 : vector<2x32xf32>
    %456 = vector.extract_strided_slice %436 {offsets = [0, 64], sizes = [2, 32], strides = [1, 1]} : vector<2x96xf32> to vector<2x32xf32>
    %457 = vector.extract_strided_slice %439 {offsets = [0, 64], sizes = [2, 32], strides = [1, 1]} : vector<2x96xf32> to vector<2x32xf32>
    %458 = arith.mulf %447, %457 : vector<2x32xf32>
    %459 = arith.addf %456, %458 : vector<2x32xf32>
    %460 = math.tanh %459 : vector<2x32xf32>
    %cst_135 = arith.constant 1.000000e+00 : f32
    %461 = vector.broadcast %cst_135 : f32 to vector<2x32xf32>
    %462 = arith.subf %461, %455 : vector<2x32xf32>
    %463 = arith.mulf %462, %460 : vector<2x32xf32>
    %464 = arith.mulf %455, %403 : vector<2x32xf32>
    %465 = arith.addf %463, %464 : vector<2x32xf32>
    %466 = vector.extract_strided_slice %85 {offsets = [12, 0], sizes = [2, 96], strides = [1, 1]} : vector<32x96xf32> to vector<2x96xf32>
    %cst_136 = arith.constant dense<0.000000e+00> : vector<2x96xf32>
    %467 = tpu.matmul %433, %86, %cst_136 {dimension_numbers = #tpu.dot_dimension_numbers<[1], [0], [0], [1], [0, 0, 1, 1], [], []>} : vector<2x32xf32>, vector<32x96xf32>, vector<2x96xf32> -> vector<2x96xf32>
    %468 = vector.broadcast %87 : vector<1x96xf32> to vector<2x96xf32>
    %469 = arith.addf %467, %468 : vector<2x96xf32>
    %470 = vector.extract_strided_slice %466 {offsets = [0, 0], sizes = [2, 32], strides = [1, 1]} : vector<2x96xf32> to vector<2x32xf32>
    %471 = vector.extract_strided_slice %469 {offsets = [0, 0], sizes = [2, 32], strides = [1, 1]} : vector<2x96xf32> to vector<2x32xf32>
    %472 = arith.addf %470, %471 : vector<2x32xf32>
    %473 = arith.negf %472 : vector<2x32xf32>
    %474 = math.exp %473 : vector<2x32xf32>
    %cst_137 = arith.constant 1.000000e+00 : f32
    %475 = vector.broadcast %cst_137 : f32 to vector<2x32xf32>
    %476 = arith.addf %475, %474 : vector<2x32xf32>
    %477 = arith.divf %475, %476 : vector<2x32xf32>
    %478 = vector.extract_strided_slice %466 {offsets = [0, 32], sizes = [2, 32], strides = [1, 1]} : vector<2x96xf32> to vector<2x32xf32>
    %479 = vector.extract_strided_slice %469 {offsets = [0, 32], sizes = [2, 32], strides = [1, 1]} : vector<2x96xf32> to vector<2x32xf32>
    %480 = arith.addf %478, %479 : vector<2x32xf32>
    %481 = arith.negf %480 : vector<2x32xf32>
    %482 = math.exp %481 : vector<2x32xf32>
    %cst_138 = arith.constant 1.000000e+00 : f32
    %483 = vector.broadcast %cst_138 : f32 to vector<2x32xf32>
    %484 = arith.addf %483, %482 : vector<2x32xf32>
    %485 = arith.divf %483, %484 : vector<2x32xf32>
    %486 = vector.extract_strided_slice %466 {offsets = [0, 64], sizes = [2, 32], strides = [1, 1]} : vector<2x96xf32> to vector<2x32xf32>
    %487 = vector.extract_strided_slice %469 {offsets = [0, 64], sizes = [2, 32], strides = [1, 1]} : vector<2x96xf32> to vector<2x32xf32>
    %488 = arith.mulf %477, %487 : vector<2x32xf32>
    %489 = arith.addf %486, %488 : vector<2x32xf32>
    %490 = math.tanh %489 : vector<2x32xf32>
    %cst_139 = arith.constant 1.000000e+00 : f32
    %491 = vector.broadcast %cst_139 : f32 to vector<2x32xf32>
    %492 = arith.subf %491, %485 : vector<2x32xf32>
    %493 = arith.mulf %492, %490 : vector<2x32xf32>
    %494 = arith.mulf %485, %433 : vector<2x32xf32>
    %495 = arith.addf %493, %494 : vector<2x32xf32>
    %cst_140 = arith.constant dense<0.000000e+00> : vector<2x96xf32>
    %496 = tpu.matmul %495, %88, %cst_140 {dimension_numbers = #tpu.dot_dimension_numbers<[1], [0], [0], [1], [0, 0, 1, 1], [], []>} : vector<2x32xf32>, vector<32x96xf32>, vector<2x96xf32> -> vector<2x96xf32>
    %497 = vector.broadcast %89 : vector<1x96xf32> to vector<2x96xf32>
    %498 = arith.addf %496, %497 : vector<2x96xf32>
    %cst_141 = arith.constant dense<0.000000e+00> : vector<2x96xf32>
    %499 = tpu.matmul %465, %90, %cst_141 {dimension_numbers = #tpu.dot_dimension_numbers<[1], [0], [0], [1], [0, 0, 1, 1], [], []>} : vector<2x32xf32>, vector<32x96xf32>, vector<2x96xf32> -> vector<2x96xf32>
    %500 = vector.broadcast %91 : vector<1x96xf32> to vector<2x96xf32>
    %501 = arith.addf %499, %500 : vector<2x96xf32>
    %502 = vector.extract_strided_slice %498 {offsets = [0, 0], sizes = [2, 32], strides = [1, 1]} : vector<2x96xf32> to vector<2x32xf32>
    %503 = vector.extract_strided_slice %501 {offsets = [0, 0], sizes = [2, 32], strides = [1, 1]} : vector<2x96xf32> to vector<2x32xf32>
    %504 = arith.addf %502, %503 : vector<2x32xf32>
    %505 = arith.negf %504 : vector<2x32xf32>
    %506 = math.exp %505 : vector<2x32xf32>
    %cst_142 = arith.constant 1.000000e+00 : f32
    %507 = vector.broadcast %cst_142 : f32 to vector<2x32xf32>
    %508 = arith.addf %507, %506 : vector<2x32xf32>
    %509 = arith.divf %507, %508 : vector<2x32xf32>
    %510 = vector.extract_strided_slice %498 {offsets = [0, 32], sizes = [2, 32], strides = [1, 1]} : vector<2x96xf32> to vector<2x32xf32>
    %511 = vector.extract_strided_slice %501 {offsets = [0, 32], sizes = [2, 32], strides = [1, 1]} : vector<2x96xf32> to vector<2x32xf32>
    %512 = arith.addf %510, %511 : vector<2x32xf32>
    %513 = arith.negf %512 : vector<2x32xf32>
    %514 = math.exp %513 : vector<2x32xf32>
    %cst_143 = arith.constant 1.000000e+00 : f32
    %515 = vector.broadcast %cst_143 : f32 to vector<2x32xf32>
    %516 = arith.addf %515, %514 : vector<2x32xf32>
    %517 = arith.divf %515, %516 : vector<2x32xf32>
    %518 = vector.extract_strided_slice %498 {offsets = [0, 64], sizes = [2, 32], strides = [1, 1]} : vector<2x96xf32> to vector<2x32xf32>
    %519 = vector.extract_strided_slice %501 {offsets = [0, 64], sizes = [2, 32], strides = [1, 1]} : vector<2x96xf32> to vector<2x32xf32>
    %520 = arith.mulf %509, %519 : vector<2x32xf32>
    %521 = arith.addf %518, %520 : vector<2x32xf32>
    %522 = math.tanh %521 : vector<2x32xf32>
    %cst_144 = arith.constant 1.000000e+00 : f32
    %523 = vector.broadcast %cst_144 : f32 to vector<2x32xf32>
    %524 = arith.subf %523, %517 : vector<2x32xf32>
    %525 = arith.mulf %524, %522 : vector<2x32xf32>
    %526 = arith.mulf %517, %465 : vector<2x32xf32>
    %527 = arith.addf %525, %526 : vector<2x32xf32>
    %528 = vector.extract_strided_slice %85 {offsets = [14, 0], sizes = [2, 96], strides = [1, 1]} : vector<32x96xf32> to vector<2x96xf32>
    %cst_145 = arith.constant dense<0.000000e+00> : vector<2x96xf32>
    %529 = tpu.matmul %495, %86, %cst_145 {dimension_numbers = #tpu.dot_dimension_numbers<[1], [0], [0], [1], [0, 0, 1, 1], [], []>} : vector<2x32xf32>, vector<32x96xf32>, vector<2x96xf32> -> vector<2x96xf32>
    %530 = vector.broadcast %87 : vector<1x96xf32> to vector<2x96xf32>
    %531 = arith.addf %529, %530 : vector<2x96xf32>
    %532 = vector.extract_strided_slice %528 {offsets = [0, 0], sizes = [2, 32], strides = [1, 1]} : vector<2x96xf32> to vector<2x32xf32>
    %533 = vector.extract_strided_slice %531 {offsets = [0, 0], sizes = [2, 32], strides = [1, 1]} : vector<2x96xf32> to vector<2x32xf32>
    %534 = arith.addf %532, %533 : vector<2x32xf32>
    %535 = arith.negf %534 : vector<2x32xf32>
    %536 = math.exp %535 : vector<2x32xf32>
    %cst_146 = arith.constant 1.000000e+00 : f32
    %537 = vector.broadcast %cst_146 : f32 to vector<2x32xf32>
    %538 = arith.addf %537, %536 : vector<2x32xf32>
    %539 = arith.divf %537, %538 : vector<2x32xf32>
    %540 = vector.extract_strided_slice %528 {offsets = [0, 32], sizes = [2, 32], strides = [1, 1]} : vector<2x96xf32> to vector<2x32xf32>
    %541 = vector.extract_strided_slice %531 {offsets = [0, 32], sizes = [2, 32], strides = [1, 1]} : vector<2x96xf32> to vector<2x32xf32>
    %542 = arith.addf %540, %541 : vector<2x32xf32>
    %543 = arith.negf %542 : vector<2x32xf32>
    %544 = math.exp %543 : vector<2x32xf32>
    %cst_147 = arith.constant 1.000000e+00 : f32
    %545 = vector.broadcast %cst_147 : f32 to vector<2x32xf32>
    %546 = arith.addf %545, %544 : vector<2x32xf32>
    %547 = arith.divf %545, %546 : vector<2x32xf32>
    %548 = vector.extract_strided_slice %528 {offsets = [0, 64], sizes = [2, 32], strides = [1, 1]} : vector<2x96xf32> to vector<2x32xf32>
    %549 = vector.extract_strided_slice %531 {offsets = [0, 64], sizes = [2, 32], strides = [1, 1]} : vector<2x96xf32> to vector<2x32xf32>
    %550 = arith.mulf %539, %549 : vector<2x32xf32>
    %551 = arith.addf %548, %550 : vector<2x32xf32>
    %552 = math.tanh %551 : vector<2x32xf32>
    %cst_148 = arith.constant 1.000000e+00 : f32
    %553 = vector.broadcast %cst_148 : f32 to vector<2x32xf32>
    %554 = arith.subf %553, %547 : vector<2x32xf32>
    %555 = arith.mulf %554, %552 : vector<2x32xf32>
    %556 = arith.mulf %547, %495 : vector<2x32xf32>
    %557 = arith.addf %555, %556 : vector<2x32xf32>
    %cst_149 = arith.constant dense<0.000000e+00> : vector<2x96xf32>
    %558 = tpu.matmul %557, %88, %cst_149 {dimension_numbers = #tpu.dot_dimension_numbers<[1], [0], [0], [1], [0, 0, 1, 1], [], []>} : vector<2x32xf32>, vector<32x96xf32>, vector<2x96xf32> -> vector<2x96xf32>
    %559 = vector.broadcast %89 : vector<1x96xf32> to vector<2x96xf32>
    %560 = arith.addf %558, %559 : vector<2x96xf32>
    %cst_150 = arith.constant dense<0.000000e+00> : vector<2x96xf32>
    %561 = tpu.matmul %527, %90, %cst_150 {dimension_numbers = #tpu.dot_dimension_numbers<[1], [0], [0], [1], [0, 0, 1, 1], [], []>} : vector<2x32xf32>, vector<32x96xf32>, vector<2x96xf32> -> vector<2x96xf32>
    %562 = vector.broadcast %91 : vector<1x96xf32> to vector<2x96xf32>
    %563 = arith.addf %561, %562 : vector<2x96xf32>
    %564 = vector.extract_strided_slice %560 {offsets = [0, 0], sizes = [2, 32], strides = [1, 1]} : vector<2x96xf32> to vector<2x32xf32>
    %565 = vector.extract_strided_slice %563 {offsets = [0, 0], sizes = [2, 32], strides = [1, 1]} : vector<2x96xf32> to vector<2x32xf32>
    %566 = arith.addf %564, %565 : vector<2x32xf32>
    %567 = arith.negf %566 : vector<2x32xf32>
    %568 = math.exp %567 : vector<2x32xf32>
    %cst_151 = arith.constant 1.000000e+00 : f32
    %569 = vector.broadcast %cst_151 : f32 to vector<2x32xf32>
    %570 = arith.addf %569, %568 : vector<2x32xf32>
    %571 = arith.divf %569, %570 : vector<2x32xf32>
    %572 = vector.extract_strided_slice %560 {offsets = [0, 32], sizes = [2, 32], strides = [1, 1]} : vector<2x96xf32> to vector<2x32xf32>
    %573 = vector.extract_strided_slice %563 {offsets = [0, 32], sizes = [2, 32], strides = [1, 1]} : vector<2x96xf32> to vector<2x32xf32>
    %574 = arith.addf %572, %573 : vector<2x32xf32>
    %575 = arith.negf %574 : vector<2x32xf32>
    %576 = math.exp %575 : vector<2x32xf32>
    %cst_152 = arith.constant 1.000000e+00 : f32
    %577 = vector.broadcast %cst_152 : f32 to vector<2x32xf32>
    %578 = arith.addf %577, %576 : vector<2x32xf32>
    %579 = arith.divf %577, %578 : vector<2x32xf32>
    %580 = vector.extract_strided_slice %560 {offsets = [0, 64], sizes = [2, 32], strides = [1, 1]} : vector<2x96xf32> to vector<2x32xf32>
    %581 = vector.extract_strided_slice %563 {offsets = [0, 64], sizes = [2, 32], strides = [1, 1]} : vector<2x96xf32> to vector<2x32xf32>
    %582 = arith.mulf %571, %581 : vector<2x32xf32>
    %583 = arith.addf %580, %582 : vector<2x32xf32>
    %584 = math.tanh %583 : vector<2x32xf32>
    %cst_153 = arith.constant 1.000000e+00 : f32
    %585 = vector.broadcast %cst_153 : f32 to vector<2x32xf32>
    %586 = arith.subf %585, %579 : vector<2x32xf32>
    %587 = arith.mulf %586, %584 : vector<2x32xf32>
    %588 = arith.mulf %579, %527 : vector<2x32xf32>
    %589 = arith.addf %587, %588 : vector<2x32xf32>
    %590 = vector.extract_strided_slice %85 {offsets = [16, 0], sizes = [2, 96], strides = [1, 1]} : vector<32x96xf32> to vector<2x96xf32>
    %cst_154 = arith.constant dense<0.000000e+00> : vector<2x96xf32>
    %591 = tpu.matmul %557, %86, %cst_154 {dimension_numbers = #tpu.dot_dimension_numbers<[1], [0], [0], [1], [0, 0, 1, 1], [], []>} : vector<2x32xf32>, vector<32x96xf32>, vector<2x96xf32> -> vector<2x96xf32>
    %592 = vector.broadcast %87 : vector<1x96xf32> to vector<2x96xf32>
    %593 = arith.addf %591, %592 : vector<2x96xf32>
    %594 = vector.extract_strided_slice %590 {offsets = [0, 0], sizes = [2, 32], strides = [1, 1]} : vector<2x96xf32> to vector<2x32xf32>
    %595 = vector.extract_strided_slice %593 {offsets = [0, 0], sizes = [2, 32], strides = [1, 1]} : vector<2x96xf32> to vector<2x32xf32>
    %596 = arith.addf %594, %595 : vector<2x32xf32>
    %597 = arith.negf %596 : vector<2x32xf32>
    %598 = math.exp %597 : vector<2x32xf32>
    %cst_155 = arith.constant 1.000000e+00 : f32
    %599 = vector.broadcast %cst_155 : f32 to vector<2x32xf32>
    %600 = arith.addf %599, %598 : vector<2x32xf32>
    %601 = arith.divf %599, %600 : vector<2x32xf32>
    %602 = vector.extract_strided_slice %590 {offsets = [0, 32], sizes = [2, 32], strides = [1, 1]} : vector<2x96xf32> to vector<2x32xf32>
    %603 = vector.extract_strided_slice %593 {offsets = [0, 32], sizes = [2, 32], strides = [1, 1]} : vector<2x96xf32> to vector<2x32xf32>
    %604 = arith.addf %602, %603 : vector<2x32xf32>
    %605 = arith.negf %604 : vector<2x32xf32>
    %606 = math.exp %605 : vector<2x32xf32>
    %cst_156 = arith.constant 1.000000e+00 : f32
    %607 = vector.broadcast %cst_156 : f32 to vector<2x32xf32>
    %608 = arith.addf %607, %606 : vector<2x32xf32>
    %609 = arith.divf %607, %608 : vector<2x32xf32>
    %610 = vector.extract_strided_slice %590 {offsets = [0, 64], sizes = [2, 32], strides = [1, 1]} : vector<2x96xf32> to vector<2x32xf32>
    %611 = vector.extract_strided_slice %593 {offsets = [0, 64], sizes = [2, 32], strides = [1, 1]} : vector<2x96xf32> to vector<2x32xf32>
    %612 = arith.mulf %601, %611 : vector<2x32xf32>
    %613 = arith.addf %610, %612 : vector<2x32xf32>
    %614 = math.tanh %613 : vector<2x32xf32>
    %cst_157 = arith.constant 1.000000e+00 : f32
    %615 = vector.broadcast %cst_157 : f32 to vector<2x32xf32>
    %616 = arith.subf %615, %609 : vector<2x32xf32>
    %617 = arith.mulf %616, %614 : vector<2x32xf32>
    %618 = arith.mulf %609, %557 : vector<2x32xf32>
    %619 = arith.addf %617, %618 : vector<2x32xf32>
    %cst_158 = arith.constant dense<0.000000e+00> : vector<2x96xf32>
    %620 = tpu.matmul %619, %88, %cst_158 {dimension_numbers = #tpu.dot_dimension_numbers<[1], [0], [0], [1], [0, 0, 1, 1], [], []>} : vector<2x32xf32>, vector<32x96xf32>, vector<2x96xf32> -> vector<2x96xf32>
    %621 = vector.broadcast %89 : vector<1x96xf32> to vector<2x96xf32>
    %622 = arith.addf %620, %621 : vector<2x96xf32>
    %cst_159 = arith.constant dense<0.000000e+00> : vector<2x96xf32>
    %623 = tpu.matmul %589, %90, %cst_159 {dimension_numbers = #tpu.dot_dimension_numbers<[1], [0], [0], [1], [0, 0, 1, 1], [], []>} : vector<2x32xf32>, vector<32x96xf32>, vector<2x96xf32> -> vector<2x96xf32>
    %624 = vector.broadcast %91 : vector<1x96xf32> to vector<2x96xf32>
    %625 = arith.addf %623, %624 : vector<2x96xf32>
    %626 = vector.extract_strided_slice %622 {offsets = [0, 0], sizes = [2, 32], strides = [1, 1]} : vector<2x96xf32> to vector<2x32xf32>
    %627 = vector.extract_strided_slice %625 {offsets = [0, 0], sizes = [2, 32], strides = [1, 1]} : vector<2x96xf32> to vector<2x32xf32>
    %628 = arith.addf %626, %627 : vector<2x32xf32>
    %629 = arith.negf %628 : vector<2x32xf32>
    %630 = math.exp %629 : vector<2x32xf32>
    %cst_160 = arith.constant 1.000000e+00 : f32
    %631 = vector.broadcast %cst_160 : f32 to vector<2x32xf32>
    %632 = arith.addf %631, %630 : vector<2x32xf32>
    %633 = arith.divf %631, %632 : vector<2x32xf32>
    %634 = vector.extract_strided_slice %622 {offsets = [0, 32], sizes = [2, 32], strides = [1, 1]} : vector<2x96xf32> to vector<2x32xf32>
    %635 = vector.extract_strided_slice %625 {offsets = [0, 32], sizes = [2, 32], strides = [1, 1]} : vector<2x96xf32> to vector<2x32xf32>
    %636 = arith.addf %634, %635 : vector<2x32xf32>
    %637 = arith.negf %636 : vector<2x32xf32>
    %638 = math.exp %637 : vector<2x32xf32>
    %cst_161 = arith.constant 1.000000e+00 : f32
    %639 = vector.broadcast %cst_161 : f32 to vector<2x32xf32>
    %640 = arith.addf %639, %638 : vector<2x32xf32>
    %641 = arith.divf %639, %640 : vector<2x32xf32>
    %642 = vector.extract_strided_slice %622 {offsets = [0, 64], sizes = [2, 32], strides = [1, 1]} : vector<2x96xf32> to vector<2x32xf32>
    %643 = vector.extract_strided_slice %625 {offsets = [0, 64], sizes = [2, 32], strides = [1, 1]} : vector<2x96xf32> to vector<2x32xf32>
    %644 = arith.mulf %633, %643 : vector<2x32xf32>
    %645 = arith.addf %642, %644 : vector<2x32xf32>
    %646 = math.tanh %645 : vector<2x32xf32>
    %cst_162 = arith.constant 1.000000e+00 : f32
    %647 = vector.broadcast %cst_162 : f32 to vector<2x32xf32>
    %648 = arith.subf %647, %641 : vector<2x32xf32>
    %649 = arith.mulf %648, %646 : vector<2x32xf32>
    %650 = arith.mulf %641, %589 : vector<2x32xf32>
    %651 = arith.addf %649, %650 : vector<2x32xf32>
    %652 = vector.extract_strided_slice %85 {offsets = [18, 0], sizes = [2, 96], strides = [1, 1]} : vector<32x96xf32> to vector<2x96xf32>
    %cst_163 = arith.constant dense<0.000000e+00> : vector<2x96xf32>
    %653 = tpu.matmul %619, %86, %cst_163 {dimension_numbers = #tpu.dot_dimension_numbers<[1], [0], [0], [1], [0, 0, 1, 1], [], []>} : vector<2x32xf32>, vector<32x96xf32>, vector<2x96xf32> -> vector<2x96xf32>
    %654 = vector.broadcast %87 : vector<1x96xf32> to vector<2x96xf32>
    %655 = arith.addf %653, %654 : vector<2x96xf32>
    %656 = vector.extract_strided_slice %652 {offsets = [0, 0], sizes = [2, 32], strides = [1, 1]} : vector<2x96xf32> to vector<2x32xf32>
    %657 = vector.extract_strided_slice %655 {offsets = [0, 0], sizes = [2, 32], strides = [1, 1]} : vector<2x96xf32> to vector<2x32xf32>
    %658 = arith.addf %656, %657 : vector<2x32xf32>
    %659 = arith.negf %658 : vector<2x32xf32>
    %660 = math.exp %659 : vector<2x32xf32>
    %cst_164 = arith.constant 1.000000e+00 : f32
    %661 = vector.broadcast %cst_164 : f32 to vector<2x32xf32>
    %662 = arith.addf %661, %660 : vector<2x32xf32>
    %663 = arith.divf %661, %662 : vector<2x32xf32>
    %664 = vector.extract_strided_slice %652 {offsets = [0, 32], sizes = [2, 32], strides = [1, 1]} : vector<2x96xf32> to vector<2x32xf32>
    %665 = vector.extract_strided_slice %655 {offsets = [0, 32], sizes = [2, 32], strides = [1, 1]} : vector<2x96xf32> to vector<2x32xf32>
    %666 = arith.addf %664, %665 : vector<2x32xf32>
    %667 = arith.negf %666 : vector<2x32xf32>
    %668 = math.exp %667 : vector<2x32xf32>
    %cst_165 = arith.constant 1.000000e+00 : f32
    %669 = vector.broadcast %cst_165 : f32 to vector<2x32xf32>
    %670 = arith.addf %669, %668 : vector<2x32xf32>
    %671 = arith.divf %669, %670 : vector<2x32xf32>
    %672 = vector.extract_strided_slice %652 {offsets = [0, 64], sizes = [2, 32], strides = [1, 1]} : vector<2x96xf32> to vector<2x32xf32>
    %673 = vector.extract_strided_slice %655 {offsets = [0, 64], sizes = [2, 32], strides = [1, 1]} : vector<2x96xf32> to vector<2x32xf32>
    %674 = arith.mulf %663, %673 : vector<2x32xf32>
    %675 = arith.addf %672, %674 : vector<2x32xf32>
    %676 = math.tanh %675 : vector<2x32xf32>
    %cst_166 = arith.constant 1.000000e+00 : f32
    %677 = vector.broadcast %cst_166 : f32 to vector<2x32xf32>
    %678 = arith.subf %677, %671 : vector<2x32xf32>
    %679 = arith.mulf %678, %676 : vector<2x32xf32>
    %680 = arith.mulf %671, %619 : vector<2x32xf32>
    %681 = arith.addf %679, %680 : vector<2x32xf32>
    %cst_167 = arith.constant dense<0.000000e+00> : vector<2x96xf32>
    %682 = tpu.matmul %681, %88, %cst_167 {dimension_numbers = #tpu.dot_dimension_numbers<[1], [0], [0], [1], [0, 0, 1, 1], [], []>} : vector<2x32xf32>, vector<32x96xf32>, vector<2x96xf32> -> vector<2x96xf32>
    %683 = vector.broadcast %89 : vector<1x96xf32> to vector<2x96xf32>
    %684 = arith.addf %682, %683 : vector<2x96xf32>
    %cst_168 = arith.constant dense<0.000000e+00> : vector<2x96xf32>
    %685 = tpu.matmul %651, %90, %cst_168 {dimension_numbers = #tpu.dot_dimension_numbers<[1], [0], [0], [1], [0, 0, 1, 1], [], []>} : vector<2x32xf32>, vector<32x96xf32>, vector<2x96xf32> -> vector<2x96xf32>
    %686 = vector.broadcast %91 : vector<1x96xf32> to vector<2x96xf32>
    %687 = arith.addf %685, %686 : vector<2x96xf32>
    %688 = vector.extract_strided_slice %684 {offsets = [0, 0], sizes = [2, 32], strides = [1, 1]} : vector<2x96xf32> to vector<2x32xf32>
    %689 = vector.extract_strided_slice %687 {offsets = [0, 0], sizes = [2, 32], strides = [1, 1]} : vector<2x96xf32> to vector<2x32xf32>
    %690 = arith.addf %688, %689 : vector<2x32xf32>
    %691 = arith.negf %690 : vector<2x32xf32>
    %692 = math.exp %691 : vector<2x32xf32>
    %cst_169 = arith.constant 1.000000e+00 : f32
    %693 = vector.broadcast %cst_169 : f32 to vector<2x32xf32>
    %694 = arith.addf %693, %692 : vector<2x32xf32>
    %695 = arith.divf %693, %694 : vector<2x32xf32>
    %696 = vector.extract_strided_slice %684 {offsets = [0, 32], sizes = [2, 32], strides = [1, 1]} : vector<2x96xf32> to vector<2x32xf32>
    %697 = vector.extract_strided_slice %687 {offsets = [0, 32], sizes = [2, 32], strides = [1, 1]} : vector<2x96xf32> to vector<2x32xf32>
    %698 = arith.addf %696, %697 : vector<2x32xf32>
    %699 = arith.negf %698 : vector<2x32xf32>
    %700 = math.exp %699 : vector<2x32xf32>
    %cst_170 = arith.constant 1.000000e+00 : f32
    %701 = vector.broadcast %cst_170 : f32 to vector<2x32xf32>
    %702 = arith.addf %701, %700 : vector<2x32xf32>
    %703 = arith.divf %701, %702 : vector<2x32xf32>
    %704 = vector.extract_strided_slice %684 {offsets = [0, 64], sizes = [2, 32], strides = [1, 1]} : vector<2x96xf32> to vector<2x32xf32>
    %705 = vector.extract_strided_slice %687 {offsets = [0, 64], sizes = [2, 32], strides = [1, 1]} : vector<2x96xf32> to vector<2x32xf32>
    %706 = arith.mulf %695, %705 : vector<2x32xf32>
    %707 = arith.addf %704, %706 : vector<2x32xf32>
    %708 = math.tanh %707 : vector<2x32xf32>
    %cst_171 = arith.constant 1.000000e+00 : f32
    %709 = vector.broadcast %cst_171 : f32 to vector<2x32xf32>
    %710 = arith.subf %709, %703 : vector<2x32xf32>
    %711 = arith.mulf %710, %708 : vector<2x32xf32>
    %712 = arith.mulf %703, %651 : vector<2x32xf32>
    %713 = arith.addf %711, %712 : vector<2x32xf32>
    %714 = vector.extract_strided_slice %85 {offsets = [20, 0], sizes = [2, 96], strides = [1, 1]} : vector<32x96xf32> to vector<2x96xf32>
    %cst_172 = arith.constant dense<0.000000e+00> : vector<2x96xf32>
    %715 = tpu.matmul %681, %86, %cst_172 {dimension_numbers = #tpu.dot_dimension_numbers<[1], [0], [0], [1], [0, 0, 1, 1], [], []>} : vector<2x32xf32>, vector<32x96xf32>, vector<2x96xf32> -> vector<2x96xf32>
    %716 = vector.broadcast %87 : vector<1x96xf32> to vector<2x96xf32>
    %717 = arith.addf %715, %716 : vector<2x96xf32>
    %718 = vector.extract_strided_slice %714 {offsets = [0, 0], sizes = [2, 32], strides = [1, 1]} : vector<2x96xf32> to vector<2x32xf32>
    %719 = vector.extract_strided_slice %717 {offsets = [0, 0], sizes = [2, 32], strides = [1, 1]} : vector<2x96xf32> to vector<2x32xf32>
    %720 = arith.addf %718, %719 : vector<2x32xf32>
    %721 = arith.negf %720 : vector<2x32xf32>
    %722 = math.exp %721 : vector<2x32xf32>
    %cst_173 = arith.constant 1.000000e+00 : f32
    %723 = vector.broadcast %cst_173 : f32 to vector<2x32xf32>
    %724 = arith.addf %723, %722 : vector<2x32xf32>
    %725 = arith.divf %723, %724 : vector<2x32xf32>
    %726 = vector.extract_strided_slice %714 {offsets = [0, 32], sizes = [2, 32], strides = [1, 1]} : vector<2x96xf32> to vector<2x32xf32>
    %727 = vector.extract_strided_slice %717 {offsets = [0, 32], sizes = [2, 32], strides = [1, 1]} : vector<2x96xf32> to vector<2x32xf32>
    %728 = arith.addf %726, %727 : vector<2x32xf32>
    %729 = arith.negf %728 : vector<2x32xf32>
    %730 = math.exp %729 : vector<2x32xf32>
    %cst_174 = arith.constant 1.000000e+00 : f32
    %731 = vector.broadcast %cst_174 : f32 to vector<2x32xf32>
    %732 = arith.addf %731, %730 : vector<2x32xf32>
    %733 = arith.divf %731, %732 : vector<2x32xf32>
    %734 = vector.extract_strided_slice %714 {offsets = [0, 64], sizes = [2, 32], strides = [1, 1]} : vector<2x96xf32> to vector<2x32xf32>
    %735 = vector.extract_strided_slice %717 {offsets = [0, 64], sizes = [2, 32], strides = [1, 1]} : vector<2x96xf32> to vector<2x32xf32>
    %736 = arith.mulf %725, %735 : vector<2x32xf32>
    %737 = arith.addf %734, %736 : vector<2x32xf32>
    %738 = math.tanh %737 : vector<2x32xf32>
    %cst_175 = arith.constant 1.000000e+00 : f32
    %739 = vector.broadcast %cst_175 : f32 to vector<2x32xf32>
    %740 = arith.subf %739, %733 : vector<2x32xf32>
    %741 = arith.mulf %740, %738 : vector<2x32xf32>
    %742 = arith.mulf %733, %681 : vector<2x32xf32>
    %743 = arith.addf %741, %742 : vector<2x32xf32>
    %cst_176 = arith.constant dense<0.000000e+00> : vector<2x96xf32>
    %744 = tpu.matmul %743, %88, %cst_176 {dimension_numbers = #tpu.dot_dimension_numbers<[1], [0], [0], [1], [0, 0, 1, 1], [], []>} : vector<2x32xf32>, vector<32x96xf32>, vector<2x96xf32> -> vector<2x96xf32>
    %745 = vector.broadcast %89 : vector<1x96xf32> to vector<2x96xf32>
    %746 = arith.addf %744, %745 : vector<2x96xf32>
    %cst_177 = arith.constant dense<0.000000e+00> : vector<2x96xf32>
    %747 = tpu.matmul %713, %90, %cst_177 {dimension_numbers = #tpu.dot_dimension_numbers<[1], [0], [0], [1], [0, 0, 1, 1], [], []>} : vector<2x32xf32>, vector<32x96xf32>, vector<2x96xf32> -> vector<2x96xf32>
    %748 = vector.broadcast %91 : vector<1x96xf32> to vector<2x96xf32>
    %749 = arith.addf %747, %748 : vector<2x96xf32>
    %750 = vector.extract_strided_slice %746 {offsets = [0, 0], sizes = [2, 32], strides = [1, 1]} : vector<2x96xf32> to vector<2x32xf32>
    %751 = vector.extract_strided_slice %749 {offsets = [0, 0], sizes = [2, 32], strides = [1, 1]} : vector<2x96xf32> to vector<2x32xf32>
    %752 = arith.addf %750, %751 : vector<2x32xf32>
    %753 = arith.negf %752 : vector<2x32xf32>
    %754 = math.exp %753 : vector<2x32xf32>
    %cst_178 = arith.constant 1.000000e+00 : f32
    %755 = vector.broadcast %cst_178 : f32 to vector<2x32xf32>
    %756 = arith.addf %755, %754 : vector<2x32xf32>
    %757 = arith.divf %755, %756 : vector<2x32xf32>
    %758 = vector.extract_strided_slice %746 {offsets = [0, 32], sizes = [2, 32], strides = [1, 1]} : vector<2x96xf32> to vector<2x32xf32>
    %759 = vector.extract_strided_slice %749 {offsets = [0, 32], sizes = [2, 32], strides = [1, 1]} : vector<2x96xf32> to vector<2x32xf32>
    %760 = arith.addf %758, %759 : vector<2x32xf32>
    %761 = arith.negf %760 : vector<2x32xf32>
    %762 = math.exp %761 : vector<2x32xf32>
    %cst_179 = arith.constant 1.000000e+00 : f32
    %763 = vector.broadcast %cst_179 : f32 to vector<2x32xf32>
    %764 = arith.addf %763, %762 : vector<2x32xf32>
    %765 = arith.divf %763, %764 : vector<2x32xf32>
    %766 = vector.extract_strided_slice %746 {offsets = [0, 64], sizes = [2, 32], strides = [1, 1]} : vector<2x96xf32> to vector<2x32xf32>
    %767 = vector.extract_strided_slice %749 {offsets = [0, 64], sizes = [2, 32], strides = [1, 1]} : vector<2x96xf32> to vector<2x32xf32>
    %768 = arith.mulf %757, %767 : vector<2x32xf32>
    %769 = arith.addf %766, %768 : vector<2x32xf32>
    %770 = math.tanh %769 : vector<2x32xf32>
    %cst_180 = arith.constant 1.000000e+00 : f32
    %771 = vector.broadcast %cst_180 : f32 to vector<2x32xf32>
    %772 = arith.subf %771, %765 : vector<2x32xf32>
    %773 = arith.mulf %772, %770 : vector<2x32xf32>
    %774 = arith.mulf %765, %713 : vector<2x32xf32>
    %775 = arith.addf %773, %774 : vector<2x32xf32>
    %776 = vector.extract_strided_slice %85 {offsets = [22, 0], sizes = [2, 96], strides = [1, 1]} : vector<32x96xf32> to vector<2x96xf32>
    %cst_181 = arith.constant dense<0.000000e+00> : vector<2x96xf32>
    %777 = tpu.matmul %743, %86, %cst_181 {dimension_numbers = #tpu.dot_dimension_numbers<[1], [0], [0], [1], [0, 0, 1, 1], [], []>} : vector<2x32xf32>, vector<32x96xf32>, vector<2x96xf32> -> vector<2x96xf32>
    %778 = vector.broadcast %87 : vector<1x96xf32> to vector<2x96xf32>
    %779 = arith.addf %777, %778 : vector<2x96xf32>
    %780 = vector.extract_strided_slice %776 {offsets = [0, 0], sizes = [2, 32], strides = [1, 1]} : vector<2x96xf32> to vector<2x32xf32>
    %781 = vector.extract_strided_slice %779 {offsets = [0, 0], sizes = [2, 32], strides = [1, 1]} : vector<2x96xf32> to vector<2x32xf32>
    %782 = arith.addf %780, %781 : vector<2x32xf32>
    %783 = arith.negf %782 : vector<2x32xf32>
    %784 = math.exp %783 : vector<2x32xf32>
    %cst_182 = arith.constant 1.000000e+00 : f32
    %785 = vector.broadcast %cst_182 : f32 to vector<2x32xf32>
    %786 = arith.addf %785, %784 : vector<2x32xf32>
    %787 = arith.divf %785, %786 : vector<2x32xf32>
    %788 = vector.extract_strided_slice %776 {offsets = [0, 32], sizes = [2, 32], strides = [1, 1]} : vector<2x96xf32> to vector<2x32xf32>
    %789 = vector.extract_strided_slice %779 {offsets = [0, 32], sizes = [2, 32], strides = [1, 1]} : vector<2x96xf32> to vector<2x32xf32>
    %790 = arith.addf %788, %789 : vector<2x32xf32>
    %791 = arith.negf %790 : vector<2x32xf32>
    %792 = math.exp %791 : vector<2x32xf32>
    %cst_183 = arith.constant 1.000000e+00 : f32
    %793 = vector.broadcast %cst_183 : f32 to vector<2x32xf32>
    %794 = arith.addf %793, %792 : vector<2x32xf32>
    %795 = arith.divf %793, %794 : vector<2x32xf32>
    %796 = vector.extract_strided_slice %776 {offsets = [0, 64], sizes = [2, 32], strides = [1, 1]} : vector<2x96xf32> to vector<2x32xf32>
    %797 = vector.extract_strided_slice %779 {offsets = [0, 64], sizes = [2, 32], strides = [1, 1]} : vector<2x96xf32> to vector<2x32xf32>
    %798 = arith.mulf %787, %797 : vector<2x32xf32>
    %799 = arith.addf %796, %798 : vector<2x32xf32>
    %800 = math.tanh %799 : vector<2x32xf32>
    %cst_184 = arith.constant 1.000000e+00 : f32
    %801 = vector.broadcast %cst_184 : f32 to vector<2x32xf32>
    %802 = arith.subf %801, %795 : vector<2x32xf32>
    %803 = arith.mulf %802, %800 : vector<2x32xf32>
    %804 = arith.mulf %795, %743 : vector<2x32xf32>
    %805 = arith.addf %803, %804 : vector<2x32xf32>
    %cst_185 = arith.constant dense<0.000000e+00> : vector<2x96xf32>
    %806 = tpu.matmul %805, %88, %cst_185 {dimension_numbers = #tpu.dot_dimension_numbers<[1], [0], [0], [1], [0, 0, 1, 1], [], []>} : vector<2x32xf32>, vector<32x96xf32>, vector<2x96xf32> -> vector<2x96xf32>
    %807 = vector.broadcast %89 : vector<1x96xf32> to vector<2x96xf32>
    %808 = arith.addf %806, %807 : vector<2x96xf32>
    %cst_186 = arith.constant dense<0.000000e+00> : vector<2x96xf32>
    %809 = tpu.matmul %775, %90, %cst_186 {dimension_numbers = #tpu.dot_dimension_numbers<[1], [0], [0], [1], [0, 0, 1, 1], [], []>} : vector<2x32xf32>, vector<32x96xf32>, vector<2x96xf32> -> vector<2x96xf32>
    %810 = vector.broadcast %91 : vector<1x96xf32> to vector<2x96xf32>
    %811 = arith.addf %809, %810 : vector<2x96xf32>
    %812 = vector.extract_strided_slice %808 {offsets = [0, 0], sizes = [2, 32], strides = [1, 1]} : vector<2x96xf32> to vector<2x32xf32>
    %813 = vector.extract_strided_slice %811 {offsets = [0, 0], sizes = [2, 32], strides = [1, 1]} : vector<2x96xf32> to vector<2x32xf32>
    %814 = arith.addf %812, %813 : vector<2x32xf32>
    %815 = arith.negf %814 : vector<2x32xf32>
    %816 = math.exp %815 : vector<2x32xf32>
    %cst_187 = arith.constant 1.000000e+00 : f32
    %817 = vector.broadcast %cst_187 : f32 to vector<2x32xf32>
    %818 = arith.addf %817, %816 : vector<2x32xf32>
    %819 = arith.divf %817, %818 : vector<2x32xf32>
    %820 = vector.extract_strided_slice %808 {offsets = [0, 32], sizes = [2, 32], strides = [1, 1]} : vector<2x96xf32> to vector<2x32xf32>
    %821 = vector.extract_strided_slice %811 {offsets = [0, 32], sizes = [2, 32], strides = [1, 1]} : vector<2x96xf32> to vector<2x32xf32>
    %822 = arith.addf %820, %821 : vector<2x32xf32>
    %823 = arith.negf %822 : vector<2x32xf32>
    %824 = math.exp %823 : vector<2x32xf32>
    %cst_188 = arith.constant 1.000000e+00 : f32
    %825 = vector.broadcast %cst_188 : f32 to vector<2x32xf32>
    %826 = arith.addf %825, %824 : vector<2x32xf32>
    %827 = arith.divf %825, %826 : vector<2x32xf32>
    %828 = vector.extract_strided_slice %808 {offsets = [0, 64], sizes = [2, 32], strides = [1, 1]} : vector<2x96xf32> to vector<2x32xf32>
    %829 = vector.extract_strided_slice %811 {offsets = [0, 64], sizes = [2, 32], strides = [1, 1]} : vector<2x96xf32> to vector<2x32xf32>
    %830 = arith.mulf %819, %829 : vector<2x32xf32>
    %831 = arith.addf %828, %830 : vector<2x32xf32>
    %832 = math.tanh %831 : vector<2x32xf32>
    %cst_189 = arith.constant 1.000000e+00 : f32
    %833 = vector.broadcast %cst_189 : f32 to vector<2x32xf32>
    %834 = arith.subf %833, %827 : vector<2x32xf32>
    %835 = arith.mulf %834, %832 : vector<2x32xf32>
    %836 = arith.mulf %827, %775 : vector<2x32xf32>
    %837 = arith.addf %835, %836 : vector<2x32xf32>
    %838 = vector.extract_strided_slice %85 {offsets = [24, 0], sizes = [2, 96], strides = [1, 1]} : vector<32x96xf32> to vector<2x96xf32>
    %cst_190 = arith.constant dense<0.000000e+00> : vector<2x96xf32>
    %839 = tpu.matmul %805, %86, %cst_190 {dimension_numbers = #tpu.dot_dimension_numbers<[1], [0], [0], [1], [0, 0, 1, 1], [], []>} : vector<2x32xf32>, vector<32x96xf32>, vector<2x96xf32> -> vector<2x96xf32>
    %840 = vector.broadcast %87 : vector<1x96xf32> to vector<2x96xf32>
    %841 = arith.addf %839, %840 : vector<2x96xf32>
    %842 = vector.extract_strided_slice %838 {offsets = [0, 0], sizes = [2, 32], strides = [1, 1]} : vector<2x96xf32> to vector<2x32xf32>
    %843 = vector.extract_strided_slice %841 {offsets = [0, 0], sizes = [2, 32], strides = [1, 1]} : vector<2x96xf32> to vector<2x32xf32>
    %844 = arith.addf %842, %843 : vector<2x32xf32>
    %845 = arith.negf %844 : vector<2x32xf32>
    %846 = math.exp %845 : vector<2x32xf32>
    %cst_191 = arith.constant 1.000000e+00 : f32
    %847 = vector.broadcast %cst_191 : f32 to vector<2x32xf32>
    %848 = arith.addf %847, %846 : vector<2x32xf32>
    %849 = arith.divf %847, %848 : vector<2x32xf32>
    %850 = vector.extract_strided_slice %838 {offsets = [0, 32], sizes = [2, 32], strides = [1, 1]} : vector<2x96xf32> to vector<2x32xf32>
    %851 = vector.extract_strided_slice %841 {offsets = [0, 32], sizes = [2, 32], strides = [1, 1]} : vector<2x96xf32> to vector<2x32xf32>
    %852 = arith.addf %850, %851 : vector<2x32xf32>
    %853 = arith.negf %852 : vector<2x32xf32>
    %854 = math.exp %853 : vector<2x32xf32>
    %cst_192 = arith.constant 1.000000e+00 : f32
    %855 = vector.broadcast %cst_192 : f32 to vector<2x32xf32>
    %856 = arith.addf %855, %854 : vector<2x32xf32>
    %857 = arith.divf %855, %856 : vector<2x32xf32>
    %858 = vector.extract_strided_slice %838 {offsets = [0, 64], sizes = [2, 32], strides = [1, 1]} : vector<2x96xf32> to vector<2x32xf32>
    %859 = vector.extract_strided_slice %841 {offsets = [0, 64], sizes = [2, 32], strides = [1, 1]} : vector<2x96xf32> to vector<2x32xf32>
    %860 = arith.mulf %849, %859 : vector<2x32xf32>
    %861 = arith.addf %858, %860 : vector<2x32xf32>
    %862 = math.tanh %861 : vector<2x32xf32>
    %cst_193 = arith.constant 1.000000e+00 : f32
    %863 = vector.broadcast %cst_193 : f32 to vector<2x32xf32>
    %864 = arith.subf %863, %857 : vector<2x32xf32>
    %865 = arith.mulf %864, %862 : vector<2x32xf32>
    %866 = arith.mulf %857, %805 : vector<2x32xf32>
    %867 = arith.addf %865, %866 : vector<2x32xf32>
    %cst_194 = arith.constant dense<0.000000e+00> : vector<2x96xf32>
    %868 = tpu.matmul %867, %88, %cst_194 {dimension_numbers = #tpu.dot_dimension_numbers<[1], [0], [0], [1], [0, 0, 1, 1], [], []>} : vector<2x32xf32>, vector<32x96xf32>, vector<2x96xf32> -> vector<2x96xf32>
    %869 = vector.broadcast %89 : vector<1x96xf32> to vector<2x96xf32>
    %870 = arith.addf %868, %869 : vector<2x96xf32>
    %cst_195 = arith.constant dense<0.000000e+00> : vector<2x96xf32>
    %871 = tpu.matmul %837, %90, %cst_195 {dimension_numbers = #tpu.dot_dimension_numbers<[1], [0], [0], [1], [0, 0, 1, 1], [], []>} : vector<2x32xf32>, vector<32x96xf32>, vector<2x96xf32> -> vector<2x96xf32>
    %872 = vector.broadcast %91 : vector<1x96xf32> to vector<2x96xf32>
    %873 = arith.addf %871, %872 : vector<2x96xf32>
    %874 = vector.extract_strided_slice %870 {offsets = [0, 0], sizes = [2, 32], strides = [1, 1]} : vector<2x96xf32> to vector<2x32xf32>
    %875 = vector.extract_strided_slice %873 {offsets = [0, 0], sizes = [2, 32], strides = [1, 1]} : vector<2x96xf32> to vector<2x32xf32>
    %876 = arith.addf %874, %875 : vector<2x32xf32>
    %877 = arith.negf %876 : vector<2x32xf32>
    %878 = math.exp %877 : vector<2x32xf32>
    %cst_196 = arith.constant 1.000000e+00 : f32
    %879 = vector.broadcast %cst_196 : f32 to vector<2x32xf32>
    %880 = arith.addf %879, %878 : vector<2x32xf32>
    %881 = arith.divf %879, %880 : vector<2x32xf32>
    %882 = vector.extract_strided_slice %870 {offsets = [0, 32], sizes = [2, 32], strides = [1, 1]} : vector<2x96xf32> to vector<2x32xf32>
    %883 = vector.extract_strided_slice %873 {offsets = [0, 32], sizes = [2, 32], strides = [1, 1]} : vector<2x96xf32> to vector<2x32xf32>
    %884 = arith.addf %882, %883 : vector<2x32xf32>
    %885 = arith.negf %884 : vector<2x32xf32>
    %886 = math.exp %885 : vector<2x32xf32>
    %cst_197 = arith.constant 1.000000e+00 : f32
    %887 = vector.broadcast %cst_197 : f32 to vector<2x32xf32>
    %888 = arith.addf %887, %886 : vector<2x32xf32>
    %889 = arith.divf %887, %888 : vector<2x32xf32>
    %890 = vector.extract_strided_slice %870 {offsets = [0, 64], sizes = [2, 32], strides = [1, 1]} : vector<2x96xf32> to vector<2x32xf32>
    %891 = vector.extract_strided_slice %873 {offsets = [0, 64], sizes = [2, 32], strides = [1, 1]} : vector<2x96xf32> to vector<2x32xf32>
    %892 = arith.mulf %881, %891 : vector<2x32xf32>
    %893 = arith.addf %890, %892 : vector<2x32xf32>
    %894 = math.tanh %893 : vector<2x32xf32>
    %cst_198 = arith.constant 1.000000e+00 : f32
    %895 = vector.broadcast %cst_198 : f32 to vector<2x32xf32>
    %896 = arith.subf %895, %889 : vector<2x32xf32>
    %897 = arith.mulf %896, %894 : vector<2x32xf32>
    %898 = arith.mulf %889, %837 : vector<2x32xf32>
    %899 = arith.addf %897, %898 : vector<2x32xf32>
    %900 = vector.extract_strided_slice %85 {offsets = [26, 0], sizes = [2, 96], strides = [1, 1]} : vector<32x96xf32> to vector<2x96xf32>
    %cst_199 = arith.constant dense<0.000000e+00> : vector<2x96xf32>
    %901 = tpu.matmul %867, %86, %cst_199 {dimension_numbers = #tpu.dot_dimension_numbers<[1], [0], [0], [1], [0, 0, 1, 1], [], []>} : vector<2x32xf32>, vector<32x96xf32>, vector<2x96xf32> -> vector<2x96xf32>
    %902 = vector.broadcast %87 : vector<1x96xf32> to vector<2x96xf32>
    %903 = arith.addf %901, %902 : vector<2x96xf32>
    %904 = vector.extract_strided_slice %900 {offsets = [0, 0], sizes = [2, 32], strides = [1, 1]} : vector<2x96xf32> to vector<2x32xf32>
    %905 = vector.extract_strided_slice %903 {offsets = [0, 0], sizes = [2, 32], strides = [1, 1]} : vector<2x96xf32> to vector<2x32xf32>
    %906 = arith.addf %904, %905 : vector<2x32xf32>
    %907 = arith.negf %906 : vector<2x32xf32>
    %908 = math.exp %907 : vector<2x32xf32>
    %cst_200 = arith.constant 1.000000e+00 : f32
    %909 = vector.broadcast %cst_200 : f32 to vector<2x32xf32>
    %910 = arith.addf %909, %908 : vector<2x32xf32>
    %911 = arith.divf %909, %910 : vector<2x32xf32>
    %912 = vector.extract_strided_slice %900 {offsets = [0, 32], sizes = [2, 32], strides = [1, 1]} : vector<2x96xf32> to vector<2x32xf32>
    %913 = vector.extract_strided_slice %903 {offsets = [0, 32], sizes = [2, 32], strides = [1, 1]} : vector<2x96xf32> to vector<2x32xf32>
    %914 = arith.addf %912, %913 : vector<2x32xf32>
    %915 = arith.negf %914 : vector<2x32xf32>
    %916 = math.exp %915 : vector<2x32xf32>
    %cst_201 = arith.constant 1.000000e+00 : f32
    %917 = vector.broadcast %cst_201 : f32 to vector<2x32xf32>
    %918 = arith.addf %917, %916 : vector<2x32xf32>
    %919 = arith.divf %917, %918 : vector<2x32xf32>
    %920 = vector.extract_strided_slice %900 {offsets = [0, 64], sizes = [2, 32], strides = [1, 1]} : vector<2x96xf32> to vector<2x32xf32>
    %921 = vector.extract_strided_slice %903 {offsets = [0, 64], sizes = [2, 32], strides = [1, 1]} : vector<2x96xf32> to vector<2x32xf32>
    %922 = arith.mulf %911, %921 : vector<2x32xf32>
    %923 = arith.addf %920, %922 : vector<2x32xf32>
    %924 = math.tanh %923 : vector<2x32xf32>
    %cst_202 = arith.constant 1.000000e+00 : f32
    %925 = vector.broadcast %cst_202 : f32 to vector<2x32xf32>
    %926 = arith.subf %925, %919 : vector<2x32xf32>
    %927 = arith.mulf %926, %924 : vector<2x32xf32>
    %928 = arith.mulf %919, %867 : vector<2x32xf32>
    %929 = arith.addf %927, %928 : vector<2x32xf32>
    %cst_203 = arith.constant dense<0.000000e+00> : vector<2x96xf32>
    %930 = tpu.matmul %929, %88, %cst_203 {dimension_numbers = #tpu.dot_dimension_numbers<[1], [0], [0], [1], [0, 0, 1, 1], [], []>} : vector<2x32xf32>, vector<32x96xf32>, vector<2x96xf32> -> vector<2x96xf32>
    %931 = vector.broadcast %89 : vector<1x96xf32> to vector<2x96xf32>
    %932 = arith.addf %930, %931 : vector<2x96xf32>
    %cst_204 = arith.constant dense<0.000000e+00> : vector<2x96xf32>
    %933 = tpu.matmul %899, %90, %cst_204 {dimension_numbers = #tpu.dot_dimension_numbers<[1], [0], [0], [1], [0, 0, 1, 1], [], []>} : vector<2x32xf32>, vector<32x96xf32>, vector<2x96xf32> -> vector<2x96xf32>
    %934 = vector.broadcast %91 : vector<1x96xf32> to vector<2x96xf32>
    %935 = arith.addf %933, %934 : vector<2x96xf32>
    %936 = vector.extract_strided_slice %932 {offsets = [0, 0], sizes = [2, 32], strides = [1, 1]} : vector<2x96xf32> to vector<2x32xf32>
    %937 = vector.extract_strided_slice %935 {offsets = [0, 0], sizes = [2, 32], strides = [1, 1]} : vector<2x96xf32> to vector<2x32xf32>
    %938 = arith.addf %936, %937 : vector<2x32xf32>
    %939 = arith.negf %938 : vector<2x32xf32>
    %940 = math.exp %939 : vector<2x32xf32>
    %cst_205 = arith.constant 1.000000e+00 : f32
    %941 = vector.broadcast %cst_205 : f32 to vector<2x32xf32>
    %942 = arith.addf %941, %940 : vector<2x32xf32>
    %943 = arith.divf %941, %942 : vector<2x32xf32>
    %944 = vector.extract_strided_slice %932 {offsets = [0, 32], sizes = [2, 32], strides = [1, 1]} : vector<2x96xf32> to vector<2x32xf32>
    %945 = vector.extract_strided_slice %935 {offsets = [0, 32], sizes = [2, 32], strides = [1, 1]} : vector<2x96xf32> to vector<2x32xf32>
    %946 = arith.addf %944, %945 : vector<2x32xf32>
    %947 = arith.negf %946 : vector<2x32xf32>
    %948 = math.exp %947 : vector<2x32xf32>
    %cst_206 = arith.constant 1.000000e+00 : f32
    %949 = vector.broadcast %cst_206 : f32 to vector<2x32xf32>
    %950 = arith.addf %949, %948 : vector<2x32xf32>
    %951 = arith.divf %949, %950 : vector<2x32xf32>
    %952 = vector.extract_strided_slice %932 {offsets = [0, 64], sizes = [2, 32], strides = [1, 1]} : vector<2x96xf32> to vector<2x32xf32>
    %953 = vector.extract_strided_slice %935 {offsets = [0, 64], sizes = [2, 32], strides = [1, 1]} : vector<2x96xf32> to vector<2x32xf32>
    %954 = arith.mulf %943, %953 : vector<2x32xf32>
    %955 = arith.addf %952, %954 : vector<2x32xf32>
    %956 = math.tanh %955 : vector<2x32xf32>
    %cst_207 = arith.constant 1.000000e+00 : f32
    %957 = vector.broadcast %cst_207 : f32 to vector<2x32xf32>
    %958 = arith.subf %957, %951 : vector<2x32xf32>
    %959 = arith.mulf %958, %956 : vector<2x32xf32>
    %960 = arith.mulf %951, %899 : vector<2x32xf32>
    %961 = arith.addf %959, %960 : vector<2x32xf32>
    %962 = vector.extract_strided_slice %85 {offsets = [28, 0], sizes = [2, 96], strides = [1, 1]} : vector<32x96xf32> to vector<2x96xf32>
    %cst_208 = arith.constant dense<0.000000e+00> : vector<2x96xf32>
    %963 = tpu.matmul %929, %86, %cst_208 {dimension_numbers = #tpu.dot_dimension_numbers<[1], [0], [0], [1], [0, 0, 1, 1], [], []>} : vector<2x32xf32>, vector<32x96xf32>, vector<2x96xf32> -> vector<2x96xf32>
    %964 = vector.broadcast %87 : vector<1x96xf32> to vector<2x96xf32>
    %965 = arith.addf %963, %964 : vector<2x96xf32>
    %966 = vector.extract_strided_slice %962 {offsets = [0, 0], sizes = [2, 32], strides = [1, 1]} : vector<2x96xf32> to vector<2x32xf32>
    %967 = vector.extract_strided_slice %965 {offsets = [0, 0], sizes = [2, 32], strides = [1, 1]} : vector<2x96xf32> to vector<2x32xf32>
    %968 = arith.addf %966, %967 : vector<2x32xf32>
    %969 = arith.negf %968 : vector<2x32xf32>
    %970 = math.exp %969 : vector<2x32xf32>
    %cst_209 = arith.constant 1.000000e+00 : f32
    %971 = vector.broadcast %cst_209 : f32 to vector<2x32xf32>
    %972 = arith.addf %971, %970 : vector<2x32xf32>
    %973 = arith.divf %971, %972 : vector<2x32xf32>
    %974 = vector.extract_strided_slice %962 {offsets = [0, 32], sizes = [2, 32], strides = [1, 1]} : vector<2x96xf32> to vector<2x32xf32>
    %975 = vector.extract_strided_slice %965 {offsets = [0, 32], sizes = [2, 32], strides = [1, 1]} : vector<2x96xf32> to vector<2x32xf32>
    %976 = arith.addf %974, %975 : vector<2x32xf32>
    %977 = arith.negf %976 : vector<2x32xf32>
    %978 = math.exp %977 : vector<2x32xf32>
    %cst_210 = arith.constant 1.000000e+00 : f32
    %979 = vector.broadcast %cst_210 : f32 to vector<2x32xf32>
    %980 = arith.addf %979, %978 : vector<2x32xf32>
    %981 = arith.divf %979, %980 : vector<2x32xf32>
    %982 = vector.extract_strided_slice %962 {offsets = [0, 64], sizes = [2, 32], strides = [1, 1]} : vector<2x96xf32> to vector<2x32xf32>
    %983 = vector.extract_strided_slice %965 {offsets = [0, 64], sizes = [2, 32], strides = [1, 1]} : vector<2x96xf32> to vector<2x32xf32>
    %984 = arith.mulf %973, %983 : vector<2x32xf32>
    %985 = arith.addf %982, %984 : vector<2x32xf32>
    %986 = math.tanh %985 : vector<2x32xf32>
    %cst_211 = arith.constant 1.000000e+00 : f32
    %987 = vector.broadcast %cst_211 : f32 to vector<2x32xf32>
    %988 = arith.subf %987, %981 : vector<2x32xf32>
    %989 = arith.mulf %988, %986 : vector<2x32xf32>
    %990 = arith.mulf %981, %929 : vector<2x32xf32>
    %991 = arith.addf %989, %990 : vector<2x32xf32>
    %cst_212 = arith.constant dense<0.000000e+00> : vector<2x96xf32>
    %992 = tpu.matmul %991, %88, %cst_212 {dimension_numbers = #tpu.dot_dimension_numbers<[1], [0], [0], [1], [0, 0, 1, 1], [], []>} : vector<2x32xf32>, vector<32x96xf32>, vector<2x96xf32> -> vector<2x96xf32>
    %993 = vector.broadcast %89 : vector<1x96xf32> to vector<2x96xf32>
    %994 = arith.addf %992, %993 : vector<2x96xf32>
    %cst_213 = arith.constant dense<0.000000e+00> : vector<2x96xf32>
    %995 = tpu.matmul %961, %90, %cst_213 {dimension_numbers = #tpu.dot_dimension_numbers<[1], [0], [0], [1], [0, 0, 1, 1], [], []>} : vector<2x32xf32>, vector<32x96xf32>, vector<2x96xf32> -> vector<2x96xf32>
    %996 = vector.broadcast %91 : vector<1x96xf32> to vector<2x96xf32>
    %997 = arith.addf %995, %996 : vector<2x96xf32>
    %998 = vector.extract_strided_slice %994 {offsets = [0, 0], sizes = [2, 32], strides = [1, 1]} : vector<2x96xf32> to vector<2x32xf32>
    %999 = vector.extract_strided_slice %997 {offsets = [0, 0], sizes = [2, 32], strides = [1, 1]} : vector<2x96xf32> to vector<2x32xf32>
    %1000 = arith.addf %998, %999 : vector<2x32xf32>
    %1001 = arith.negf %1000 : vector<2x32xf32>
    %1002 = math.exp %1001 : vector<2x32xf32>
    %cst_214 = arith.constant 1.000000e+00 : f32
    %1003 = vector.broadcast %cst_214 : f32 to vector<2x32xf32>
    %1004 = arith.addf %1003, %1002 : vector<2x32xf32>
    %1005 = arith.divf %1003, %1004 : vector<2x32xf32>
    %1006 = vector.extract_strided_slice %994 {offsets = [0, 32], sizes = [2, 32], strides = [1, 1]} : vector<2x96xf32> to vector<2x32xf32>
    %1007 = vector.extract_strided_slice %997 {offsets = [0, 32], sizes = [2, 32], strides = [1, 1]} : vector<2x96xf32> to vector<2x32xf32>
    %1008 = arith.addf %1006, %1007 : vector<2x32xf32>
    %1009 = arith.negf %1008 : vector<2x32xf32>
    %1010 = math.exp %1009 : vector<2x32xf32>
    %cst_215 = arith.constant 1.000000e+00 : f32
    %1011 = vector.broadcast %cst_215 : f32 to vector<2x32xf32>
    %1012 = arith.addf %1011, %1010 : vector<2x32xf32>
    %1013 = arith.divf %1011, %1012 : vector<2x32xf32>
    %1014 = vector.extract_strided_slice %994 {offsets = [0, 64], sizes = [2, 32], strides = [1, 1]} : vector<2x96xf32> to vector<2x32xf32>
    %1015 = vector.extract_strided_slice %997 {offsets = [0, 64], sizes = [2, 32], strides = [1, 1]} : vector<2x96xf32> to vector<2x32xf32>
    %1016 = arith.mulf %1005, %1015 : vector<2x32xf32>
    %1017 = arith.addf %1014, %1016 : vector<2x32xf32>
    %1018 = math.tanh %1017 : vector<2x32xf32>
    %cst_216 = arith.constant 1.000000e+00 : f32
    %1019 = vector.broadcast %cst_216 : f32 to vector<2x32xf32>
    %1020 = arith.subf %1019, %1013 : vector<2x32xf32>
    %1021 = arith.mulf %1020, %1018 : vector<2x32xf32>
    %1022 = arith.mulf %1013, %961 : vector<2x32xf32>
    %1023 = arith.addf %1021, %1022 : vector<2x32xf32>
    %1024 = vector.extract_strided_slice %85 {offsets = [30, 0], sizes = [2, 96], strides = [1, 1]} : vector<32x96xf32> to vector<2x96xf32>
    %cst_217 = arith.constant dense<0.000000e+00> : vector<2x96xf32>
    %1025 = tpu.matmul %991, %86, %cst_217 {dimension_numbers = #tpu.dot_dimension_numbers<[1], [0], [0], [1], [0, 0, 1, 1], [], []>} : vector<2x32xf32>, vector<32x96xf32>, vector<2x96xf32> -> vector<2x96xf32>
    %1026 = vector.broadcast %87 : vector<1x96xf32> to vector<2x96xf32>
    %1027 = arith.addf %1025, %1026 : vector<2x96xf32>
    %1028 = vector.extract_strided_slice %1024 {offsets = [0, 0], sizes = [2, 32], strides = [1, 1]} : vector<2x96xf32> to vector<2x32xf32>
    %1029 = vector.extract_strided_slice %1027 {offsets = [0, 0], sizes = [2, 32], strides = [1, 1]} : vector<2x96xf32> to vector<2x32xf32>
    %1030 = arith.addf %1028, %1029 : vector<2x32xf32>
    %1031 = arith.negf %1030 : vector<2x32xf32>
    %1032 = math.exp %1031 : vector<2x32xf32>
    %cst_218 = arith.constant 1.000000e+00 : f32
    %1033 = vector.broadcast %cst_218 : f32 to vector<2x32xf32>
    %1034 = arith.addf %1033, %1032 : vector<2x32xf32>
    %1035 = arith.divf %1033, %1034 : vector<2x32xf32>
    %1036 = vector.extract_strided_slice %1024 {offsets = [0, 32], sizes = [2, 32], strides = [1, 1]} : vector<2x96xf32> to vector<2x32xf32>
    %1037 = vector.extract_strided_slice %1027 {offsets = [0, 32], sizes = [2, 32], strides = [1, 1]} : vector<2x96xf32> to vector<2x32xf32>
    %1038 = arith.addf %1036, %1037 : vector<2x32xf32>
    %1039 = arith.negf %1038 : vector<2x32xf32>
    %1040 = math.exp %1039 : vector<2x32xf32>
    %cst_219 = arith.constant 1.000000e+00 : f32
    %1041 = vector.broadcast %cst_219 : f32 to vector<2x32xf32>
    %1042 = arith.addf %1041, %1040 : vector<2x32xf32>
    %1043 = arith.divf %1041, %1042 : vector<2x32xf32>
    %1044 = vector.extract_strided_slice %1024 {offsets = [0, 64], sizes = [2, 32], strides = [1, 1]} : vector<2x96xf32> to vector<2x32xf32>
    %1045 = vector.extract_strided_slice %1027 {offsets = [0, 64], sizes = [2, 32], strides = [1, 1]} : vector<2x96xf32> to vector<2x32xf32>
    %1046 = arith.mulf %1035, %1045 : vector<2x32xf32>
    %1047 = arith.addf %1044, %1046 : vector<2x32xf32>
    %1048 = math.tanh %1047 : vector<2x32xf32>
    %cst_220 = arith.constant 1.000000e+00 : f32
    %1049 = vector.broadcast %cst_220 : f32 to vector<2x32xf32>
    %1050 = arith.subf %1049, %1043 : vector<2x32xf32>
    %1051 = arith.mulf %1050, %1048 : vector<2x32xf32>
    %1052 = arith.mulf %1043, %991 : vector<2x32xf32>
    %1053 = arith.addf %1051, %1052 : vector<2x32xf32>
    %cst_221 = arith.constant dense<0.000000e+00> : vector<2x96xf32>
    %1054 = tpu.matmul %1053, %88, %cst_221 {dimension_numbers = #tpu.dot_dimension_numbers<[1], [0], [0], [1], [0, 0, 1, 1], [], []>} : vector<2x32xf32>, vector<32x96xf32>, vector<2x96xf32> -> vector<2x96xf32>
    %1055 = vector.broadcast %89 : vector<1x96xf32> to vector<2x96xf32>
    %1056 = arith.addf %1054, %1055 : vector<2x96xf32>
    %cst_222 = arith.constant dense<0.000000e+00> : vector<2x96xf32>
    %1057 = tpu.matmul %1023, %90, %cst_222 {dimension_numbers = #tpu.dot_dimension_numbers<[1], [0], [0], [1], [0, 0, 1, 1], [], []>} : vector<2x32xf32>, vector<32x96xf32>, vector<2x96xf32> -> vector<2x96xf32>
    %1058 = vector.broadcast %91 : vector<1x96xf32> to vector<2x96xf32>
    %1059 = arith.addf %1057, %1058 : vector<2x96xf32>
    %1060 = vector.extract_strided_slice %1056 {offsets = [0, 0], sizes = [2, 32], strides = [1, 1]} : vector<2x96xf32> to vector<2x32xf32>
    %1061 = vector.extract_strided_slice %1059 {offsets = [0, 0], sizes = [2, 32], strides = [1, 1]} : vector<2x96xf32> to vector<2x32xf32>
    %1062 = arith.addf %1060, %1061 : vector<2x32xf32>
    %1063 = arith.negf %1062 : vector<2x32xf32>
    %1064 = math.exp %1063 : vector<2x32xf32>
    %cst_223 = arith.constant 1.000000e+00 : f32
    %1065 = vector.broadcast %cst_223 : f32 to vector<2x32xf32>
    %1066 = arith.addf %1065, %1064 : vector<2x32xf32>
    %1067 = arith.divf %1065, %1066 : vector<2x32xf32>
    %1068 = vector.extract_strided_slice %1056 {offsets = [0, 32], sizes = [2, 32], strides = [1, 1]} : vector<2x96xf32> to vector<2x32xf32>
    %1069 = vector.extract_strided_slice %1059 {offsets = [0, 32], sizes = [2, 32], strides = [1, 1]} : vector<2x96xf32> to vector<2x32xf32>
    %1070 = arith.addf %1068, %1069 : vector<2x32xf32>
    %1071 = arith.negf %1070 : vector<2x32xf32>
    %1072 = math.exp %1071 : vector<2x32xf32>
    %cst_224 = arith.constant 1.000000e+00 : f32
    %1073 = vector.broadcast %cst_224 : f32 to vector<2x32xf32>
    %1074 = arith.addf %1073, %1072 : vector<2x32xf32>
    %1075 = arith.divf %1073, %1074 : vector<2x32xf32>
    %1076 = vector.extract_strided_slice %1056 {offsets = [0, 64], sizes = [2, 32], strides = [1, 1]} : vector<2x96xf32> to vector<2x32xf32>
    %1077 = vector.extract_strided_slice %1059 {offsets = [0, 64], sizes = [2, 32], strides = [1, 1]} : vector<2x96xf32> to vector<2x32xf32>
    %1078 = arith.mulf %1067, %1077 : vector<2x32xf32>
    %1079 = arith.addf %1076, %1078 : vector<2x32xf32>
    %1080 = math.tanh %1079 : vector<2x32xf32>
    %cst_225 = arith.constant 1.000000e+00 : f32
    %1081 = vector.broadcast %cst_225 : f32 to vector<2x32xf32>
    %1082 = arith.subf %1081, %1075 : vector<2x32xf32>
    %1083 = arith.mulf %1082, %1080 : vector<2x32xf32>
    %1084 = arith.mulf %1075, %1023 : vector<2x32xf32>
    %1085 = arith.addf %1083, %1084 : vector<2x32xf32>
    %c0_226 = arith.constant 0 : index
    %c0_227 = arith.constant 0 : index
    %1086 = vector.load %arg16[%c0_226, %c0_227] : memref<32x8xf32, #tpu.memory_space<vmem>>, vector<32x8xf32>
    %cst_228 = arith.constant dense<0.000000e+00> : vector<2x8xf32>
    %1087 = tpu.matmul %1085, %1086, %cst_228 {dimension_numbers = #tpu.dot_dimension_numbers<[1], [0], [0], [1], [0, 0, 1, 1], [], []>} : vector<2x32xf32>, vector<32x8xf32>, vector<2x8xf32> -> vector<2x8xf32>
    %c0_229 = arith.constant 0 : index
    %c0_230 = arith.constant 0 : index
    %1088 = vector.load %arg17[%c0_229, %c0_230] : memref<1x8xf32, #tpu.memory_space<vmem>>, vector<1x8xf32>
    %1089 = vector.broadcast %1088 : vector<1x8xf32> to vector<2x8xf32>
    %1090 = arith.addf %1087, %1089 : vector<2x8xf32>
    %c0_231 = arith.constant 0 : index
    %c0_232 = arith.constant 0 : index
    %1091 = vector.load %arg18[%c0_231, %c0_232] : memref<32x8xf32, #tpu.memory_space<vmem>>, vector<32x8xf32>
    %cst_233 = arith.constant dense<0.000000e+00> : vector<2x8xf32>
    %1092 = tpu.matmul %1085, %1091, %cst_233 {dimension_numbers = #tpu.dot_dimension_numbers<[1], [0], [0], [1], [0, 0, 1, 1], [], []>} : vector<2x32xf32>, vector<32x8xf32>, vector<2x8xf32> -> vector<2x8xf32>
    %c0_234 = arith.constant 0 : index
    %c0_235 = arith.constant 0 : index
    %1093 = vector.load %arg19[%c0_234, %c0_235] : memref<1x8xf32, #tpu.memory_space<vmem>>, vector<1x8xf32>
    %1094 = vector.broadcast %1093 : vector<1x8xf32> to vector<2x8xf32>
    %1095 = arith.addf %1092, %1094 : vector<2x8xf32>
    %1096 = math.absf %1095 : vector<2x8xf32>
    %cst_236 = arith.constant 0.000000e+00 : f32
    %1097 = vector.broadcast %cst_236 : f32 to vector<2x8xf32>
    %1098 = arith.subf %1097, %1096 : vector<2x8xf32>
    %cst_237 = arith.constant 1.000000e+00 : f32
    %1099 = vector.broadcast %cst_237 : f32 to vector<2x8xf32>
    %1100 = arith.addf %1099, %1098 : vector<2x8xf32>
    %1101 = arith.mulf %1090, %1090 : vector<2x8xf32>
    %1102 = arith.subf %1100, %1101 : vector<2x8xf32>
    %1103 = math.exp %1098 : vector<2x8xf32>
    %1104 = arith.subf %1102, %1103 : vector<2x8xf32>
    %1105 = vector.shape_cast %1104 : vector<2x8xf32> to vector<1x2x8xf32>
    %cst_238 = arith.constant dense<0.000000e+00> : vector<1xf32>
    %1106 = vector.multi_reduction <add>, %1105, %cst_238 [1, 2] : vector<1x2x8xf32> to vector<1xf32>
    %1107 = vector.shape_cast %1106 : vector<1xf32> to vector<1x1x1xf32>
    %1108 = vector.extract %1107[0, 0, 0] : f32 from vector<1x1x1xf32>
    %cst_239 = arith.constant -5.000000e-01 : f32
    %1109 = arith.mulf %cst_239, %1108 : f32
    %cst_240 = arith.constant 2.000000e+00 : f32
    %1110 = arith.divf %1109, %cst_240 : f32
    %cst_241 = arith.constant 5.000000e-01 : f32
    %1111 = vector.broadcast %cst_241 : f32 to vector<2x8xf32>
    %1112 = arith.mulf %1111, %1098 : vector<2x8xf32>
    %1113 = math.exp %1112 : vector<2x8xf32>
    %c0_242 = arith.constant 0 : index
    %c0_243 = arith.constant 0 : index
    %1114 = vector.load %arg20[%c0_242, %c0_243] : memref<2x8xf32, #tpu.memory_space<vmem>>, vector<2x8xf32>
    %1115 = arith.mulf %1113, %1114 : vector<2x8xf32>
    %cst_244 = arith.constant 1.000000e+00 : f32
    %1116 = vector.broadcast %cst_244 : f32 to vector<2x8xf32>
    %1117 = arith.mulf %1115, %1116 : vector<2x8xf32>
    %1118 = arith.addf %1090, %1117 : vector<2x8xf32>
    %c0_245 = arith.constant 0 : index
    %c0_246 = arith.constant 0 : index
    %1119 = vector.load %arg21[%c0_245, %c0_246] : memref<2x8xf32, #tpu.memory_space<vmem>>, vector<2x8xf32>
    tpu.vector_store %arg21[%c0_245, %c0_246], %1118 {strides = array<i32>} : memref<2x8xf32, #tpu.memory_space<vmem>>, vector<2x8xf32>,
    %c0_247 = arith.constant 0 : index
    %c0_248 = arith.constant 0 : index
    %1120 = memref.load %arg22[%c0_247, %c0_248] : memref<1x1xf32, #tpu.memory_space<smem>>
    memref.store %1110, %arg22[%c0_247, %c0_248] : memref<1x1xf32, #tpu.memory_space<smem>>
    return
  }
  func.func @transform_0(%arg0: i32) -> (i32, i32) {
    %c0_i32 = arith.constant 0 : i32
    %c0_i32_0 = arith.constant 0 : i32
    %c0_i32_1 = arith.constant 0 : i32
    return %c0_i32, %c0_i32_0 : i32, i32
  }
  func.func @transform_1(%arg0: i32) -> (i32, i32, i32) {
    %c0_i32 = arith.constant 0 : i32
    %c0_i32_0 = arith.constant 0 : i32
    %c0_i32_1 = arith.constant 0 : i32
    %c0_i32_2 = arith.constant 0 : i32
    return %c0_i32, %c0_i32_0, %c0_i32_1 : i32, i32, i32
  }
  func.func @transform_2(%arg0: i32) -> (i32, i32) {
    %c0_i32 = arith.constant 0 : i32
    %c0_i32_0 = arith.constant 0 : i32
    %c0_i32_1 = arith.constant 0 : i32
    return %c0_i32, %c0_i32_0 : i32, i32
  }
  func.func @transform_3(%arg0: i32) -> (i32, i32, i32) {
    %c0_i32 = arith.constant 0 : i32
    %c0_i32_0 = arith.constant 0 : i32
    %c0_i32_1 = arith.constant 0 : i32
    %c0_i32_2 = arith.constant 0 : i32
    return %c0_i32, %c0_i32_0, %c0_i32_1 : i32, i32, i32
  }
  func.func @transform_4(%arg0: i32) -> (i32, i32) {
    %c0_i32 = arith.constant 0 : i32
    %c0_i32_0 = arith.constant 0 : i32
    %c0_i32_1 = arith.constant 0 : i32
    return %c0_i32, %c0_i32_0 : i32, i32
  }
  func.func @transform_5(%arg0: i32) -> (i32, i32, i32) {
    %c0_i32 = arith.constant 0 : i32
    %c0_i32_0 = arith.constant 0 : i32
    %c0_i32_1 = arith.constant 0 : i32
    %c0_i32_2 = arith.constant 0 : i32
    return %c0_i32, %c0_i32_0, %c0_i32_1 : i32, i32, i32
  }
  func.func @transform_6(%arg0: i32) -> (i32, i32) {
    %c0_i32 = arith.constant 0 : i32
    %c0_i32_0 = arith.constant 0 : i32
    %c0_i32_1 = arith.constant 0 : i32
    return %c0_i32, %c0_i32_0 : i32, i32
  }
  func.func @transform_7(%arg0: i32) -> (i32, i32) {
    %c0_i32 = arith.constant 0 : i32
    %c0_i32_0 = arith.constant 0 : i32
    %c0_i32_1 = arith.constant 0 : i32
    return %c0_i32, %c0_i32_0 : i32, i32
  }
  func.func @transform_8(%arg0: i32) -> (i32, i32) {
    %c0_i32 = arith.constant 0 : i32
    %c0_i32_0 = arith.constant 0 : i32
    %c0_i32_1 = arith.constant 0 : i32
    return %c0_i32, %c0_i32_0 : i32, i32
  }
  func.func @transform_9(%arg0: i32) -> (i32, i32) {
    %c0_i32 = arith.constant 0 : i32
    %c0_i32_0 = arith.constant 0 : i32
    %c0_i32_1 = arith.constant 0 : i32
    return %c0_i32, %c0_i32_0 : i32, i32
  }
  func.func @transform_10(%arg0: i32) -> (i32, i32) {
    %c0_i32 = arith.constant 0 : i32
    %c0_i32_0 = arith.constant 0 : i32
    %c0_i32_1 = arith.constant 0 : i32
    return %c0_i32, %c0_i32_0 : i32, i32
  }
  func.func @transform_11(%arg0: i32) -> (i32, i32) {
    %c0_i32 = arith.constant 0 : i32
    %c0_i32_0 = arith.constant 0 : i32
    %c0_i32_1 = arith.constant 0 : i32
    return %c0_i32, %c0_i32_0 : i32, i32
  }
  func.func @transform_12(%arg0: i32) -> (i32, i32) {
    %c0_i32 = arith.constant 0 : i32
    %c0_i32_0 = arith.constant 0 : i32
    %c0_i32_1 = arith.constant 0 : i32
    return %c0_i32, %c0_i32_0 : i32, i32
  }
  func.func @transform_13(%arg0: i32) -> (i32, i32) {
    %c0_i32 = arith.constant 0 : i32
    %c0_i32_0 = arith.constant 0 : i32
    %c0_i32_1 = arith.constant 0 : i32
    return %c0_i32, %c0_i32_0 : i32, i32
  }
  func.func @transform_14(%arg0: i32) -> (i32, i32) {
    %c0_i32 = arith.constant 0 : i32
    %c0_i32_0 = arith.constant 0 : i32
    %c0_i32_1 = arith.constant 0 : i32
    return %c0_i32, %c0_i32_0 : i32, i32
  }
  func.func @transform_15(%arg0: i32) -> (i32, i32) {
    %c0_i32 = arith.constant 0 : i32
    %c0_i32_0 = arith.constant 0 : i32
    %c0_i32_1 = arith.constant 0 : i32
    return %c0_i32, %c0_i32_0 : i32, i32
  }
  func.func @transform_16(%arg0: i32) -> (i32, i32) {
    %c0_i32 = arith.constant 0 : i32
    %c0_i32_0 = arith.constant 0 : i32
    %c0_i32_1 = arith.constant 0 : i32
    return %c0_i32, %c0_i32_0 : i32, i32
  }
  func.func @transform_17(%arg0: i32) -> (i32, i32) {
    %c0_i32 = arith.constant 0 : i32
    %c0_i32_0 = arith.constant 0 : i32
    %c0_i32_1 = arith.constant 0 : i32
    return %c0_i32, %c0_i32_0 : i32, i32
  }
  func.func @transform_18(%arg0: i32) -> (i32, i32) {
    %c0_i32 = arith.constant 0 : i32
    %c0_i32_0 = arith.constant 0 : i32
    %c0_i32_1 = arith.constant 0 : i32
    return %c0_i32, %c0_i32_0 : i32, i32
  }
  func.func @transform_19(%arg0: i32) -> (i32, i32) {
    %c0_i32 = arith.constant 0 : i32
    %c0_i32_0 = arith.constant 0 : i32
    %c0_i32_1 = arith.constant 0 : i32
    return %c0_i32, %c0_i32_0 : i32, i32
  }
  func.func @transform_20(%arg0: i32) -> (i32, i32) {
    %c0_i32 = arith.constant 0 : i32
    %c0_i32_0 = arith.constant 0 : i32
    %c0_i32_1 = arith.constant 0 : i32
    return %c0_i32, %c0_i32_0 : i32, i32
  }
  func.func @transform_21(%arg0: i32) -> (i32, i32) {
    %c0_i32 = arith.constant 0 : i32
    %c0_i32_0 = arith.constant 0 : i32
    %c0_i32_1 = arith.constant 0 : i32
    return %c0_i32, %c0_i32_0 : i32, i32
  }
}

</mosaic_0001>

<bundles_post_ra>
// kernel: tpu_custom_call.1
= control target key start
LH: loop header
LB: loop body
LE: loop exit
PB: predicated region body
PF: predicated region fallthrough
CT: control target
= control target key end

     0   :  { %s8975_s0 = inlined_call_operand.vmem [shape: f32[32,11], index: 0, kind: input, shape index: {}]   ;;  %s8976_s1 = inlined_call_operand.vmem [shape: f32[3,11,16], index: 1, kind: input, shape index: {}]   ;;  %s8977_s2 = inlined_call_operand.vmem [shape: f32[1,16], index: 2, kind: input, shape index: {}]   ;;  %s8978_s3 = inlined_call_operand.vmem [shape: f32[3,16,16], index: 3, kind: input, shape index: {}]   ;;  %s8979_s4 = inlined_call_operand.hbm [shape: f32[1,16], index: 4, kind: input, shape index: {}]   ;;  %s8980_s5 = inlined_call_operand.vmem [shape: f32[3,16,16], index: 5, kind: input, shape index: {}]   ;;  %s8981_s6 = inlined_call_operand.hbm [shape: f32[1,16], index: 6, kind: input, shape index: {}]   ;;  %s8982_s7 = inlined_call_operand.hbm [shape: f32[16,96], index: 7, kind: input, shape index: {}]   ;;  %s8983_s8 = inlined_call_operand.vmem [shape: f32[32,96], index: 8, kind: input, shape index: {}]   ;;  %s8984_s9 = inlined_call_operand.hbm [shape: f32[1,96], index: 9, kind: input, shape index: {}]   ;;  %s8985_s10 = inlined_call_operand.hbm [shape: f32[1,96], index: 10, kind: input, shape index: {}]   ;;  %s8986_s11 = inlined_call_operand.vmem [shape: f32[32,96], index: 11, kind: input, shape index: {}]   ;;  %s8987_s12 = inlined_call_operand.vmem [shape: f32[32,96], index: 12, kind: input, shape index: {}]   ;;  %s8988_s13 = inlined_call_operand.hbm [shape: f32[1,96], index: 13, kind: input, shape index: {}]   ;;  %s8989_s14 = inlined_call_operand.hbm [shape: f32[1,96], index: 14, kind: input, shape index: {}]   ;;  %s8990_s15 = inlined_call_operand.vmem [shape: f32[32,8], index: 15, kind: input, shape index: {}]   ;;  %s8991_s16 = inlined_call_operand.vmem [shape: f32[1,8], index: 16, kind: input, shape index: {}]   ;;  %s8992_s17 = inlined_call_operand.vmem [shape: f32[32,8], index: 17, kind: input, shape index: {}]   ;;  %s8993_s18 = inlined_call_operand.vmem [shape: f32[1,8], index: 18, kind: input, shape index: {}]   ;;  %s8994_s19 = inlined_call_operand.vmem [shape: f32[2,8], index: 19, kind: input, shape index: {}]   ;;  %s8995_s20 = inlined_call_operand.hbm [shape: f32[2,8], index: 20, kind: output, shape index: {0}]   ;;  %s8996_s21 = inlined_call_operand.hbm [shape: f32[1,1], index: 21, kind: output, shape index: {1}]  }
   0x1   :  { %9001 = sst [smem:[#allocation24_spill]] %s8975_s0 }
   0x2   :  { %9002 = sst [smem:[#allocation25_spill]] %s8976_s1 }
   0x3   :  { %9003 = sst [smem:[#allocation26_spill]] %s8977_s2 }
   0x4   :  { %9004 = sst [smem:[#allocation27_spill]] %s8978_s3 }
   0x5   :  { %9005 = sst [smem:[#allocation28_spill]] %s8979_s4 }
   0x6   :  { %9006 = sst [smem:[#allocation29_spill]] %s8980_s5 }
   0x7   :  { %27 = vsyncpa [#allocation4], 0 }
   0x8   :  { %28 = vsyncpa [#allocation8], 0 }
   0x9   :  { %29 = vsyncpa [#allocation11], 0 }
   0xa   :  { %30 = vsyncpa [#allocation14], 0 }
   0xb   :  { %31 = vsyncpa [#allocation5], 0 }
   0xc   :  { %32 = vsyncpa [#allocation6], 0  ;;  %s7533_s2 = smov [#allocation7]   ;;  %s7534_s26 = smov [#allocation10]  }
   0xd   :  { %s59_s25 = sshll.u32 %s7533_s2, 4  ;;  %s83_s27 = sshll.u32 %s7534_s26, 4  ;;  %s60_s25 = int_to_ptr.vmem [resolvable:$true] %s59_s25  ;;  %s84_s27 = int_to_ptr.vmem [resolvable:$true] %s83_s27 }
   0xe   :  { %s7361_s3 = scalar_lea.vmem %s60_s25, 16  ;;  %s7365_s28 = scalar_lea.vmem %s60_s25, 32 }
   0xf   :  { %p7362_p0 = scmp.ne.s32.totalorder %s60_s25, %s7361_s3  ;;  %p7366_p1 = scmp.lt.s32.totalorder %s60_s25, %s60_s25 }
  0x10   :  { %p7367_p2 = scmp.lt.s32.totalorder %s7365_s28, %s7361_s3 }
  0x12   :  { %p7368_p3 = por %p7367_p2, %p7366_p1 }
  0x14   :  { %p7369_p4 = pnand %p7368_p3, %p7362_p0 }
  0x16   :  { %7372 = shalt.err (!%p7369_p4)
}
  0x17   :  { %62 = dma.hbm_to_vmem [thread:$0]  %s8981_s6, 16, %s60_s25, [#allocation8]  }
  0x18   :  { %s7381_s4 = scalar_lea.vmem %s84_s27, 16  ;;  %s7385_s30 = scalar_lea.vmem %s84_s27, 32 }
  0x19   :  { %p7382_p5 = scmp.ne.s32.totalorder %s84_s27, %s7381_s4  ;;  %p7386_p6 = scmp.lt.s32.totalorder %s84_s27, %s84_s27 }
  0x1a   :  { %p7387_p7 = scmp.lt.s32.totalorder %s7385_s30, %s7381_s4 }
  0x1c   :  { %p7388_p8 = por %p7387_p7, %p7386_p6 }
  0x1e   :  { %p7389_p9 = pnand %p7388_p8, %p7382_p5 }
  0x20   :  { %7392 = shalt.err (!%p7389_p9)
}
  0x21   :  { %86 = dma.hbm_to_vmem [thread:$0]  %s8984_s9, 16, %s84_s27, [#allocation11]  }
  0x22   :  { %s7535_s23 = smov [#allocation13]   ;;  %s7536_s24 = smov [#allocation3]  }
  0x23   :  { %s107_s1 = sshll.u32 %s7535_s23, 4  ;;  %s47_s2 = sshll.u32 %s7536_s24, 4  ;;  %s108_s1 = int_to_ptr.vmem [resolvable:$true] %s107_s1  ;;  %s48_s2 = int_to_ptr.vmem [resolvable:$true] %s47_s2 }
  0x24   :  { %s7401_s26 = scalar_lea.vmem %s108_s1, 16  ;;  %s7405_s6 = scalar_lea.vmem %s108_s1, 32 }
  0x25   :  { %p7402_p10 = scmp.ne.s32.totalorder %s108_s1, %s7401_s26  ;;  %p7406_p11 = scmp.lt.s32.totalorder %s108_s1, %s108_s1 }
  0x26   :  { %p7407_p12 = scmp.lt.s32.totalorder %s7405_s6, %s7401_s26 }
  0x28   :  { %p7408_p13 = por %p7407_p12, %p7406_p11 }
  0x2a   :  { %p7409_p0 = pnand %p7408_p13, %p7402_p10 }
  0x2c   :  { %7412 = shalt.err (!%p7409_p0)
}
  0x2d   :  { %110 = dma.hbm_to_vmem [thread:$0]  %s8988_s13, 16, %s108_s1, [#allocation14]  }
  0x2e   :  { %s7421_s28 = scalar_lea.vmem %s48_s2, 16  ;;  %s7425_s9 = scalar_lea.vmem %s48_s2, 32 }
  0x2f   :  { %p7422_p1 = scmp.ne.s32.totalorder %s48_s2, %s7421_s28  ;;  %p7426_p2 = scmp.lt.s32.totalorder %s48_s2, %s48_s2 }
  0x30   :  { %p7427_p3 = scmp.lt.s32.totalorder %s7425_s9, %s7421_s28 }
  0x32   :  { %p7428_p4 = por %p7427_p3, %p7426_p2 }
  0x34   :  { %p7429_p5 = pnand %p7428_p4, %p7422_p1 }
  0x36   :  { %7432 = shalt.err (!%p7429_p5)
}
  0x37   :  { %s9007_s0 = sld [smem:[#allocation28_spill]]  ;;  %s7537_s4 = smov [#allocation9]  }
  0x38   :  { %s68_s30 = sshll.u32 %s7537_s4, 4  ;;  %s69_s30 = int_to_ptr.vmem [resolvable:$true] %s68_s30 }
  0x39   :  { %s7441_s5 = scalar_lea.vmem %s69_s30, 256  ;;  %p7446_p7 = scmp.lt.s32.totalorder %s69_s30, %s69_s30 }
  0x3a   :  { %p7442_p6 = scmp.ne.s32.totalorder %s69_s30, %s7441_s5  ;;  %p7447_p8 = scmp.lt.s32.totalorder %s7441_s5, %s7441_s5 }
  0x3c   :  { %p7448_p9 = por %p7447_p8, %p7446_p7 }
  0x3d   :  { %50 = dma.hbm_to_vmem [thread:$0]  %s9007_s0, 16, %s48_s2, [#allocation4]  }
  0x3e   :  { %p7449_p10 = pnand %p7448_p9, %p7442_p6 }
  0x40   :  { %7452 = shalt.err (!%p7449_p10)
}
  0x41   :  { %s7538_s13 = smov 128   ;;  %s7539_s22 = smov 8  }
  0x42   :  { %74 = dma.hbm_to_vmem [thread:$0]  %s8982_s7, 256, %s69_s30, [#allocation8], %s7538_s13, %s7538_s13, %s7539_s22  }
  0x43   :  { %s7540_s24 = smov [#allocation12]   ;;  %s7541_s2 = smov [#allocation15]  }
  0x44   :  { %s93_s26 = sshll.u32 %s7540_s24, 4  ;;  %s117_s6 = sshll.u32 %s7541_s2, 4  ;;  %s94_s26 = int_to_ptr.vmem [resolvable:$true] %s93_s26  ;;  %s118_s6 = int_to_ptr.vmem [resolvable:$true] %s117_s6 }
  0x45   :  { %s7461_s25 = scalar_lea.vmem %s94_s26, 16  ;;  %s7465_s3 = scalar_lea.vmem %s94_s26, 32 }
  0x46   :  { %p7462_p11 = scmp.ne.s32.totalorder %s94_s26, %s7461_s25  ;;  %p7466_p12 = scmp.lt.s32.totalorder %s94_s26, %s94_s26 }
  0x47   :  { %p7467_p13 = scmp.lt.s32.totalorder %s7465_s3, %s7461_s25 }
  0x49   :  { %p7468_p0 = por %p7467_p13, %p7466_p12 }
  0x4b   :  { %p7469_p1 = pnand %p7468_p0, %p7462_p11 }
  0x4d   :  { %7472 = shalt.err (!%p7469_p1)
}
  0x4e   :  { %96 = dma.hbm_to_vmem [thread:$0]  %s8985_s10, 16, %s94_s26, [#allocation11]  }
  0x4f   :  { %s7481_s27 = scalar_lea.vmem %s118_s6, 16  ;;  %s7485_s7 = scalar_lea.vmem %s118_s6, 32 }
  0x50   :  { %p7482_p2 = scmp.ne.s32.totalorder %s118_s6, %s7481_s27  ;;  %p7486_p3 = scmp.lt.s32.totalorder %s118_s6, %s118_s6 }
  0x51   :  { %p7487_p4 = scmp.lt.s32.totalorder %s7485_s7, %s7481_s27 }
  0x53   :  { %p7488_p5 = por %p7487_p4, %p7486_p3 }
  0x55   :  { %p7489_p6 = pnand %p7488_p5, %p7482_p2 }
  0x57   :  { %7492 = shalt.err (!%p7489_p6)
}
  0x58   :  { %120 = dma.hbm_to_vmem [thread:$0]  %s8989_s14, 16, %s118_s6, [#allocation14]  }
  0x59   :  { %7521 = dma.done.wait [#allocation4], 16  }
  0x5a   :  { %7522 = vsyncadd [#allocation4], 4294967280 }
  0x5b   :  { %7523 = dma.done.wait [#allocation8], 272  }
  0x5c   :  { %7524 = vsyncadd [#allocation8], 4294967024 }
  0x5d   :  { %7525 = dma.done.wait [#allocation11], 32  }
  0x5e   :  { %7526 = vsyncadd [#allocation11], 4294967264 }
  0x5f   :  { %7527 = dma.done.wait [#allocation14], 32  }
  0x60   :  { %7528 = vsyncadd [#allocation14], 4294967264  ;;  %vm152_vm0 = vcmask 130048   ;;  %v7542_v0 = vmov 0.0   ;;  %vm193_vm1 = vcmask 1042432   ;;  %vm165_vm2 = vcmask 89088  }
  0x61   :  { %154 = vst.msk [vmem:[#allocation2 + $0x8] sm:$0xff] %vm152_vm0, %v7542_v0  ;;  %155 = vst.msk [vmem:[#allocation2 + $0x10] sm:$0xff] %vm152_vm0, %v7542_v0  ;;  %s9008_s4 = sld [smem:[#allocation25_spill]]  ;;  %vm283_vm3 = vcmask 1041408   ;;  %vm393_vm4 = vcmask 1045504   ;;  %vm7543_vm13 = vmmov 0  }
  0x62   :  { %156 = vst.msk [vmem:[#allocation2 + $0x18] sm:$0xff] %vm152_vm0, %v7542_v0  ;;  %157 = vst.msk [vmem:[#allocation2 + $0x20] sm:$0xff] %vm152_vm0, %v7542_v0  ;;  %s9009_s23 = sld [smem:[#allocation24_spill]]  ;;  %s7544_s27 = smov 64  }
  0x63   :  { %158 = vst.msk [vmem:[#allocation2 + $0x28] sm:$0xff] %vm152_vm0, %v7542_v0  ;;  %159 = vst.msk [vmem:[#allocation2 + $0x30] sm:$0xff] %vm152_vm0, %v7542_v0  ;;  %s9010_s30 = sld [smem:[#allocation27_spill]]  ;;  %s7545_s25 = smov 96  }
  0x64   :  { %s9011_s3 = sld [smem:[#allocation26_spill]] }
  0x65   :  { %s9012_s29 = sld [smem:[#allocation29_spill]] }
  0x67   :  { %v6006_v1 = vld [vmem:[%s9008_s4 + $0x18] sm:$0x7]  ;;  %v6005_v2 = vld [vmem:[%s9008_s4 + $0x10] sm:$0xff]  ;;  %v177_v4 = vld [vmem:[%s9008_s4 + $0x8] sm:$0x7] }
  0x68   :  { %v161_v3 = vld [vmem:[%s9009_s23] sm:$0xff]  ;;  %6459 = vmatprep.subr.msk.mxu0 %vm193_vm1, %v6006_v1  ;;  %v162_v5 = vld [vmem:[%s9009_s23 + $0x8] sm:$0xff]  ;;  %6469 = vmatprep.subr.msk.mxu1 %vm193_vm1, %v177_v4  ;;  %v163_v8 = vld [vmem:[%s9009_s23 + $0x10] sm:$0xff] }
  0x69   :  { %166 = vst.msk [vmem:[#allocation2 + $0x10] sm:$0xff] %vm165_vm2, %v161_v3  ;;  %6460 = vmatpush3.msk.msra.mxu0 %vm193_vm1, %v6006_v1  ;;  %v6018_v6 = vld [vmem:[%s9008_s4 + $0x28] sm:$0x7]  ;;  %167 = vst.msk [vmem:[#allocation2 + $0x18] sm:$0xff] %vm165_vm2, %v162_v5  ;;  %v176_v7 = vld [vmem:[%s9008_s4] sm:$0xff]  ;;  %6470 = vmatpush3.msk.msra.mxu1 %vm193_vm1, %v177_v4 }
  0x6a   :  { %6461 = vmatprep.subr.mxu0 %v6005_v2  ;;  %168 = vst.msk [vmem:[#allocation2 + $0x20] sm:$0xff] %vm165_vm2, %v163_v8  ;;  %v164_v9 = vld [vmem:[%s9009_s23 + $0x18] sm:$0xff]  ;;  %6471 = vmatprep.subr.mxu1 %v176_v7  ;;  %v170_v10 = vld [vmem:[#allocation2 + $0x8] sm:$0xff]  ;;  %v6017_v16 = vld [vmem:[%s9008_s4 + $0x20] sm:$0xff] }
  0x6b   :  { %6462 = vmatpush3.msra.mxu0 %v6005_v2  ;;  %169 = vst.msk [vmem:[#allocation2 + $0x28] sm:$0xff] %vm165_vm2, %v164_v9  ;;  %6472 = vmatpush3.msra.mxu1 %v176_v7  ;;  %v7727_v11 = vrot.slane %v170_v10, 6  ;;  %v175_v28 = vld [vmem:[#allocation2 + $0x30] sm:$0xff]  ;;  %v6026_v35 = vld [vmem:[%s9010_s30 + $0x18] sm:$0xff]  ;;  %v537_v37 = vld [vmem:[%s9010_s30 + $0x8] sm:$0xff] }
  0x6c   :  { %6479 = vmatprep.subr.msk.mxu0 %vm193_vm1, %v6018_v6  ;;  %v7748_v32 = vrot.slane %v175_v28, 2  ;;  %v6025_v36 = vld [vmem:[%s9010_s30 + $0x10] sm:$0xff]  ;;  %6489 = vmatprep.subr.mxu1 %v6026_v35  ;;  %v6036_v38 = vld [vmem:[%s9010_s30 + $0x28] sm:$0xff]  ;;  %v536_v39 = vld [vmem:[%s9010_s30] sm:$0xff] }
  0x6d   :  { %v6024_v49 = vld [vmem:[%s9011_s3] ss:$0 sm:$0xff] }
  0x70   :  { %v171_v12 = vld [vmem:[#allocation2 + $0x10] sm:$0xff]  ;;  %v172_v14 = vld [vmem:[#allocation2 + $0x18] sm:$0xff] }
  0x71   :  { %6463 = vmatprep.mubr.msk.f32.mxu0 %vm165_vm2, %v171_v12  ;;  %v394_v13 = vrot.slane %v171_v12, 2  ;;  %v285_v15 = vrot.slane %v171_v12, 6  ;;  %v287_v17 = vrot.slane %v172_v14, 6  ;;  %v395_v18 = vrot.slane %v172_v14, 2  ;;  %v173_v19 = vld [vmem:[#allocation2 + $0x20] sm:$0xff] }
  0x72   :  { %6464 = vmatmul.mubr.msk.f32.vlgmr.msra.gmra.mxu0 %vm165_vm2, %v172_v14  ;;  %v289_v21 = vrot.slane %v173_v19, 6  ;;  %v397_v22 = vrot.slane %v173_v19, 2  ;;  %v174_v23 = vld [vmem:[#allocation2 + $0x28] sm:$0xff] }
  0x73   :  { %6480 = vmatpush3.msk.msra.mxu0 %vm193_vm1, %v6018_v6  ;;  %v286_v20 = vsel %vm283_vm3, %v7727_v11, %v285_v15  ;;  %6466 = vmatprep.mubr.msk.f32.mxu0 %vm165_vm2, %v173_v19  ;;  %v288_v24 = vsel %vm283_vm3, %v285_v15, %v287_v17  ;;  %v291_v25 = vrot.slane %v174_v23, 6  ;;  %v399_v26 = vrot.slane %v174_v23, 2  ;;  %v6035_v15 = vld [vmem:[%s9010_s30 + $0x20] sm:$0xff] }
  0x74   :  { %6473 = vmatprep.mubr.msk.f32.mxu1 %vm165_vm2, %v286_v20  ;;  %6481 = vmatprep.subr.mxu0 %v6017_v16  ;;  %v396_v27 = vsel %vm393_vm4, %v394_v13, %v395_v18  ;;  %v290_v29 = vsel %vm283_vm3, %v287_v17, %v289_v21  ;;  %v398_v31 = vsel %vm393_vm4, %v395_v18, %v397_v22 }
  0x75   :  { %6474 = vmatmul.mubr.msk.f32.vlgmr.msra.gmra.mxu1 %vm165_vm2, %v288_v24  ;;  %6482 = vmatpush3.msra.mxu0 %v6017_v16  ;;  %v292_v30 = vsel %vm283_vm3, %v289_v21, %v291_v25  ;;  %v400_v33 = vsel %vm393_vm4, %v397_v22, %v399_v26  ;;  %v402_v34 = vsel %vm393_vm4, %v399_v26, %v7748_v32 }
  0x76   :  { %6467 = vmatmul.mubr.msk.f32.gmra.mxu0 %vm165_vm2, %v174_v23  ;;  %6476 = vmatprep.mubr.msk.f32.mxu1 %vm165_vm2, %v290_v29 }
  0x77   :  { %6483 = vmatprep.mubr.msk.f32.mxu0 %vm165_vm2, %v396_v27  ;;  %6499 = vmatprep.subr.mxu0 %v537_v37 }
  0x78   :  { %6490 = vmatpush3.msra.mxu1 %v6026_v35  ;;  %v885_v35 = vld [vmem:[%s9012_s29 + $0x8] sm:$0xff] }
  0x79   :  { %6477 = vmatmul.mubr.msk.f32.gmra.mxu1 %vm165_vm2, %v292_v30  ;;  %6491 = vmatprep.subr.mxu1 %v6025_v36 }
  0x7a   :  { %6484 = vmatmul.mubr.msk.f32.vlgmr.msra.gmra.mxu0 %vm165_vm2, %v398_v31  ;;  %6492 = vmatpush3.msra.mxu1 %v6025_v36  ;;  %v6053_v36 = vld [vmem:[%s9012_s29 + $0x28] sm:$0xff] }
  0x7b   :  { %6486 = vmatprep.mubr.msk.f32.mxu0 %vm165_vm2, %v400_v33  ;;  %6500 = vmatpush3.msra.mxu0 %v537_v37  ;;  %v6043_v33 = vld [vmem:[%s9012_s29 + $0x18] sm:$0xff]  ;;  %v884_v37 = vld [vmem:[%s9012_s29] sm:$0xff] }
  0x7c   :  { %6509 = vmatprep.subr.mxu1 %v6036_v38  ;;  %6501 = vmatprep.subr.mxu0 %v536_v39 }
  0x7d   :  { %6502 = vmatpush3.msra.mxu0 %v536_v39 }
  0x7e   :  { %6487 = vmatmul.mubr.msk.f32.gmra.mxu0 %vm165_vm2, %v402_v34  ;;  %v6042_v34 = vld [vmem:[%s9012_s29 + $0x10] sm:$0xff]  ;;  %6519 = vmatprep.subr.mxu0 %v6043_v33 }
 0x132   :  { %v6465_v40 = vpop.f32.mrf.mxu0 }
 0x134   :  { %v263_v41 = vpop.f32.mrf.mxu0 }
 0x135   :  { %v6475_v42 = vpop.f32.mrf.mxu1 }
 0x136   :  { %v6468_v43 = vpop.f32.mrf.mxu0  ;;  %v376_v46 = vadd.f32 %v6475_v42, %v6465_v40 }
 0x137   :  { %v370_v44 = vpop.f32.mrf.mxu1 }
 0x138   :  { %v273_v45 = vpop.f32.mrf.mxu0  ;;  %v371_v50 = vadd.f32 %v370_v44, %v263_v41 }
 0x139   :  { %v6478_v47 = vpop.f32.mrf.mxu1 }
 0x13a   :  { %v6485_v48 = vpop.f32.mrf.mxu0  ;;  %v386_v53 = vadd.f32 %v6478_v47, %v6468_v43  ;;  %v6041_v47 = vld [vmem:[#allocation3] ss:$0 sm:$0xff] }
 0x13b   :  { %v500_v51 = vadd.f32 %v6485_v48, %v376_v46  ;;  %v380_v55 = vpop.f32.mrf.mxu1 }
 0x13c   :  { %v480_v52 = vpop.f32.mrf.mxu0  ;;  %v381_v61 = vadd.f32 %v380_v55, %v273_v45 }
 0x13d   :  { %v511_v54 = vadd.f32 %v6024_v49, %v500_v51  ;;  %v499_v56 = vadd.f32 %v480_v52, %v371_v50 }
 0x13e   :  { %v6488_v57 = vpop.f32.mrf.mxu0 }
 0x13f   :  { %vm515_vm5 = vcmp.ge.f32.partialorder %v511_v54, 0.0  ;;  %v519_v58 = vmul.f32 0.01, %v511_v54  ;;  %v510_v59 = vadd.f32 %v6024_v49, %v499_v56  ;;  %v502_v60 = vadd.f32 %v6488_v57, %v386_v53 }
 0x140   :  { %v490_v62 = vpop.f32.mrf.mxu0 }
 0x141   :  { %v523_v63 = vsel %vm515_vm5, %v511_v54, %v519_v58  ;;  %vm514_vm6 = vcmp.ge.f32.partialorder %v510_v59, 0.0  ;;  %v518_v1 = vmul.f32 0.01, %v510_v59  ;;  %v513_v2 = vadd.f32 %v6024_v49, %v502_v60 }
 0x142   :  { %527 = vst.msk [vmem:[#allocation2 + $0x18] sm:$0xff] %vm152_vm0, %v523_v63  ;;  %v501_v3 = vadd.f32 %v490_v62, %v381_v61 }
 0x143   :  { %v522_v4 = vsel %vm514_vm6, %v510_v59, %v518_v1  ;;  %vm517_vm7 = vcmp.ge.f32.partialorder %v513_v2, 0.0  ;;  %v521_v5 = vmul.f32 0.01, %v513_v2 }
 0x144   :  { %526 = vst.msk [vmem:[#allocation2 + $0x10] sm:$0xff] %vm152_vm0, %v522_v4  ;;  %v512_v6 = vadd.f32 %v6024_v49, %v501_v3 }
 0x145   :  { %v525_v7 = vsel %vm517_vm7, %v513_v2, %v521_v5 }
 0x146   :  { %529 = vst.msk [vmem:[#allocation2 + $0x28] sm:$0xff] %vm152_vm0, %v525_v7  ;;  %vm516_vm8 = vcmp.ge.f32.partialorder %v512_v6, 0.0  ;;  %v520_v8 = vmul.f32 0.01, %v512_v6 }
 0x148   :  { %v524_v9 = vsel %vm516_vm8, %v512_v6, %v520_v8 }
 0x149   :  { %528 = vst.msk [vmem:[#allocation2 + $0x20] sm:$0xff] %vm152_vm0, %v524_v9  ;;  %v532_v10 = vld [vmem:[#allocation2 + $0x18] sm:$0xff] }
 0x14a   :  { %v642_v14 = vrot.slane %v532_v10, 6  ;;  %v746_v21 = vrot.slane %v532_v10, 2 }
 0x14b   :  { %v531_v12 = vld [vmem:[#allocation2 + $0x10] sm:$0xff] }
 0x14c   :  { %6493 = vmatprep.mubr.msk.f32.mxu1 %vm152_vm0, %v531_v12  ;;  %v640_v13 = vrot.slane %v531_v12, 6  ;;  %v745_v16 = vrot.slane %v531_v12, 2 }
 0x14d   :  { %6494 = vmatmul.mubr.msk.f32.vlgmr.msra.gmra.mxu1 %vm152_vm0, %v532_v10  ;;  %v534_v19 = vld [vmem:[#allocation2 + $0x28] sm:$0xff] }
 0x14e   :  { %6510 = vmatpush3.msra.mxu1 %v6036_v38  ;;  %v641_v17 = vsel %vm283_vm3, %v7727_v11, %v640_v13  ;;  %v643_v18 = vsel %vm283_vm3, %v640_v13, %v642_v14  ;;  %v646_v24 = vrot.slane %v534_v19, 6  ;;  %v747_v25 = vsel %vm393_vm4, %v745_v16, %v746_v21  ;;  %v6052_v13 = vld [vmem:[%s9012_s29 + $0x20] sm:$0xff]  ;;  %s7546_s29 = smov [#allocation16]  }
 0x14f   :  { %6503 = vmatprep.mubr.msk.f32.mxu0 %vm152_vm0, %v641_v17  ;;  %6511 = vmatprep.subr.mxu1 %v6035_v15  ;;  %v750_v28 = vrot.slane %v534_v19, 2 }
 0x150   :  { %v533_v20 = vld [vmem:[#allocation2 + $0x20] sm:$0xff]  ;;  %6504 = vmatmul.mubr.msk.f32.vlgmr.msra.gmra.mxu0 %vm152_vm0, %v643_v18  ;;  %6512 = vmatpush3.msra.mxu1 %v6035_v15 }
 0x151   :  { %6496 = vmatprep.mubr.msk.f32.mxu1 %vm152_vm0, %v533_v20  ;;  %v644_v22 = vrot.slane %v533_v20, 6  ;;  %v748_v23 = vrot.slane %v533_v20, 2  ;;  %v753_v31 = vsel %vm393_vm4, %v750_v28, %v7748_v32  ;;  %6529 = vmatprep.subr.mxu1 %v885_v35 }
 0x152   :  { %6497 = vmatmul.mubr.msk.f32.gmra.mxu1 %vm152_vm0, %v534_v19  ;;  %6520 = vmatpush3.msra.mxu0 %v6043_v33  ;;  %v7871_v33 = vld [vmem:[%s8983_s8] sm:$0xff] }
 0x153   :  { %6513 = vmatprep.mubr.msk.f32.mxu1 %vm152_vm0, %v747_v25  ;;  %v645_v26 = vsel %vm283_vm3, %v642_v14, %v644_v22  ;;  %v647_v27 = vsel %vm283_vm3, %v644_v22, %v646_v24  ;;  %v749_v29 = vsel %vm393_vm4, %v746_v21, %v748_v23  ;;  %v751_v30 = vsel %vm393_vm4, %v748_v23, %v750_v28 }
 0x154   :  { %6506 = vmatprep.mubr.msk.f32.mxu0 %vm152_vm0, %v645_v26  ;;  %6521 = vmatprep.subr.mxu0 %v6042_v34  ;;  %v7844_v26 = vld [vmem:[%s8983_s8 + $0x18] sm:$0xff] }
 0x155   :  { %6507 = vmatmul.mubr.msk.f32.gmra.mxu0 %vm152_vm0, %v647_v27 }
 0x156   :  { %6514 = vmatmul.mubr.msk.f32.vlgmr.msra.gmra.mxu1 %vm152_vm0, %v749_v29  ;;  %6522 = vmatpush3.msra.mxu0 %v6042_v34  ;;  %v7853_v29 = vld [vmem:[%s8983_s8 + $0x10] sm:$0xff]  ;;  %v1222_v34 = vld [vmem:[#allocation9] sm:$0xff] }
 0x157   :  { %6516 = vmatprep.mubr.msk.f32.mxu1 %vm152_vm0, %v751_v30  ;;  %6530 = vmatpush3.msra.mxu1 %v885_v35  ;;  %v7861_v30 = vld [vmem:[%s8983_s8 + $0x8] sm:$0xff] }
 0x158   :  { %6539 = vmatprep.subr.mxu0 %v6053_v36  ;;  %6531 = vmatprep.subr.mxu1 %v884_v37 }
 0x159   :  { %6532 = vmatpush3.msra.mxu1 %v884_v37 }
 0x15a   :  { %6517 = vmatmul.mubr.msk.f32.gmra.mxu1 %vm152_vm0, %v753_v31 }
 0x20d   :  { %v6495_v38 = vpop.f32.mrf.mxu1 }
 0x20f   :  { %v619_v39 = vpop.f32.mrf.mxu1 }
 0x210   :  { %v6505_v40 = vpop.f32.mrf.mxu0 }
 0x211   :  { %v728_v44 = vadd.f32 %v6505_v40, %v6495_v38 }
 0x212   :  { %v6498_v41 = vpop.f32.mrf.mxu1  ;;  %v722_v42 = vpop.f32.mrf.mxu0 }
 0x213   :  { %v723_v48 = vadd.f32 %v722_v42, %v619_v39 }
 0x214   :  { %v629_v43 = vpop.f32.mrf.mxu1 }
 0x215   :  { %v6508_v45 = vpop.f32.mrf.mxu0 }
 0x216   :  { %v6515_v46 = vpop.f32.mrf.mxu1  ;;  %v738_v51 = vadd.f32 %v6508_v45, %v6498_v41 }
 0x217   :  { %v848_v49 = vadd.f32 %v6515_v46, %v728_v44  ;;  %v732_v53 = vpop.f32.mrf.mxu0  ;;  %v6058_v44 = vld [vmem:[#allocation7] ss:$0 sm:$0xff] }
 0x218   :  { %v828_v50 = vpop.f32.mrf.mxu1  ;;  %v733_v59 = vadd.f32 %v732_v53, %v629_v43 }
 0x219   :  { %v859_v52 = vadd.f32 %v6041_v47, %v848_v49  ;;  %v847_v54 = vadd.f32 %v828_v50, %v723_v48 }
 0x21a   :  { %v6518_v55 = vpop.f32.mrf.mxu1 }
 0x21b   :  { %vm863_vm9 = vcmp.ge.f32.partialorder %v859_v52, 0.0  ;;  %v867_v56 = vmul.f32 0.01, %v859_v52  ;;  %v858_v57 = vadd.f32 %v6041_v47, %v847_v54  ;;  %v850_v58 = vadd.f32 %v6518_v55, %v738_v51 }
 0x21c   :  { %v838_v60 = vpop.f32.mrf.mxu1 }
 0x21d   :  { %v871_v61 = vsel %vm863_vm9, %v859_v52, %v867_v56  ;;  %vm862_vm10 = vcmp.ge.f32.partialorder %v858_v57, 0.0  ;;  %v866_v62 = vmul.f32 0.01, %v858_v57  ;;  %v861_v63 = vadd.f32 %v6041_v47, %v850_v58 }
 0x21e   :  { %875 = vst.msk [vmem:[#allocation2 + $0x18] sm:$0xff] %vm152_vm0, %v871_v61  ;;  %v849_v1 = vadd.f32 %v838_v60, %v733_v59  ;;  %v7883_v61 = vld [vmem:[#allocation12] ss:$0 sm:$0xff] }
 0x21f   :  { %v870_v2 = vsel %vm862_vm10, %v858_v57, %v866_v62  ;;  %vm865_vm11 = vcmp.ge.f32.partialorder %v861_v63, 0.0  ;;  %v869_v3 = vmul.f32 0.01, %v861_v63 }
 0x220   :  { %874 = vst.msk [vmem:[#allocation2 + $0x10] sm:$0xff] %vm152_vm0, %v870_v2  ;;  %v860_v4 = vadd.f32 %v6041_v47, %v849_v1 }
 0x221   :  { %v873_v5 = vsel %vm865_vm11, %v861_v63, %v869_v3 }
 0x222   :  { %877 = vst.msk [vmem:[#allocation2 + $0x28] sm:$0xff] %vm152_vm0, %v873_v5  ;;  %vm864_vm12 = vcmp.ge.f32.partialorder %v860_v4, 0.0  ;;  %v868_v6 = vmul.f32 0.01, %v860_v4 }
 0x224   :  { %v872_v7 = vsel %vm864_vm12, %v860_v4, %v868_v6 }
 0x225   :  { %876 = vst.msk [vmem:[#allocation2 + $0x20] sm:$0xff] %vm152_vm0, %v872_v7  ;;  %v880_v8 = vld [vmem:[#allocation2 + $0x18] sm:$0xff] }
 0x226   :  { %v990_v12 = vrot.slane %v880_v8, 6  ;;  %v1094_v19 = vrot.slane %v880_v8, 2 }
 0x227   :  { %v879_v9 = vld [vmem:[#allocation2 + $0x10] sm:$0xff] }
 0x228   :  { %6523 = vmatprep.mubr.msk.f32.mxu0 %vm152_vm0, %v879_v9  ;;  %v988_v10 = vrot.slane %v879_v9, 6  ;;  %v1093_v14 = vrot.slane %v879_v9, 2  ;;  %v6059_v9 = vld [vmem:[#allocation10] ss:$0 sm:$0xff] }
 0x229   :  { %6524 = vmatmul.mubr.msk.f32.vlgmr.msra.gmra.mxu0 %vm152_vm0, %v880_v8  ;;  %v882_v17 = vld [vmem:[#allocation2 + $0x28] sm:$0xff] }
 0x22a   :  { %6540 = vmatpush3.msra.mxu0 %v6053_v36  ;;  %v989_v15 = vsel %vm283_vm3, %v7727_v11, %v988_v10  ;;  %v991_v16 = vsel %vm283_vm3, %v988_v10, %v990_v12  ;;  %v994_v22 = vrot.slane %v882_v17, 6  ;;  %v1095_v11 = vsel %vm393_vm4, %v1093_v14, %v1094_v19 }
 0x22b   :  { %6533 = vmatprep.mubr.msk.f32.mxu1 %vm152_vm0, %v989_v15  ;;  %6541 = vmatprep.subr.mxu0 %v6052_v13  ;;  %v1098_v25 = vrot.slane %v882_v17, 2 }
 0x22c   :  { %v881_v18 = vld [vmem:[#allocation2 + $0x20] sm:$0xff]  ;;  %6534 = vmatmul.mubr.msk.f32.vlgmr.msra.gmra.mxu1 %vm152_vm0, %v991_v16  ;;  %6542 = vmatpush3.msra.mxu0 %v6052_v13 }
 0x22d   :  { %6526 = vmatprep.mubr.msk.f32.mxu0 %vm152_vm0, %v881_v18  ;;  %v992_v20 = vrot.slane %v881_v18, 6  ;;  %v1096_v21 = vrot.slane %v881_v18, 2  ;;  %6559 = vmatprep.subr.mxu0 %v7542_v0  ;;  %v1101_v31 = vsel %vm393_vm4, %v1098_v25, %v7748_v32  ;;  %v1223_v32 = vld [vmem:[#allocation9 + $0x8] sm:$0xff] }
 0x22e   :  { %6527 = vmatmul.mubr.msk.f32.gmra.mxu0 %vm152_vm0, %v882_v17  ;;  %6549 = vmatprep.subr.mxu1 %v1223_v32 }
 0x22f   :  { %6543 = vmatprep.mubr.msk.f32.mxu0 %vm152_vm0, %v1095_v11  ;;  %v993_v23 = vsel %vm283_vm3, %v990_v12, %v992_v20  ;;  %v995_v24 = vsel %vm283_vm3, %v992_v20, %v994_v22  ;;  %v1097_v27 = vsel %vm393_vm4, %v1094_v19, %v1096_v21  ;;  %v1099_v28 = vsel %vm393_vm4, %v1096_v21, %v1098_v25  ;;  %v7905_v25 = vld [vmem:[%s8986_s11 + $0x18] sm:$0xff] }
 0x230   :  { %6536 = vmatprep.mubr.msk.f32.mxu1 %vm152_vm0, %v993_v23  ;;  %6550 = vmatpush3.msra.mxu1 %v1223_v32  ;;  %v7929_v32 = vld [vmem:[%s8986_s11 + $0x8] sm:$0xff]  ;;  %vm5950_vm3 = vcmask 58368  }
 0x231   :  { %6537 = vmatmul.mubr.msk.f32.gmra.mxu1 %vm152_vm0, %v995_v24  ;;  %6551 = vmatprep.subr.mxu1 %v1222_v34 }
 0x232   :  { %6544 = vmatmul.mubr.msk.f32.vlgmr.msra.gmra.mxu0 %vm152_vm0, %v1097_v27  ;;  %6552 = vmatpush3.msra.mxu1 %v1222_v34  ;;  %v7910_v27 = vld [vmem:[%s8987_s12 + $0x18] sm:$0xff]  ;;  %v7934_v34 = vld [vmem:[%s8987_s12 + $0x8] sm:$0xff] }
 0x233   :  { %6546 = vmatprep.mubr.msk.f32.mxu0 %vm152_vm0, %v1099_v28  ;;  %6560 = vmatpush3.msra.mxu0 %v7844_v26  ;;  %v7915_v28 = vld [vmem:[%s8986_s11 + $0x10] sm:$0xff] }
 0x234   :  { %6561 = vmatprep.subr.mxu0 %v7542_v0  ;;  %6570 = vmatprep.subr.mxu1 %v7542_v0 }
 0x235   :  { %6562 = vmatpush3.msra.mxu0 %v7853_v29 }
 0x236   :  { %6547 = vmatmul.mubr.msk.f32.gmra.mxu0 %vm152_vm0, %v1101_v31  ;;  %6563 = vmatprep.subr.mxu0 %v7542_v0  ;;  %v7922_v31 = vld [vmem:[%s8987_s12 + $0x10] sm:$0xff] }
 0x237   :  { %6564 = vmatpush3.msra.mxu0 %v7861_v30  ;;  %6567 = vmatprep.mubr.msk.f32.mxu0 %vm7543_vm13, %v7542_v0 }
 0x238   :  { %6565 = vmatprep.subr.mxu0 %v7542_v0 }
 0x239   :  { %6566 = vmatpush3.msra.mxu0 %v7871_v33 }
 0x23a   :  { %6568 = vmatmul.mubr.f32.vlgmr.msra.gmra.mxu0 %v7542_v0  ;;  %6581 = vmatprep.subr.mxu0 %v7542_v0 }
 0x23b   :  { %6589 = vmatprep.mubr.msk.f32.mxu0 %vm7543_vm13, %v7542_v0  ;;  %6582 = vmatpush3.msra.mxu0 %v7910_v27 }
 0x23c   :  { %6583 = vmatprep.subr.mxu0 %v7542_v0 }
 0x23d   :  { %6584 = vmatpush3.msra.mxu0 %v7922_v31 }
 0x23e   :  { %6585 = vmatprep.subr.mxu0 %v7542_v0 }
 0x23f   :  { %6586 = vmatpush3.msra.mxu0 %v7934_v34 }
 0x240   :  { %6587 = vmatprep.subr.mxu0 %v7542_v0 }
 0x2e9   :  { %v6525_v35 = vpop.f32.mrf.mxu0 }
 0x2eb   :  { %v967_v36 = vpop.f32.mrf.mxu0 }
 0x2ec   :  { %v6535_v37 = vpop.f32.mrf.mxu1 }
 0x2ed   :  { %v1076_v41 = vadd.f32 %v6535_v37, %v6525_v35  ;;  %v7943_v35 = vld [vmem:[%s8986_s11] sm:$0xff] }
 0x2ee   :  { %v6528_v38 = vpop.f32.mrf.mxu0  ;;  %v1070_v39 = vpop.f32.mrf.mxu1 }
 0x2ef   :  { %v1071_v45 = vadd.f32 %v1070_v39, %v967_v36  ;;  %v7948_v36 = vld [vmem:[%s8987_s12] sm:$0xff] }
 0x2f0   :  { %v977_v40 = vpop.f32.mrf.mxu0  ;;  %6588 = vmatpush3.msra.mxu0 %v7948_v36 }
 0x2f1   :  { %v6538_v42 = vpop.f32.mrf.mxu1  ;;  %6590 = vmatmul.mubr.f32.vlgmr.msra.gmra.mxu0 %v7542_v0  ;;  %6603 = vmatprep.subr.mxu0 %v7542_v0 }
 0x2f2   :  { %v6545_v43 = vpop.f32.mrf.mxu0  ;;  %v1086_v49 = vadd.f32 %v6538_v42, %v6528_v38  ;;  %6604 = vmatpush3.msra.mxu0 %v7905_v25  ;;  %6611 = vmatprep.mubr.msk.f32.mxu0 %vm7543_vm13, %v7542_v0 }
 0x2f3   :  { %v1196_v46 = vadd.f32 %v6545_v43, %v1076_v41  ;;  %v1080_v47 = vpop.f32.mrf.mxu1  ;;  %6605 = vmatprep.subr.mxu0 %v7542_v0 }
 0x2f4   :  { %v1176_v48 = vpop.f32.mrf.mxu0  ;;  %v1081_v53 = vadd.f32 %v1080_v47, %v977_v40  ;;  %6606 = vmatpush3.msra.mxu0 %v7915_v28 }
 0x2f5   :  { %v1207_v50 = vadd.f32 %v6058_v44, %v1196_v46  ;;  %v1195_v51 = vadd.f32 %v1176_v48, %v1071_v45  ;;  %6607 = vmatprep.subr.mxu0 %v7542_v0 }
 0x2f6   :  { %v6548_v52 = vpop.f32.mrf.mxu0  ;;  %6608 = vmatpush3.msra.mxu0 %v7929_v32 }
 0x2f7   :  { %v1206_v54 = vadd.f32 %v6058_v44, %v1195_v51  ;;  %v1198_v55 = vadd.f32 %v6548_v52, %v1086_v49  ;;  %v1215_v56 = vmul.f32 0.01, %v1207_v50  ;;  %vm1211_vm14 = vcmp.ge.f32.partialorder %v1207_v50, 0.0  ;;  %6609 = vmatprep.subr.mxu0 %v7542_v0 }
 0x2f8   :  { %v1186_v57 = vpop.f32.mrf.mxu0  ;;  %6610 = vmatpush3.msra.mxu0 %v7943_v35 }
 0x2f9   :  { %v1214_v58 = vmul.f32 0.01, %v1206_v54  ;;  %v1209_v59 = vadd.f32 %v6058_v44, %v1198_v55  ;;  %v1197_v60 = vadd.f32 %v1186_v57, %v1081_v53  ;;  %vm1210_vm15 = vcmp.ge.f32.partialorder %v1206_v54, 0.0  ;;  %6625 = vmatprep.subr.mxu0 %v7542_v0  ;;  %v7999_v53 = vld [vmem:[#allocation15] ss:$0 sm:$0xff] }
 0x2fa   :  { %v1419_v62 = vpop.f32.mrf.mxu0  ;;  %v1219_v2 = vsel %vm1211_vm14, %v1207_v50, %v1215_v56  ;;  %v8004_v55 = vld [vmem:[#allocation13] ss:$0 sm:$0xff] }
 0x2fb   :  { %v1208_v63 = vadd.f32 %v6058_v44, %v1197_v60  ;;  %v1218_v1 = vsel %vm1210_vm15, %v1206_v54, %v1214_v58  ;;  %v1217_v3 = vmul.f32 0.01, %v1209_v59  ;;  %v1420_v4 = vadd.f32 %v7883_v61, %v1419_v62 }
 0x2fc   :  { %6553 = vmatprep.mubr.msk.f32.mxu1 %vm152_vm0, %v1218_v1  ;;  %v6569_v5 = vpop.f32.mrf.mxu0  ;;  %vm1213_vm2 = vcmp.ge.f32.partialorder %v1209_v59, 0.0 }
 0x2fd   :  { %v1216_v6 = vmul.f32 0.01, %v1208_v63  ;;  %6554 = vmatmul.mubr.msk.f32.vlgmr.msra.gmra.mxu1 %vm152_vm0, %v1219_v2  ;;  %vm1212_vm1 = vcmp.ge.f32.partialorder %v1208_v63, 0.0  ;;  %1431 = vrot.lane.b32.xlu0 %v1420_v4, %s7544_s27  ;;  %v1221_v8 = vsel %vm1213_vm2, %v1209_v59, %v1217_v3 }
 0x2fe   :  { %6571 = vmatpush3.msra.mxu1 %v7905_v25 }
 0x2ff   :  { %v1220_v7 = vsel %vm1212_vm1, %v1208_v63, %v1216_v6  ;;  %6572 = vmatprep.subr.mxu1 %v7542_v0 }
 0x300   :  { %6556 = vmatprep.mubr.msk.f32.mxu1 %vm152_vm0, %v1220_v7  ;;  %6573 = vmatpush3.msra.mxu1 %v7915_v28 }
 0x301   :  { %6557 = vmatmul.mubr.msk.f32.gmra.mxu1 %vm152_vm0, %v1221_v8  ;;  %6574 = vmatprep.subr.mxu1 %v7542_v0  ;;  %vm1349_vm0 = vcmask 261120  }
 0x302   :  { %6578 = vmatprep.mubr.msk.f32.mxu1 %vm7543_vm13, %v7542_v0  ;;  %6575 = vmatpush3.msra.mxu1 %v7929_v32 }
 0x303   :  { %6576 = vmatprep.subr.mxu1 %v7542_v0 }
 0x304   :  { %6577 = vmatpush3.msra.mxu1 %v7943_v35 }
 0x305   :  { %6592 = vmatprep.subr.mxu1 %v7542_v0 }
 0x36f   :  { %v1432_v21 = vpop.permute.xlu0 %1431 }
 0x3b1   :  { %v1602_v44 = vpop.f32.mrf.mxu0 }
 0x3b2   :  { %v1603_v54 = vadd.f32 %v7999_v53, %v1602_v44 }
 0x3b3   :  { %v6591_v45 = vpop.f32.mrf.mxu0 }
 0x3bd   :  { %v6555_v10 = vpop.f32.mrf.mxu1 }
 0x3be   :  { %v7893_v12 = vadd.f32 %v6555_v10, %v6059_v9 }
 0x3bf   :  { %v1309_v13 = vpop.f32.mrf.mxu1 }
 0x3c0   :  { %v7895_v14 = vadd.f32 %v6059_v9, %v1309_v13 }
 0x3c1   :  { %v6558_v15 = vpop.f32.mrf.mxu1 }
 0x3c2   :  { %v1423_v16 = vadd.f32 %v1420_v4, %v7895_v14  ;;  %v7898_v17 = vadd.f32 %v6558_v15, %v6059_v9 }
 0x3c3   :  { %v7996_v46 = vpop.f32.mrf.mxu1 }
 0x3c4   :  { %v6065_v18 = vmul.f32 -1.442695, %v1423_v16 }
 0x3c6   :  { %7126 = vpow2.f32 %v6065_v18 }
 0x3d3   :  { %v7127_v19 = vpop.eup %7126 }
 0x3d4   :  { %v1427_v20 = vadd.f32 1.0, %v7127_v19 }
 0x3d6   :  { %7128 = vrcp.f32 %v1427_v20 }
 0x3e3   :  { %v7129_v22 = vpop.eup %7128 }
 0x3e4   :  { %v1434_v11 = vmul.f32 %v7129_v22, %v1432_v21  ;;  %v1441_v38 = vsub.f32 1.0, %v7129_v22  ;;  %v1447_v40 = vmul.f32 0.0, %v7129_v22 }
 0x3e6   :  { %1436 = vrot.lane.b32.xlu0 %v1434_v11, %s7544_s27 }
 0x458   :  { %v1437_v23 = vpop.permute.xlu0 %1436 }
 0x459   :  { %v1439_v24 = vadd.f32 %v1437_v23, %v7895_v14 }
 0x45b   :  { %7130 = vtanh.f32 %v1439_v24 }
 0x468   :  { %v7131_v37 = vpop.eup %7130 }
 0x469   :  { %1443 = vrot.lane.b32.xlu1 %v7131_v37, %s7545_s25 }
 0x4db   :  { %v1444_v39 = vpop.permute.xlu1 %1443 }
 0x4dc   :  { %v1446_v41 = vmul.f32 %v1444_v39, %v1441_v38 }
 0x4de   :  { %v7970_v42 = vadd.f32 %v1447_v40, %v1446_v41 }
 0x4e0   :  { %1456 = vrot.lane.b32.xlu1 %v7970_v42, %s7545_s25  ;;  %v1728_v19 = vrot.slane %v7970_v42, 6 }
 0x552   :  { %v1457_v43 = vpop.permute.xlu1 %1456 }
 0x553   :  { %6579 = vmatmul.mubr.msk.f32.vlgmr.msra.gmra.mxu1 %vm1349_vm0, %v1457_v43 }
 0x554   :  { %6593 = vmatpush3.msra.mxu1 %v7844_v26  ;;  %6600 = vmatprep.mubr.msk.f32.mxu1 %vm7543_vm13, %v7542_v0 }
 0x555   :  { %6594 = vmatprep.subr.mxu1 %v7542_v0 }
 0x556   :  { %6595 = vmatpush3.msra.mxu1 %v7853_v29 }
 0x557   :  { %6596 = vmatprep.subr.mxu1 %v7542_v0 }
 0x558   :  { %6597 = vmatpush3.msra.mxu1 %v7861_v30 }
 0x559   :  { %6598 = vmatprep.subr.mxu1 %v7542_v0 }
 0x55a   :  { %6599 = vmatpush3.msra.mxu1 %v7871_v33 }
 0x55b   :  { %6601 = vmatmul.mubr.msk.f32.vlgmr.msra.gmra.mxu1 %vm1349_vm0, %v1457_v43  ;;  %6614 = vmatprep.subr.mxu1 %v7542_v0 }
 0x55c   :  { %6615 = vmatpush3.msra.mxu1 %v7910_v27  ;;  %6622 = vmatprep.mubr.msk.f32.mxu1 %vm7543_vm13, %v7542_v0 }
 0x55d   :  { %6616 = vmatprep.subr.mxu1 %v7542_v0 }
 0x55e   :  { %6617 = vmatpush3.msra.mxu1 %v7922_v31 }
 0x55f   :  { %6618 = vmatprep.subr.mxu1 %v7542_v0 }
 0x560   :  { %6619 = vmatpush3.msra.mxu1 %v7934_v34 }
 0x561   :  { %6620 = vmatprep.subr.mxu1 %v7542_v0 }
 0x562   :  { %6621 = vmatpush3.msra.mxu1 %v7948_v36 }
 0x563   :  { %6636 = vmatprep.subr.mxu1 %v7542_v0 }
 0x613   :  { %v1526_v47 = vpop.f32.mrf.mxu1 }
 0x614   :  { %v1527_v56 = vadd.f32 %v8004_v55, %v1526_v47 }
 0x615   :  { %v6580_v48 = vpop.f32.mrf.mxu1 }
 0x616   :  { %v1606_v58 = vadd.f32 %v1603_v54, %v1527_v56 }
 0x618   :  { %v6069_v60 = vmul.f32 -1.442695, %v1606_v58 }
 0x61b   :  { %v1698_v49 = vpop.f32.mrf.mxu1 }
 0x61c   :  { %v1699_v50 = vadd.f32 %v7883_v61, %v1698_v49 }
 0x61d   :  { %v6602_v51 = vpop.f32.mrf.mxu1 }
 0x61e   :  { %v1703_v52 = vrot.slane %v1699_v50, 6 }
 0x620   :  { %1712 = vrot.lane.b32.xlu0 %v1703_v52, %s7544_s27  ;;  %v1705_v57 = vadd.f32 %v1703_v52, %v7895_v14 }
 0x622   :  { %v6071_v59 = vmul.f32 -1.442695, %v1705_v57 }
 0x624   :  { %1614 = vrot.lane.b32.xlu0 %v1603_v54, %s7544_s27  ;;  %7132 = vpow2.f32 %v6071_v59 }
 0x625   :  { %7134 = vpow2.f32 %v6069_v60 }
 0x631   :  { %v7133_v62 = vpop.eup %7132 }
 0x632   :  { %v1709_v63 = vadd.f32 1.0, %v7133_v62  ;;  %v7135_v1 = vpop.eup %7134 }
 0x633   :  { %v1610_v2 = vadd.f32 1.0, %v7135_v1 }
 0x634   :  { %7136 = vrcp.f32 %v1709_v63 }
 0x635   :  { %7138 = vrcp.f32 %v1610_v2 }
 0x641   :  { %v7137_v3 = vpop.eup %7136 }
 0x642   :  { %v7139_v6 = vpop.eup %7138  ;;  %v1722_v20 = vsub.f32 1.0, %v7137_v3  ;;  %v1730_v22 = vmul.f32 %v7137_v3, %v1728_v19 }
 0x643   :  { %v1624_v24 = vsub.f32 1.0, %v7139_v6  ;;  %v1630_v40 = vmul.f32 0.0, %v7139_v6 }
 0x692   :  { %v1713_v4 = vpop.permute.xlu0 %1712 }
 0x693   :  { %v1715_v5 = vmul.f32 %v7137_v3, %v1713_v4 }
 0x695   :  { %1717 = vrot.lane.b32.xlu1 %v1715_v5, %s7544_s27 }
 0x696   :  { %v1615_v7 = vpop.permute.xlu0 %1614 }
 0x697   :  { %v1617_v8 = vmul.f32 %v7139_v6, %v1615_v7 }
 0x699   :  { %1619 = vrot.lane.b32.xlu0 %v1617_v8, %s7544_s27 }
 0x707   :  { %v1718_v9 = vpop.permute.xlu1 %1717 }
 0x708   :  { %v1720_v10 = vadd.f32 %v1718_v9, %v7895_v14 }
 0x70a   :  { %7140 = vtanh.f32 %v1720_v10 }
 0x70b   :  { %v1620_v13 = vpop.permute.xlu0 %1619 }
 0x70c   :  { %v1622_v15 = vadd.f32 %v1620_v13, %v1527_v56 }
 0x70e   :  { %7142 = vtanh.f32 %v1622_v15 }
 0x717   :  { %v7141_v16 = vpop.eup %7140 }
 0x718   :  { %1724 = vrot.lane.b32.xlu1 %v7141_v16, %s7545_s25 }
 0x71b   :  { %v7143_v18 = vpop.eup %7142 }
 0x71c   :  { %1626 = vrot.lane.b32.xlu0 %v7143_v18, %s7545_s25 }
 0x78a   :  { %v1725_v21 = vpop.permute.xlu1 %1724 }
 0x78b   :  { %v1727_v11 = vmul.f32 %v1725_v21, %v1722_v20 }
 0x78d   :  { %v8014_v23 = vadd.f32 %v1730_v22, %v1727_v11 }
 0x78e   :  { %v1627_v37 = vpop.permute.xlu0 %1626 }
 0x78f   :  { %v1629_v38 = vmul.f32 %v1627_v37, %v1624_v24  ;;  %v1733_v39 = vrot.slane %v8014_v23, 2  ;;  %v2005_v19 = vrot.slane %v8014_v23, 6 }
 0x791   :  { %1734 = vrot.lane.b32.xlu1 %v1733_v39, %s7545_s25  ;;  %v8018_v41 = vadd.f32 %v1630_v40, %v1629_v38 }
 0x795   :  { %1809 = vrot.lane.b32.xlu1 %v8018_v41, %s7545_s25 }
 0x803   :  { %v1735_v42 = vpop.permute.xlu1 %1734 }
 0x804   :  { %6612 = vmatmul.mubr.msk.f32.vlgmr.msra.gmra.mxu0 %vm1349_vm0, %v1735_v42 }
 0x805   :  { %6626 = vmatpush3.msra.mxu0 %v7844_v26  ;;  %6633 = vmatprep.mubr.msk.f32.mxu0 %vm7543_vm13, %v7542_v0 }
 0x806   :  { %6627 = vmatprep.subr.mxu0 %v7542_v0 }
 0x807   :  { %6628 = vmatpush3.msra.mxu0 %v7853_v29  ;;  %v1810_v43 = vpop.permute.xlu1 %1809 }
 0x808   :  { %6629 = vmatprep.subr.mxu0 %v7542_v0  ;;  %6623 = vmatmul.mubr.msk.f32.vlgmr.msra.gmra.mxu1 %vm1349_vm0, %v1810_v43 }
 0x809   :  { %6630 = vmatpush3.msra.mxu0 %v7861_v30  ;;  %6637 = vmatpush3.msra.mxu1 %v7905_v25 }
 0x80a   :  { %6631 = vmatprep.subr.mxu0 %v7542_v0  ;;  %6638 = vmatprep.subr.mxu1 %v7542_v0 }
 0x80b   :  { %6632 = vmatpush3.msra.mxu0 %v7871_v33  ;;  %6639 = vmatpush3.msra.mxu1 %v7915_v28 }
 0x80c   :  { %6634 = vmatmul.mubr.msk.f32.vlgmr.msra.gmra.mxu0 %vm1349_vm0, %v1735_v42  ;;  %6640 = vmatprep.subr.mxu1 %v7542_v0 }
 0x80d   :  { %6641 = vmatpush3.msra.mxu1 %v7929_v32  ;;  %6647 = vmatprep.subr.mxu0 %v7542_v0 }
 0x80e   :  { %6642 = vmatprep.subr.mxu1 %v7542_v0  ;;  %6648 = vmatpush3.msra.mxu0 %v7910_v27 }
 0x80f   :  { %6643 = vmatpush3.msra.mxu1 %v7943_v35  ;;  %6649 = vmatprep.subr.mxu0 %v7542_v0 }
 0x810   :  { %6644 = vmatprep.mubr.msk.f32.mxu1 %vm7543_vm13, %v7542_v0  ;;  %6650 = vmatpush3.msra.mxu0 %v7922_v31 }
 0x811   :  { %6658 = vmatprep.subr.mxu1 %v7542_v0  ;;  %6651 = vmatprep.subr.mxu0 %v7542_v0 }
 0x812   :  { %6652 = vmatpush3.msra.mxu0 %v7934_v34  ;;  %6655 = vmatprep.mubr.msk.f32.mxu0 %vm7543_vm13, %v7542_v0 }
 0x813   :  { %6653 = vmatprep.subr.mxu0 %v7542_v0 }
 0x814   :  { %6654 = vmatpush3.msra.mxu0 %v7948_v36 }
 0x815   :  { %6669 = vmatprep.subr.mxu0 %v7542_v0 }
 0x8c4   :  { %v1804_v44 = vpop.f32.mrf.mxu0 }
 0x8c5   :  { %v1805_v57 = vadd.f32 %v8004_v55, %v1804_v44 }
 0x8c6   :  { %v6613_v45 = vpop.f32.mrf.mxu0 }
 0x8c8   :  { %v1879_v47 = vpop.f32.mrf.mxu1 }
 0x8c9   :  { %v1880_v54 = vadd.f32 %v7999_v53, %v1879_v47 }
 0x8ca   :  { %v6624_v48 = vpop.f32.mrf.mxu1 }
 0x8cb   :  { %v1883_v58 = vadd.f32 %v1880_v54, %v1805_v57 }
 0x8cc   :  { %v1975_v49 = vpop.f32.mrf.mxu0 }
 0x8cd   :  { %v1976_v50 = vadd.f32 %v7883_v61, %v1975_v49  ;;  %v6074_v60 = vmul.f32 -1.442695, %v1883_v58 }
 0x8ce   :  { %v6635_v51 = vpop.f32.mrf.mxu0 }
 0x8cf   :  { %v1980_v52 = vrot.slane %v1976_v50, 4 }
 0x8d1   :  { %1989 = vrot.lane.b32.xlu0 %v1980_v52, %s7544_s27  ;;  %v1982_v56 = vadd.f32 %v1980_v52, %v7895_v14 }
 0x8d3   :  { %v6076_v59 = vmul.f32 -1.442695, %v1982_v56 }
 0x8d5   :  { %1891 = vrot.lane.b32.xlu0 %v1880_v54, %s7544_s27  ;;  %7144 = vpow2.f32 %v6076_v59 }
 0x8d6   :  { %7146 = vpow2.f32 %v6074_v60 }
 0x8e2   :  { %v7145_v62 = vpop.eup %7144 }
 0x8e3   :  { %v1986_v63 = vadd.f32 1.0, %v7145_v62  ;;  %v7147_v1 = vpop.eup %7146 }
 0x8e4   :  { %v1887_v2 = vadd.f32 1.0, %v7147_v1 }
 0x8e5   :  { %7148 = vrcp.f32 %v1986_v63 }
 0x8e6   :  { %7150 = vrcp.f32 %v1887_v2 }
 0x8f2   :  { %v7149_v3 = vpop.eup %7148 }
 0x8f3   :  { %v7151_v6 = vpop.eup %7150  ;;  %v1999_v20 = vsub.f32 1.0, %v7149_v3  ;;  %v2007_v22 = vmul.f32 %v7149_v3, %v2005_v19 }
 0x8f4   :  { %v1901_v37 = vsub.f32 1.0, %v7151_v6  ;;  %v1907_v42 = vmul.f32 %v7151_v6, %v8018_v41 }
 0x943   :  { %v1990_v4 = vpop.permute.xlu0 %1989 }
 0x944   :  { %v1992_v5 = vmul.f32 %v7149_v3, %v1990_v4 }
 0x946   :  { %1994 = vrot.lane.b32.xlu1 %v1992_v5, %s7544_s27 }
 0x947   :  { %v1892_v7 = vpop.permute.xlu0 %1891 }
 0x948   :  { %v1894_v8 = vmul.f32 %v7151_v6, %v1892_v7 }
 0x94a   :  { %1896 = vrot.lane.b32.xlu0 %v1894_v8, %s7544_s27 }
 0x9b8   :  { %v1995_v9 = vpop.permute.xlu1 %1994 }
 0x9b9   :  { %v1997_v10 = vadd.f32 %v1995_v9, %v7895_v14 }
 0x9bb   :  { %7152 = vtanh.f32 %v1997_v10 }
 0x9bc   :  { %v1897_v13 = vpop.permute.xlu0 %1896 }
 0x9bd   :  { %v1899_v15 = vadd.f32 %v1897_v13, %v1805_v57 }
 0x9bf   :  { %7154 = vtanh.f32 %v1899_v15 }
 0x9c8   :  { %v7153_v16 = vpop.eup %7152 }
 0x9c9   :  { %2001 = vrot.lane.b32.xlu1 %v7153_v16, %s7545_s25 }
 0x9cc   :  { %v7155_v18 = vpop.eup %7154 }
 0x9cd   :  { %1903 = vrot.lane.b32.xlu0 %v7155_v18, %s7545_s25 }
 0xa3b   :  { %v2002_v21 = vpop.permute.xlu1 %2001 }
 0xa3c   :  { %v2004_v11 = vmul.f32 %v2002_v21, %v1999_v20 }
 0xa3e   :  { %v8067_v24 = vadd.f32 %v2007_v22, %v2004_v11 }
 0xa3f   :  { %v1904_v38 = vpop.permute.xlu0 %1903 }
 0xa40   :  { %v1906_v39 = vmul.f32 %v1904_v38, %v1901_v37  ;;  %v2010_v40 = vrot.slane %v8067_v24, 4  ;;  %v2282_v19 = vrot.slane %v8067_v24, 6 }
 0xa42   :  { %2011 = vrot.lane.b32.xlu1 %v2010_v40, %s7545_s25  ;;  %v8072_v43 = vadd.f32 %v1907_v42, %v1906_v39 }
 0xa46   :  { %2086 = vrot.lane.b32.xlu1 %v8072_v43, %s7545_s25 }
 0xab4   :  { %v2012_v23 = vpop.permute.xlu1 %2011 }
 0xab5   :  { %6645 = vmatmul.mubr.msk.f32.vlgmr.msra.gmra.mxu1 %vm1349_vm0, %v2012_v23 }
 0xab6   :  { %6659 = vmatpush3.msra.mxu1 %v7844_v26  ;;  %6666 = vmatprep.mubr.msk.f32.mxu1 %vm7543_vm13, %v7542_v0 }
 0xab7   :  { %6660 = vmatprep.subr.mxu1 %v7542_v0 }
 0xab8   :  { %6661 = vmatpush3.msra.mxu1 %v7853_v29  ;;  %v2087_v41 = vpop.permute.xlu1 %2086 }
 0xab9   :  { %6662 = vmatprep.subr.mxu1 %v7542_v0  ;;  %6656 = vmatmul.mubr.msk.f32.vlgmr.msra.gmra.mxu0 %vm1349_vm0, %v2087_v41 }
 0xaba   :  { %6663 = vmatpush3.msra.mxu1 %v7861_v30  ;;  %6670 = vmatpush3.msra.mxu0 %v7905_v25 }
 0xabb   :  { %6664 = vmatprep.subr.mxu1 %v7542_v0  ;;  %6671 = vmatprep.subr.mxu0 %v7542_v0 }
 0xabc   :  { %6665 = vmatpush3.msra.mxu1 %v7871_v33  ;;  %6672 = vmatpush3.msra.mxu0 %v7915_v28 }
 0xabd   :  { %6667 = vmatmul.mubr.msk.f32.vlgmr.msra.gmra.mxu1 %vm1349_vm0, %v2012_v23  ;;  %6673 = vmatprep.subr.mxu0 %v7542_v0 }
 0xabe   :  { %6674 = vmatpush3.msra.mxu0 %v7929_v32  ;;  %6680 = vmatprep.subr.mxu1 %v7542_v0 }
 0xabf   :  { %6675 = vmatprep.subr.mxu0 %v7542_v0  ;;  %6681 = vmatpush3.msra.mxu1 %v7910_v27 }
 0xac0   :  { %6676 = vmatpush3.msra.mxu0 %v7943_v35  ;;  %6682 = vmatprep.subr.mxu1 %v7542_v0 }
 0xac1   :  { %6677 = vmatprep.mubr.msk.f32.mxu0 %vm7543_vm13, %v7542_v0  ;;  %6683 = vmatpush3.msra.mxu1 %v7922_v31 }
 0xac2   :  { %6691 = vmatprep.subr.mxu0 %v7542_v0  ;;  %6684 = vmatprep.subr.mxu1 %v7542_v0 }
 0xac3   :  { %6685 = vmatpush3.msra.mxu1 %v7934_v34  ;;  %6688 = vmatprep.mubr.msk.f32.mxu1 %vm7543_vm13, %v7542_v0 }
 0xac4   :  { %6686 = vmatprep.subr.mxu1 %v7542_v0 }
 0xac5   :  { %6687 = vmatpush3.msra.mxu1 %v7948_v36 }
 0xac6   :  { %6702 = vmatprep.subr.mxu1 %v7542_v0 }
 0xb75   :  { %v2081_v44 = vpop.f32.mrf.mxu1 }
 0xb76   :  { %v2082_v57 = vadd.f32 %v8004_v55, %v2081_v44 }
 0xb77   :  { %v6646_v45 = vpop.f32.mrf.mxu1 }
 0xb79   :  { %v2156_v47 = vpop.f32.mrf.mxu0 }
 0xb7a   :  { %v2157_v54 = vadd.f32 %v7999_v53, %v2156_v47 }
 0xb7b   :  { %v6657_v48 = vpop.f32.mrf.mxu0 }
 0xb7c   :  { %v2160_v58 = vadd.f32 %v2157_v54, %v2082_v57 }
 0xb7d   :  { %v2252_v49 = vpop.f32.mrf.mxu1 }
 0xb7e   :  { %v2253_v50 = vadd.f32 %v7883_v61, %v2252_v49  ;;  %v6079_v60 = vmul.f32 -1.442695, %v2160_v58 }
 0xb7f   :  { %v6668_v51 = vpop.f32.mrf.mxu1 }
 0xb80   :  { %v2257_v52 = vrot.slane %v2253_v50, 2 }
 0xb82   :  { %2266 = vrot.lane.b32.xlu0 %v2257_v52, %s7544_s27  ;;  %v2259_v56 = vadd.f32 %v2257_v52, %v7895_v14 }
 0xb84   :  { %v6081_v59 = vmul.f32 -1.442695, %v2259_v56 }
 0xb86   :  { %2168 = vrot.lane.b32.xlu0 %v2157_v54, %s7544_s27  ;;  %7156 = vpow2.f32 %v6081_v59 }
 0xb87   :  { %7158 = vpow2.f32 %v6079_v60 }
 0xb93   :  { %v7157_v62 = vpop.eup %7156 }
 0xb94   :  { %v2263_v63 = vadd.f32 1.0, %v7157_v62  ;;  %v7159_v1 = vpop.eup %7158 }
 0xb95   :  { %v2164_v2 = vadd.f32 1.0, %v7159_v1 }
 0xb96   :  { %7160 = vrcp.f32 %v2263_v63 }
 0xb97   :  { %7162 = vrcp.f32 %v2164_v2 }
 0xba3   :  { %v7161_v3 = vpop.eup %7160 }
 0xba4   :  { %v7163_v6 = vpop.eup %7162  ;;  %v2276_v20 = vsub.f32 1.0, %v7161_v3  ;;  %v2284_v22 = vmul.f32 %v7161_v3, %v2282_v19 }
 0xba5   :  { %v2178_v38 = vsub.f32 1.0, %v7163_v6  ;;  %v2184_v42 = vmul.f32 %v7163_v6, %v8072_v43 }
 0xbf4   :  { %v2267_v4 = vpop.permute.xlu0 %2266 }
 0xbf5   :  { %v2269_v5 = vmul.f32 %v7161_v3, %v2267_v4 }
 0xbf7   :  { %2271 = vrot.lane.b32.xlu1 %v2269_v5, %s7544_s27 }
 0xbf8   :  { %v2169_v7 = vpop.permute.xlu0 %2168 }
 0xbf9   :  { %v2171_v8 = vmul.f32 %v7163_v6, %v2169_v7 }
 0xbfb   :  { %2173 = vrot.lane.b32.xlu0 %v2171_v8, %s7544_s27 }
 0xc69   :  { %v2272_v9 = vpop.permute.xlu1 %2271 }
 0xc6a   :  { %v2274_v10 = vadd.f32 %v2272_v9, %v7895_v14 }
 0xc6c   :  { %7164 = vtanh.f32 %v2274_v10 }
 0xc6d   :  { %v2174_v13 = vpop.permute.xlu0 %2173 }
 0xc6e   :  { %v2176_v15 = vadd.f32 %v2174_v13, %v2082_v57 }
 0xc70   :  { %7166 = vtanh.f32 %v2176_v15 }
 0xc79   :  { %v7165_v16 = vpop.eup %7164 }
 0xc7a   :  { %2278 = vrot.lane.b32.xlu1 %v7165_v16, %s7545_s25 }
 0xc7d   :  { %v7167_v18 = vpop.eup %7166 }
 0xc7e   :  { %2180 = vrot.lane.b32.xlu0 %v7167_v18, %s7545_s25 }
 0xcec   :  { %v2279_v21 = vpop.permute.xlu1 %2278 }
 0xced   :  { %v2281_v11 = vmul.f32 %v2279_v21, %v2276_v20 }
 0xcef   :  { %v8121_v37 = vadd.f32 %v2284_v22, %v2281_v11 }
 0xcf0   :  { %v2181_v14 = vpop.permute.xlu0 %2180 }
 0xcf1   :  { %v2183_v39 = vmul.f32 %v2181_v14, %v2178_v38  ;;  %v2287_v40 = vrot.slane %v8121_v37, 6 }
 0xcf3   :  { %2288 = vrot.lane.b32.xlu1 %v2287_v40, %s7545_s25  ;;  %v8128_v23 = vadd.f32 %v2184_v42, %v2183_v39 }
 0xcf7   :  { %2363 = vrot.lane.b32.xlu1 %v8128_v23, %s7545_s25 }
 0xd65   :  { %v2289_v24 = vpop.permute.xlu1 %2288 }
 0xd66   :  { %6678 = vmatmul.mubr.msk.f32.vlgmr.msra.gmra.mxu0 %vm1349_vm0, %v2289_v24 }
 0xd67   :  { %6692 = vmatpush3.msra.mxu0 %v7844_v26  ;;  %6699 = vmatprep.mubr.msk.f32.mxu0 %vm7543_vm13, %v7542_v0 }
 0xd68   :  { %6693 = vmatprep.subr.mxu0 %v7542_v0 }
 0xd69   :  { %6694 = vmatpush3.msra.mxu0 %v7853_v29  ;;  %v2364_v43 = vpop.permute.xlu1 %2363 }
 0xd6a   :  { %6695 = vmatprep.subr.mxu0 %v7542_v0  ;;  %6689 = vmatmul.mubr.msk.f32.vlgmr.msra.gmra.mxu1 %vm1349_vm0, %v2364_v43 }
 0xd6b   :  { %6696 = vmatpush3.msra.mxu0 %v7861_v30  ;;  %6703 = vmatpush3.msra.mxu1 %v7905_v25 }
 0xd6c   :  { %6697 = vmatprep.subr.mxu0 %v7542_v0  ;;  %6704 = vmatprep.subr.mxu1 %v7542_v0 }
 0xd6d   :  { %6698 = vmatpush3.msra.mxu0 %v7871_v33  ;;  %6705 = vmatpush3.msra.mxu1 %v7915_v28 }
 0xd6e   :  { %6700 = vmatmul.mubr.msk.f32.vlgmr.msra.gmra.mxu0 %vm1349_vm0, %v2289_v24  ;;  %6706 = vmatprep.subr.mxu1 %v7542_v0 }
 0xd6f   :  { %6707 = vmatpush3.msra.mxu1 %v7929_v32  ;;  %6713 = vmatprep.subr.mxu0 %v7542_v0 }
 0xd70   :  { %6708 = vmatprep.subr.mxu1 %v7542_v0  ;;  %6714 = vmatpush3.msra.mxu0 %v7910_v27 }
 0xd71   :  { %6709 = vmatpush3.msra.mxu1 %v7943_v35  ;;  %6715 = vmatprep.subr.mxu0 %v7542_v0 }
 0xd72   :  { %6710 = vmatprep.mubr.msk.f32.mxu1 %vm7543_vm13, %v7542_v0  ;;  %6716 = vmatpush3.msra.mxu0 %v7922_v31 }
 0xd73   :  { %6724 = vmatprep.subr.mxu1 %v7542_v0  ;;  %6717 = vmatprep.subr.mxu0 %v7542_v0 }
 0xd74   :  { %6718 = vmatpush3.msra.mxu0 %v7934_v34  ;;  %6721 = vmatprep.mubr.msk.f32.mxu0 %vm7543_vm13, %v7542_v0 }
 0xd75   :  { %6719 = vmatprep.subr.mxu0 %v7542_v0 }
 0xd76   :  { %6720 = vmatpush3.msra.mxu0 %v7948_v36 }
 0xd77   :  { %6735 = vmatprep.subr.mxu0 %v7542_v0 }
 0xe26   :  { %v2358_v41 = vpop.f32.mrf.mxu0 }
 0xe27   :  { %v2359_v54 = vadd.f32 %v8004_v55, %v2358_v41 }
 0xe28   :  { %v6679_v44 = vpop.f32.mrf.mxu0 }
 0xe2a   :  { %v2433_v45 = vpop.f32.mrf.mxu1 }
 0xe2b   :  { %v2434_v51 = vadd.f32 %v7999_v53, %v2433_v45 }
 0xe2c   :  { %v6690_v47 = vpop.f32.mrf.mxu1 }
 0xe2d   :  { %v2437_v56 = vadd.f32 %v2434_v51, %v2359_v54 }
 0xe2e   :  { %v2529_v48 = vpop.f32.mrf.mxu0 }
 0xe2f   :  { %v2530_v49 = vadd.f32 %v7883_v61, %v2529_v48  ;;  %v6084_v58 = vmul.f32 -1.442695, %v2437_v56 }
 0xe30   :  { %v6701_v50 = vpop.f32.mrf.mxu0 }
 0xe31   :  { %2541 = vrot.lane.b32.xlu0 %v2530_v49, %s7544_s27  ;;  %v2533_v52 = vadd.f32 %v2530_v49, %v7893_v12 }
 0xe33   :  { %v6086_v57 = vmul.f32 -1.442695, %v2533_v52 }
 0xe35   :  { %2445 = vrot.lane.b32.xlu0 %v2434_v51, %s7544_s27  ;;  %7168 = vpow2.f32 %v6086_v57 }
 0xe36   :  { %7170 = vpow2.f32 %v6084_v58 }
 0xe42   :  { %v7169_v59 = vpop.eup %7168 }
 0xe43   :  { %v2537_v60 = vadd.f32 1.0, %v7169_v59  ;;  %v7171_v62 = vpop.eup %7170 }
 0xe44   :  { %v2441_v63 = vadd.f32 1.0, %v7171_v62 }
 0xe45   :  { %7172 = vrcp.f32 %v2537_v60 }
 0xe46   :  { %7174 = vrcp.f32 %v2441_v63 }
 0xe52   :  { %v7173_v1 = vpop.eup %7172 }
 0xe53   :  { %v7175_v4 = vpop.eup %7174  ;;  %v2551_v16 = vsub.f32 1.0, %v7173_v1  ;;  %v2558_v19 = vmul.f32 %v7173_v1, %v2287_v40 }
 0xe54   :  { %v2455_v22 = vsub.f32 1.0, %v7175_v4  ;;  %v2461_v38 = vmul.f32 %v7175_v4, %v8128_v23 }
 0xea3   :  { %v2542_v2 = vpop.permute.xlu0 %2541 }
 0xea4   :  { %v2544_v3 = vmul.f32 %v7173_v1, %v2542_v2 }
 0xea6   :  { %2546 = vrot.lane.b32.xlu1 %v2544_v3, %s7544_s27 }
 0xea7   :  { %v2446_v5 = vpop.permute.xlu0 %2445 }
 0xea8   :  { %v2448_v6 = vmul.f32 %v7175_v4, %v2446_v5 }
 0xeaa   :  { %2450 = vrot.lane.b32.xlu0 %v2448_v6, %s7544_s27 }
 0xf18   :  { %v2547_v7 = vpop.permute.xlu1 %2546 }
 0xf19   :  { %v2549_v8 = vadd.f32 %v2547_v7, %v7893_v12 }
 0xf1b   :  { %7176 = vtanh.f32 %v2549_v8 }
 0xf1c   :  { %v2451_v9 = vpop.permute.xlu0 %2450 }
 0xf1d   :  { %v2453_v10 = vadd.f32 %v2451_v9, %v2359_v54 }
 0xf1f   :  { %7178 = vtanh.f32 %v2453_v10 }
 0xf28   :  { %v7177_v13 = vpop.eup %7176 }
 0xf29   :  { %2553 = vrot.lane.b32.xlu1 %v7177_v13, %s7545_s25 }
 0xf2c   :  { %v7179_v15 = vpop.eup %7178 }
 0xf2d   :  { %2457 = vrot.lane.b32.xlu0 %v7179_v15, %s7545_s25 }
 0xf9b   :  { %v2554_v18 = vpop.permute.xlu1 %2553 }
 0xf9c   :  { %v2556_v20 = vmul.f32 %v2554_v18, %v2551_v16 }
 0xf9e   :  { %v8178_v21 = vadd.f32 %v2558_v19, %v2556_v20 }
 0xf9f   :  { %v2458_v11 = vpop.permute.xlu0 %2457 }
 0xfa0   :  { %v2460_v14 = vmul.f32 %v2458_v11, %v2455_v22  ;;  %2561 = vrot.lane.b32.xlu1 %v8178_v21, %s7545_s25  ;;  %v2832_v5 = vrot.slane %v8178_v21, 6  ;;  %v8245_v22 = vld [vmem:[%s8983_s8 + $0x18] sm:$0xff]  ;;  %v8254_v11 = vld [vmem:[%s8983_s8 + $0x10] sm:$0xff] }
 0xfa2   :  { %v8183_v39 = vadd.f32 %v2461_v38, %v2460_v14  ;;  %v8262_v14 = vld [vmem:[%s8983_s8 + $0x8] sm:$0xff] }
 0xfa4   :  { %2636 = vrot.lane.b32.xlu1 %v8183_v39, %s7545_s25 }
0x1012   :  { %v2562_v42 = vpop.permute.xlu1 %2561 }
0x1013   :  { %6711 = vmatmul.mubr.msk.f32.vlgmr.msra.gmra.mxu1 %vm1349_vm0, %v2562_v42 }
0x1014   :  { %6725 = vmatpush3.msra.mxu1 %v7844_v26  ;;  %6732 = vmatprep.mubr.msk.f32.mxu1 %vm7543_vm13, %v7542_v0 }
0x1015   :  { %6726 = vmatprep.subr.mxu1 %v7542_v0 }
0x1016   :  { %6727 = vmatpush3.msra.mxu1 %v7853_v29  ;;  %v2637_v37 = vpop.permute.xlu1 %2636 }
0x1017   :  { %6728 = vmatprep.subr.mxu1 %v7542_v0  ;;  %6722 = vmatmul.mubr.msk.f32.vlgmr.msra.gmra.mxu0 %vm1349_vm0, %v2637_v37 }
0x1018   :  { %6729 = vmatpush3.msra.mxu1 %v7861_v30  ;;  %6736 = vmatpush3.msra.mxu0 %v7905_v25 }
0x1019   :  { %6730 = vmatprep.subr.mxu1 %v7542_v0  ;;  %6737 = vmatprep.subr.mxu0 %v7542_v0 }
0x101a   :  { %6731 = vmatpush3.msra.mxu1 %v7871_v33  ;;  %6738 = vmatpush3.msra.mxu0 %v7915_v28 }
0x101b   :  { %6733 = vmatmul.mubr.msk.f32.vlgmr.msra.gmra.mxu1 %vm1349_vm0, %v2562_v42  ;;  %6739 = vmatprep.subr.mxu0 %v7542_v0 }
0x101c   :  { %6740 = vmatpush3.msra.mxu0 %v7929_v32  ;;  %6746 = vmatprep.subr.mxu1 %v7542_v0 }
0x101d   :  { %6741 = vmatprep.subr.mxu0 %v7542_v0  ;;  %6747 = vmatpush3.msra.mxu1 %v7910_v27 }
0x101e   :  { %6742 = vmatpush3.msra.mxu0 %v7943_v35  ;;  %6748 = vmatprep.subr.mxu1 %v7542_v0 }
0x101f   :  { %6743 = vmatprep.mubr.msk.f32.mxu0 %vm7543_vm13, %v7542_v0  ;;  %6749 = vmatpush3.msra.mxu1 %v7922_v31 }
0x1020   :  { %6757 = vmatprep.subr.mxu0 %v7542_v0  ;;  %6750 = vmatprep.subr.mxu1 %v7542_v0 }
0x1021   :  { %6751 = vmatpush3.msra.mxu1 %v7934_v34  ;;  %6754 = vmatprep.mubr.msk.f32.mxu1 %vm7543_vm13, %v7542_v0 }
0x1022   :  { %6752 = vmatprep.subr.mxu1 %v7542_v0 }
0x1023   :  { %6753 = vmatpush3.msra.mxu1 %v7948_v36 }
0x1024   :  { %6768 = vmatprep.subr.mxu1 %v7542_v0 }
0x10d3   :  { %v2631_v26 = vpop.f32.mrf.mxu1 }
0x10d4   :  { %v2632_v45 = vadd.f32 %v8004_v55, %v2631_v26 }
0x10d5   :  { %v6712_v29 = vpop.f32.mrf.mxu1 }
0x10d7   :  { %v2706_v30 = vpop.f32.mrf.mxu0 }
0x10d8   :  { %v2707_v41 = vadd.f32 %v7999_v53, %v2706_v30 }
0x10d9   :  { %v6723_v33 = vpop.f32.mrf.mxu0 }
0x10da   :  { %v2710_v47 = vadd.f32 %v2707_v41, %v2632_v45 }
0x10db   :  { %v2802_v40 = vpop.f32.mrf.mxu1 }
0x10dc   :  { %v2803_v23 = vadd.f32 %v7883_v61, %v2802_v40  ;;  %v6089_v49 = vmul.f32 -1.442695, %v2710_v47 }
0x10dd   :  { %v6734_v24 = vpop.f32.mrf.mxu1 }
0x10de   :  { %v2807_v43 = vrot.slane %v2803_v23, 6 }
0x10e0   :  { %2816 = vrot.lane.b32.xlu0 %v2807_v43, %s7544_s27  ;;  %v2809_v44 = vadd.f32 %v2807_v43, %v7893_v12 }
0x10e2   :  { %v6091_v48 = vmul.f32 -1.442695, %v2809_v44 }
0x10e4   :  { %2718 = vrot.lane.b32.xlu0 %v2707_v41, %s7544_s27  ;;  %7180 = vpow2.f32 %v6091_v48 }
0x10e5   :  { %7182 = vpow2.f32 %v6089_v49 }
0x10f1   :  { %v7181_v50 = vpop.eup %7180 }
0x10f2   :  { %v2813_v51 = vadd.f32 1.0, %v7181_v50  ;;  %v7183_v61 = vpop.eup %7182 }
0x10f3   :  { %v2714_v52 = vadd.f32 1.0, %v7183_v61 }
0x10f4   :  { %7184 = vrcp.f32 %v2813_v51 }
0x10f5   :  { %7186 = vrcp.f32 %v2714_v52 }
0x1101   :  { %v7185_v54 = vpop.eup %7184 }
0x1102   :  { %v7187_v58 = vpop.eup %7186  ;;  %v2826_v6 = vsub.f32 1.0, %v7185_v54  ;;  %v2834_v8 = vmul.f32 %v7185_v54, %v2832_v5 }
0x1103   :  { %v2728_v13 = vsub.f32 1.0, %v7187_v58  ;;  %v2734_v19 = vmul.f32 %v7187_v58, %v8183_v39  ;;  %v8271_v39 = vld [vmem:[%s8983_s8] sm:$0xff] }
0x1152   :  { %v2817_v56 = vpop.permute.xlu0 %2816 }
0x1153   :  { %v2819_v57 = vmul.f32 %v7185_v54, %v2817_v56 }
0x1155   :  { %2821 = vrot.lane.b32.xlu1 %v2819_v57, %s7544_s27 }
0x1156   :  { %v2719_v59 = vpop.permute.xlu0 %2718 }
0x1157   :  { %v2721_v60 = vmul.f32 %v7187_v58, %v2719_v59 }
0x1159   :  { %2723 = vrot.lane.b32.xlu0 %v2721_v60, %s7544_s27 }
0x11c7   :  { %v2822_v62 = vpop.permute.xlu1 %2821 }
0x11c8   :  { %v2824_v63 = vadd.f32 %v2822_v62, %v7893_v12 }
0x11ca   :  { %7188 = vtanh.f32 %v2824_v63 }
0x11cb   :  { %v2724_v1 = vpop.permute.xlu0 %2723 }
0x11cc   :  { %v2726_v2 = vadd.f32 %v2724_v1, %v2632_v45 }
0x11ce   :  { %7190 = vtanh.f32 %v2726_v2 }
0x11d7   :  { %v7189_v3 = vpop.eup %7188 }
0x11d8   :  { %2828 = vrot.lane.b32.xlu1 %v7189_v3, %s7545_s25 }
0x11db   :  { %v7191_v4 = vpop.eup %7190 }
0x11dc   :  { %2730 = vrot.lane.b32.xlu0 %v7191_v4, %s7545_s25 }
0x124a   :  { %v2829_v7 = vpop.permute.xlu1 %2828 }
0x124b   :  { %v2831_v9 = vmul.f32 %v2829_v7, %v2826_v6 }
0x124d   :  { %v8232_v10 = vadd.f32 %v2834_v8, %v2831_v9  ;;  %v8329_v8 = vld [vmem:[%s8986_s11 + $0x18] sm:$0xff]  ;;  %v8338_v9 = vld [vmem:[%s8986_s11 + $0x10] sm:$0xff] }
0x124e   :  { %v2731_v15 = vpop.permute.xlu0 %2730 }
0x124f   :  { %v2733_v16 = vmul.f32 %v2731_v15, %v2728_v13  ;;  %v2837_v18 = vrot.slane %v8232_v10, 2  ;;  %v3109_v56 = vrot.slane %v8232_v10, 6  ;;  %v8346_v10 = vld [vmem:[%s8987_s12 + $0x18] sm:$0xff]  ;;  %v8356_v13 = vld [vmem:[%s8987_s12 + $0x10] sm:$0xff]  ;;  %v8362_v15 = vld [vmem:[%s8986_s11 + $0x8] sm:$0xff] }
0x1251   :  { %2838 = vrot.lane.b32.xlu1 %v2837_v18, %s7545_s25  ;;  %v8237_v20 = vadd.f32 %v2734_v19, %v2733_v16  ;;  %v8370_v16 = vld [vmem:[%s8987_s12 + $0x8] sm:$0xff]  ;;  %v8376_v18 = vld [vmem:[%s8986_s11] sm:$0xff] }
0x1252   :  { %v8385_v19 = vld [vmem:[%s8987_s12] sm:$0xff] }
0x1255   :  { %2913 = vrot.lane.b32.xlu1 %v8237_v20, %s7545_s25 }
0x12c3   :  { %v2839_v21 = vpop.permute.xlu1 %2838 }
0x12c4   :  { %6744 = vmatmul.mubr.msk.f32.vlgmr.msra.gmra.mxu0 %vm1349_vm0, %v2839_v21 }
0x12c5   :  { %6758 = vmatpush3.msra.mxu0 %v8245_v22  ;;  %6765 = vmatprep.mubr.msk.f32.mxu0 %vm7543_vm13, %v7542_v0 }
0x12c6   :  { %6759 = vmatprep.subr.mxu0 %v7542_v0 }
0x12c7   :  { %6760 = vmatpush3.msra.mxu0 %v8254_v11  ;;  %v2914_v38 = vpop.permute.xlu1 %2913 }
0x12c8   :  { %6761 = vmatprep.subr.mxu0 %v7542_v0  ;;  %6755 = vmatmul.mubr.msk.f32.vlgmr.msra.gmra.mxu1 %vm1349_vm0, %v2914_v38 }
0x12c9   :  { %6762 = vmatpush3.msra.mxu0 %v8262_v14  ;;  %6769 = vmatpush3.msra.mxu1 %v7905_v25 }
0x12ca   :  { %6763 = vmatprep.subr.mxu0 %v7542_v0  ;;  %6770 = vmatprep.subr.mxu1 %v7542_v0 }
0x12cb   :  { %6764 = vmatpush3.msra.mxu0 %v8271_v39  ;;  %6771 = vmatpush3.msra.mxu1 %v7915_v28 }
0x12cc   :  { %6766 = vmatmul.mubr.msk.f32.vlgmr.msra.gmra.mxu0 %vm1349_vm0, %v2839_v21  ;;  %6772 = vmatprep.subr.mxu1 %v7542_v0 }
0x12cd   :  { %6773 = vmatpush3.msra.mxu1 %v7929_v32  ;;  %6779 = vmatprep.subr.mxu0 %v7542_v0 }
0x12ce   :  { %6774 = vmatprep.subr.mxu1 %v7542_v0  ;;  %6780 = vmatpush3.msra.mxu0 %v7910_v27 }
0x12cf   :  { %6775 = vmatpush3.msra.mxu1 %v7943_v35  ;;  %6781 = vmatprep.subr.mxu0 %v7542_v0  ;;  %v8294_v35 = vld [vmem:[#allocation12] ss:$0 sm:$0xff] }
0x12d0   :  { %6776 = vmatprep.mubr.msk.f32.mxu1 %vm7543_vm13, %v7542_v0  ;;  %6782 = vmatpush3.msra.mxu0 %v7922_v31 }
0x12d1   :  { %6790 = vmatprep.subr.mxu1 %v7542_v0  ;;  %6783 = vmatprep.subr.mxu0 %v7542_v0 }
0x12d2   :  { %6784 = vmatpush3.msra.mxu0 %v7934_v34  ;;  %6787 = vmatprep.mubr.msk.f32.mxu0 %vm7543_vm13, %v7542_v0 }
0x12d3   :  { %6785 = vmatprep.subr.mxu0 %v7542_v0 }
0x12d4   :  { %6786 = vmatpush3.msra.mxu0 %v7948_v36 }
0x12d5   :  { %6801 = vmatprep.subr.mxu0 %v7542_v0 }
0x1384   :  { %v2908_v25 = vpop.f32.mrf.mxu0 }
0x1385   :  { %v2909_v29 = vadd.f32 %v8004_v55, %v2908_v25  ;;  %v8390_v25 = vld [vmem:[#allocation15] ss:$0 sm:$0xff] }
0x1386   :  { %v6745_v27 = vpop.f32.mrf.mxu0 }
0x1388   :  { %v2983_v28 = vpop.f32.mrf.mxu1 }
0x1389   :  { %v2984_v26 = vadd.f32 %v7999_v53, %v2983_v28 }
0x138a   :  { %v6756_v32 = vpop.f32.mrf.mxu1 }
0x138b   :  { %v2987_v30 = vadd.f32 %v2984_v26, %v2909_v29 }
0x138c   :  { %v3079_v31 = vpop.f32.mrf.mxu0 }
0x138d   :  { %v3080_v42 = vadd.f32 %v8294_v35, %v3079_v31  ;;  %v6094_v40 = vmul.f32 -1.442695, %v2987_v30 }
0x138e   :  { %v6767_v37 = vpop.f32.mrf.mxu0 }
0x138f   :  { %v3084_v34 = vrot.slane %v3080_v42, 4 }
0x1391   :  { %3093 = vrot.lane.b32.xlu0 %v3084_v34, %s7544_s27  ;;  %v3086_v36 = vadd.f32 %v3084_v34, %v7893_v12  ;;  %v8396_v34 = vld [vmem:[#allocation13] ss:$0 sm:$0xff] }
0x1393   :  { %v6096_v33 = vmul.f32 -1.442695, %v3086_v36 }
0x1395   :  { %2995 = vrot.lane.b32.xlu0 %v2984_v26, %s7544_s27  ;;  %7192 = vpow2.f32 %v6096_v33 }
0x1396   :  { %7194 = vpow2.f32 %v6094_v40 }
0x13a2   :  { %v7193_v23 = vpop.eup %7192 }
0x13a3   :  { %v3090_v24 = vadd.f32 1.0, %v7193_v23  ;;  %v7195_v43 = vpop.eup %7194 }
0x13a4   :  { %v2991_v41 = vadd.f32 1.0, %v7195_v43 }
0x13a5   :  { %7196 = vrcp.f32 %v3090_v24 }
0x13a6   :  { %7198 = vrcp.f32 %v2991_v41 }
0x13b2   :  { %v7197_v44 = vpop.eup %7196 }
0x13b3   :  { %v7199_v47 = vpop.eup %7198  ;;  %v3103_v57 = vsub.f32 1.0, %v7197_v44  ;;  %v3111_v59 = vmul.f32 %v7197_v44, %v3109_v56 }
0x13b4   :  { %v3005_v63 = vsub.f32 1.0, %v7199_v47  ;;  %v3011_v4 = vmul.f32 %v7199_v47, %v8237_v20 }
0x1403   :  { %v3094_v45 = vpop.permute.xlu0 %3093 }
0x1404   :  { %v3096_v53 = vmul.f32 %v7197_v44, %v3094_v45 }
0x1406   :  { %3098 = vrot.lane.b32.xlu1 %v3096_v53, %s7544_s27 }
0x1407   :  { %v2996_v48 = vpop.permute.xlu0 %2995 }
0x1408   :  { %v2998_v49 = vmul.f32 %v7199_v47, %v2996_v48 }
0x140a   :  { %3000 = vrot.lane.b32.xlu1 %v2998_v49, %s7544_s27 }
0x1478   :  { %v3099_v55 = vpop.permute.xlu1 %3098 }
0x1479   :  { %v3101_v50 = vadd.f32 %v3099_v55, %v7893_v12 }
0x147b   :  { %7200 = vtanh.f32 %v3101_v50 }
0x147c   :  { %v3001_v51 = vpop.permute.xlu1 %3000 }
0x147d   :  { %v3003_v61 = vadd.f32 %v3001_v51, %v2909_v29 }
0x147f   :  { %7202 = vtanh.f32 %v3003_v61 }
0x1488   :  { %v7201_v52 = vpop.eup %7200 }
0x1489   :  { %3105 = vrot.lane.b32.xlu0 %v7201_v52, %s7545_s25 }
0x148c   :  { %v7203_v54 = vpop.eup %7202 }
0x148d   :  { %3007 = vrot.lane.b32.xlu0 %v7203_v54, %s7545_s25 }
0x14fb   :  { %v3106_v58 = vpop.permute.xlu0 %3105 }
0x14fc   :  { %v3108_v60 = vmul.f32 %v3106_v58, %v3103_v57 }
0x14fe   :  { %v8308_v62 = vadd.f32 %v3111_v59, %v3108_v60 }
0x14ff   :  { %v3008_v1 = vpop.permute.xlu0 %3007 }
0x1500   :  { %v3010_v2 = vmul.f32 %v3008_v1, %v3005_v63  ;;  %v3114_v3 = vrot.slane %v8308_v62, 4  ;;  %v3386_v60 = vrot.slane %v8308_v62, 6 }
0x1502   :  { %3115 = vrot.lane.b32.xlu1 %v3114_v3, %s7545_s25  ;;  %v8313_v5 = vadd.f32 %v3011_v4, %v3010_v2 }
0x1506   :  { %3190 = vrot.lane.b32.xlu1 %v8313_v5, %s7545_s25 }
0x1574   :  { %v3116_v6 = vpop.permute.xlu1 %3115 }
0x1575   :  { %6777 = vmatmul.mubr.msk.f32.vlgmr.msra.gmra.mxu1 %vm1349_vm0, %v3116_v6 }
0x1576   :  { %6791 = vmatpush3.msra.mxu1 %v8245_v22  ;;  %6798 = vmatprep.mubr.msk.f32.mxu1 %vm7543_vm13, %v7542_v0 }
0x1577   :  { %6792 = vmatprep.subr.mxu1 %v7542_v0 }
0x1578   :  { %6793 = vmatpush3.msra.mxu1 %v8254_v11  ;;  %v3191_v7 = vpop.permute.xlu1 %3190 }
0x1579   :  { %6794 = vmatprep.subr.mxu1 %v7542_v0  ;;  %6788 = vmatmul.mubr.msk.f32.vlgmr.msra.gmra.mxu0 %vm1349_vm0, %v3191_v7 }
0x157a   :  { %6795 = vmatpush3.msra.mxu1 %v8262_v14  ;;  %6802 = vmatpush3.msra.mxu0 %v8329_v8 }
0x157b   :  { %6796 = vmatprep.subr.mxu1 %v7542_v0  ;;  %6803 = vmatprep.subr.mxu0 %v7542_v0 }
0x157c   :  { %6797 = vmatpush3.msra.mxu1 %v8271_v39  ;;  %6804 = vmatpush3.msra.mxu0 %v8338_v9 }
0x157d   :  { %6799 = vmatmul.mubr.msk.f32.vlgmr.msra.gmra.mxu1 %vm1349_vm0, %v3116_v6  ;;  %6812 = vmatprep.subr.mxu1 %v7542_v0 }
0x157e   :  { %6813 = vmatpush3.msra.mxu1 %v8346_v10  ;;  %6820 = vmatprep.mubr.msk.f32.mxu1 %vm7543_vm13, %v7542_v0 }
0x157f   :  { %6814 = vmatprep.subr.mxu1 %v7542_v0  ;;  %6805 = vmatprep.subr.mxu0 %v7542_v0 }
0x1580   :  { %6815 = vmatpush3.msra.mxu1 %v8356_v13  ;;  %6806 = vmatpush3.msra.mxu0 %v8362_v15 }
0x1581   :  { %6816 = vmatprep.subr.mxu1 %v7542_v0  ;;  %6807 = vmatprep.subr.mxu0 %v7542_v0 }
0x1582   :  { %6817 = vmatpush3.msra.mxu1 %v8370_v16  ;;  %6808 = vmatpush3.msra.mxu0 %v8376_v18 }
0x1583   :  { %6818 = vmatprep.subr.mxu1 %v7542_v0  ;;  %6809 = vmatprep.mubr.msk.f32.mxu0 %vm7543_vm13, %v7542_v0 }
0x1584   :  { %6819 = vmatpush3.msra.mxu1 %v8385_v19  ;;  %6823 = vmatprep.subr.mxu0 %v7542_v0 }
0x1585   :  { %6834 = vmatprep.subr.mxu1 %v7542_v0 }
0x1635   :  { %v3185_v20 = vpop.f32.mrf.mxu1 }
0x1636   :  { %v3186_v26 = vadd.f32 %v8396_v34, %v3185_v20 }
0x1637   :  { %v6778_v21 = vpop.f32.mrf.mxu1 }
0x1639   :  { %v3260_v38 = vpop.f32.mrf.mxu0 }
0x163a   :  { %v3261_v27 = vadd.f32 %v8390_v25, %v3260_v38 }
0x163b   :  { %v6789_v28 = vpop.f32.mrf.mxu0 }
0x163c   :  { %3272 = vrot.lane.b32.xlu1 %v3261_v27, %s7544_s27  ;;  %v3264_v36 = vadd.f32 %v3261_v27, %v3186_v26 }
0x163d   :  { %v3356_v32 = vpop.f32.mrf.mxu1 }
0x163e   :  { %v3357_v31 = vadd.f32 %v8294_v35, %v3356_v32  ;;  %v6099_v29 = vmul.f32 -1.442695, %v3264_v36 }
0x163f   :  { %v6800_v42 = vpop.f32.mrf.mxu1 }
0x1640   :  { %v3361_v37 = vrot.slane %v3357_v31, 2  ;;  %7204 = vpow2.f32 %v6099_v29 }
0x1642   :  { %3370 = vrot.lane.b32.xlu0 %v3361_v37, %s7544_s27  ;;  %v3363_v30 = vadd.f32 %v3361_v37, %v7893_v12 }
0x1644   :  { %v6101_v33 = vmul.f32 -1.442695, %v3363_v30 }
0x1646   :  { %7206 = vpow2.f32 %v6101_v33 }
0x164d   :  { %v7205_v40 = vpop.eup %7204 }
0x164e   :  { %v3268_v23 = vadd.f32 1.0, %v7205_v40 }
0x1650   :  { %7208 = vrcp.f32 %v3268_v23 }
0x1653   :  { %v7207_v24 = vpop.eup %7206 }
0x1654   :  { %v3367_v43 = vadd.f32 1.0, %v7207_v24 }
0x1656   :  { %7210 = vrcp.f32 %v3367_v43 }
0x165d   :  { %v7209_v41 = vpop.eup %7208 }
0x165e   :  { %v3282_v54 = vsub.f32 1.0, %v7209_v41  ;;  %v3288_v57 = vmul.f32 %v7209_v41, %v8313_v5 }
0x1663   :  { %v7211_v53 = vpop.eup %7210 }
0x1664   :  { %v3388_v1 = vmul.f32 %v7211_v53, %v3386_v60 }
0x16ae   :  { %v3273_v44 = vpop.permute.xlu1 %3272 }
0x16af   :  { %v3275_v45 = vmul.f32 %v7209_v41, %v3273_v44 }
0x16b1   :  { %3277 = vrot.lane.b32.xlu1 %v3275_v45, %s7544_s27 }
0x16b4   :  { %v3371_v47 = vpop.permute.xlu0 %3370 }
0x16b5   :  { %v3373_v48 = vmul.f32 %v7211_v53, %v3371_v47 }
0x16b7   :  { %3375 = vrot.lane.b32.xlu0 %v3373_v48, %s7544_s27 }
0x1723   :  { %v3278_v49 = vpop.permute.xlu1 %3277 }
0x1724   :  { %v3280_v55 = vadd.f32 %v3278_v49, %v3186_v26  ;;  %v7337_v26 = vld [vmem:[#allocation10] ss:$0 sm:$0xff] }
0x1725   :  { %v8456_v36 = vadd.f32 %v7337_v26, %v7996_v46 }
0x1726   :  { %7212 = vtanh.f32 %v3280_v55 }
0x1729   :  { %v3376_v50 = vpop.permute.xlu0 %3375 }
0x172a   :  { %v3378_v51 = vadd.f32 %v3376_v50, %v7893_v12  ;;  %v3380_v12 = vsub.f32 1.0, %v7211_v53 }
0x172c   :  { %7214 = vtanh.f32 %v3378_v51 }
0x1733   :  { %v7213_v61 = vpop.eup %7212 }
0x1734   :  { %3284 = vrot.lane.b32.xlu1 %v7213_v61, %s7545_s25 }
0x1739   :  { %v7215_v52 = vpop.eup %7214 }
0x173a   :  { %3382 = vrot.lane.b32.xlu0 %v7215_v52, %s7545_s25 }
0x17a6   :  { %v3285_v56 = vpop.permute.xlu1 %3284 }
0x17a7   :  { %v3287_v58 = vmul.f32 %v3285_v56, %v3282_v54 }
0x17a9   :  { %v8406_v59 = vadd.f32 %v3288_v57, %v3287_v58 }
0x17ab   :  { %3467 = vrot.lane.b32.xlu1 %v8406_v59, %s7545_s25 }
0x17ac   :  { %v3383_v63 = vpop.permute.xlu0 %3382 }
0x17ad   :  { %v3385_v2 = vmul.f32 %v3383_v63, %v3380_v12 }
0x17af   :  { %v8411_v3 = vadd.f32 %v3388_v1, %v3385_v2 }
0x17b1   :  { %v3391_v4 = vrot.slane %v8411_v3, 6 }
0x17b3   :  { %3392 = vrot.lane.b32.xlu0 %v3391_v4, %s7545_s25 }
0x181d   :  { %v3468_v5 = vpop.permute.xlu1 %3467 }
0x181e   :  { %6821 = vmatmul.mubr.msk.f32.vlgmr.msra.gmra.mxu1 %vm1349_vm0, %v3468_v5 }
0x181f   :  { %6835 = vmatpush3.msra.mxu1 %v8329_v8  ;;  %6842 = vmatprep.mubr.msk.f32.mxu1 %vm7543_vm13, %v7542_v0 }
0x1820   :  { %6836 = vmatprep.subr.mxu1 %v7542_v0 }
0x1821   :  { %6837 = vmatpush3.msra.mxu1 %v8338_v9 }
0x1822   :  { %6838 = vmatprep.subr.mxu1 %v7542_v0 }
0x1823   :  { %6839 = vmatpush3.msra.mxu1 %v8362_v15 }
0x1824   :  { %6840 = vmatprep.subr.mxu1 %v7542_v0 }
0x1825   :  { %v3393_v62 = vpop.permute.xlu0 %3392  ;;  %6841 = vmatpush3.msra.mxu1 %v8376_v18 }
0x1826   :  { %6810 = vmatmul.mubr.msk.f32.vlgmr.msra.gmra.mxu0 %vm1349_vm0, %v3393_v62  ;;  %6856 = vmatprep.subr.mxu1 %v7542_v0 }
0x1827   :  { %6824 = vmatpush3.msra.mxu0 %v8245_v22  ;;  %6831 = vmatprep.mubr.msk.f32.mxu0 %vm7543_vm13, %v7542_v0 }
0x1828   :  { %6825 = vmatprep.subr.mxu0 %v7542_v0 }
0x1829   :  { %6826 = vmatpush3.msra.mxu0 %v8254_v11 }
0x182a   :  { %6827 = vmatprep.subr.mxu0 %v7542_v0 }
0x182b   :  { %6828 = vmatpush3.msra.mxu0 %v8262_v14 }
0x182c   :  { %6829 = vmatprep.subr.mxu0 %v7542_v0 }
0x182d   :  { %6830 = vmatpush3.msra.mxu0 %v8271_v39 }
0x182e   :  { %6832 = vmatmul.mubr.msk.f32.vlgmr.msra.gmra.mxu0 %vm1349_vm0, %v3393_v62  ;;  %6845 = vmatprep.subr.mxu0 %v7542_v0 }
0x182f   :  { %6846 = vmatpush3.msra.mxu0 %v8346_v10  ;;  %6853 = vmatprep.mubr.msk.f32.mxu0 %vm7543_vm13, %v7542_v0 }
0x1830   :  { %6847 = vmatprep.subr.mxu0 %v7542_v0 }
0x1831   :  { %6848 = vmatpush3.msra.mxu0 %v8356_v13 }
0x1832   :  { %6849 = vmatprep.subr.mxu0 %v7542_v0 }
0x1833   :  { %6850 = vmatpush3.msra.mxu0 %v8370_v16 }
0x1834   :  { %6851 = vmatprep.subr.mxu0 %v7542_v0 }
0x1835   :  { %6852 = vmatpush3.msra.mxu0 %v8385_v19 }
0x1836   :  { %6867 = vmatprep.subr.mxu0 %v7542_v0 }
0x18de   :  { %v3537_v6 = vpop.f32.mrf.mxu1 }
0x18df   :  { %v3538_v7 = vadd.f32 %v8390_v25, %v3537_v6 }
0x18e0   :  { %v6822_v20 = vpop.f32.mrf.mxu1 }
0x18e1   :  { %3549 = vrot.lane.b32.xlu1 %v3538_v7, %s7544_s27 }
0x18e6   :  { %v3462_v21 = vpop.f32.mrf.mxu0 }
0x18e7   :  { %v3463_v31 = vadd.f32 %v8396_v34, %v3462_v21 }
0x18e8   :  { %v6811_v38 = vpop.f32.mrf.mxu0 }
0x18e9   :  { %v3541_v42 = vadd.f32 %v3538_v7, %v3463_v31 }
0x18eb   :  { %v6104_v37 = vmul.f32 -1.442695, %v3541_v42 }
0x18ed   :  { %7216 = vpow2.f32 %v6104_v37 }
0x18ee   :  { %v3633_v27 = vpop.f32.mrf.mxu0 }
0x18ef   :  { %v3634_v28 = vadd.f32 %v8294_v35, %v3633_v27 }
0x18f0   :  { %v6833_v32 = vpop.f32.mrf.mxu0 }
0x18f1   :  { %3645 = vrot.lane.b32.xlu0 %v3634_v28, %s7544_s27  ;;  %v3637_v29 = vadd.f32 %v3634_v28, %v8456_v36 }
0x18f3   :  { %v6106_v30 = vmul.f32 -1.442695, %v3637_v29 }
0x18f5   :  { %7218 = vpow2.f32 %v6106_v30 }
0x18fa   :  { %v7217_v33 = vpop.eup %7216 }
0x18fb   :  { %v3545_v40 = vadd.f32 1.0, %v7217_v33 }
0x18fd   :  { %7220 = vrcp.f32 %v3545_v40 }
0x1902   :  { %v7219_v23 = vpop.eup %7218 }
0x1903   :  { %v3641_v24 = vadd.f32 1.0, %v7219_v23 }
0x1905   :  { %7222 = vrcp.f32 %v3641_v24 }
0x190a   :  { %v7221_v43 = vpop.eup %7220 }
0x190b   :  { %v3559_v61 = vsub.f32 1.0, %v7221_v43  ;;  %v3565_v54 = vmul.f32 %v7221_v43, %v8406_v59 }
0x1912   :  { %v7223_v45 = vpop.eup %7222 }
0x1913   :  { %v3655_v58 = vsub.f32 1.0, %v7223_v45  ;;  %v3662_v12 = vmul.f32 %v7223_v45, %v3391_v4 }
0x1953   :  { %v3550_v41 = vpop.permute.xlu1 %3549 }
0x1954   :  { %v3552_v44 = vmul.f32 %v7221_v43, %v3550_v41 }
0x1956   :  { %3554 = vrot.lane.b32.xlu1 %v3552_v44, %s7544_s27 }
0x1963   :  { %v3646_v53 = vpop.permute.xlu0 %3645 }
0x1964   :  { %v3648_v47 = vmul.f32 %v7223_v45, %v3646_v53 }
0x1966   :  { %3650 = vrot.lane.b32.xlu0 %v3648_v47, %s7544_s27 }
0x19c8   :  { %v3555_v46 = vpop.permute.xlu1 %3554 }
0x19c9   :  { %v3557_v48 = vadd.f32 %v3555_v46, %v3463_v31 }
0x19cb   :  { %7224 = vtanh.f32 %v3557_v48 }
0x19d8   :  { %v7225_v49 = vpop.eup %7224  ;;  %v3651_v55 = vpop.permute.xlu0 %3650 }
0x19d9   :  { %v3653_v50 = vadd.f32 %v3651_v55, %v8456_v36  ;;  %3561 = vrot.lane.b32.xlu1 %v7225_v49, %s7545_s25 }
0x19db   :  { %7226 = vtanh.f32 %v3653_v50 }
0x19e8   :  { %v7227_v51 = vpop.eup %7226 }
0x19e9   :  { %3657 = vrot.lane.b32.xlu0 %v7227_v51, %s7545_s25 }
0x1a4b   :  { %v3562_v52 = vpop.permute.xlu1 %3561 }
0x1a4c   :  { %v3564_v56 = vmul.f32 %v3562_v52, %v3559_v61 }
0x1a4e   :  { %v8465_v57 = vadd.f32 %v3565_v54, %v3564_v56 }
0x1a50   :  { %3740 = vrot.lane.b32.xlu1 %v8465_v57, %s7545_s25 }
0x1a5b   :  { %v3658_v60 = vpop.permute.xlu0 %3657 }
0x1a5c   :  { %v3660_v63 = vmul.f32 %v3658_v60, %v3655_v58 }
0x1a5e   :  { %v8471_v1 = vadd.f32 %v3662_v12, %v3660_v63 }
0x1a60   :  { %3665 = vrot.lane.b32.xlu0 %v8471_v1, %s7545_s25  ;;  %v3936_v52 = vrot.slane %v8471_v1, 6 }
0x1ac2   :  { %v3741_v2 = vpop.permute.xlu1 %3740 }
0x1ac3   :  { %6854 = vmatmul.mubr.msk.f32.vlgmr.msra.gmra.mxu0 %vm1349_vm0, %v3741_v2 }
0x1ac4   :  { %6868 = vmatpush3.msra.mxu0 %v8329_v8  ;;  %6875 = vmatprep.mubr.msk.f32.mxu0 %vm7543_vm13, %v7542_v0 }
0x1ac5   :  { %6869 = vmatprep.subr.mxu0 %v7542_v0 }
0x1ac6   :  { %6870 = vmatpush3.msra.mxu0 %v8338_v9 }
0x1ac7   :  { %6871 = vmatprep.subr.mxu0 %v7542_v0 }
0x1ac8   :  { %6872 = vmatpush3.msra.mxu0 %v8362_v15 }
0x1ac9   :  { %6873 = vmatprep.subr.mxu0 %v7542_v0 }
0x1aca   :  { %6874 = vmatpush3.msra.mxu0 %v8376_v18 }
0x1acb   :  { %6889 = vmatprep.subr.mxu0 %v7542_v0 }
0x1ad2   :  { %v3666_v59 = vpop.permute.xlu0 %3665 }
0x1ad3   :  { %6843 = vmatmul.mubr.msk.f32.vlgmr.msra.gmra.mxu1 %vm1349_vm0, %v3666_v59 }
0x1ad4   :  { %6857 = vmatpush3.msra.mxu1 %v8245_v22  ;;  %6864 = vmatprep.mubr.msk.f32.mxu1 %vm7543_vm13, %v7542_v0 }
0x1ad5   :  { %6858 = vmatprep.subr.mxu1 %v7542_v0 }
0x1ad6   :  { %6859 = vmatpush3.msra.mxu1 %v8254_v11 }
0x1ad7   :  { %6860 = vmatprep.subr.mxu1 %v7542_v0 }
0x1ad8   :  { %6861 = vmatpush3.msra.mxu1 %v8262_v14 }
0x1ad9   :  { %6862 = vmatprep.subr.mxu1 %v7542_v0 }
0x1ada   :  { %6863 = vmatpush3.msra.mxu1 %v8271_v39 }
0x1adb   :  { %6865 = vmatmul.mubr.msk.f32.vlgmr.msra.gmra.mxu1 %vm1349_vm0, %v3666_v59  ;;  %6878 = vmatprep.subr.mxu1 %v7542_v0 }
0x1adc   :  { %6879 = vmatpush3.msra.mxu1 %v8346_v10  ;;  %6886 = vmatprep.mubr.msk.f32.mxu1 %vm7543_vm13, %v7542_v0 }
0x1add   :  { %6880 = vmatprep.subr.mxu1 %v7542_v0 }
0x1ade   :  { %6881 = vmatpush3.msra.mxu1 %v8356_v13 }
0x1adf   :  { %6882 = vmatprep.subr.mxu1 %v7542_v0 }
0x1ae0   :  { %6883 = vmatpush3.msra.mxu1 %v8370_v16 }
0x1ae1   :  { %6884 = vmatprep.subr.mxu1 %v7542_v0 }
0x1ae2   :  { %6885 = vmatpush3.msra.mxu1 %v8385_v19 }
0x1ae3   :  { %6900 = vmatprep.subr.mxu1 %v7542_v0 }
0x1b83   :  { %v3810_v3 = vpop.f32.mrf.mxu0 }
0x1b84   :  { %v3811_v4 = vadd.f32 %v8390_v25, %v3810_v3 }
0x1b85   :  { %v6855_v5 = vpop.f32.mrf.mxu0 }
0x1b86   :  { %3822 = vrot.lane.b32.xlu1 %v3811_v4, %s7544_s27 }
0x1b93   :  { %v3735_v62 = vpop.f32.mrf.mxu1 }
0x1b94   :  { %v3736_v27 = vadd.f32 %v8396_v34, %v3735_v62 }
0x1b95   :  { %v6844_v6 = vpop.f32.mrf.mxu1 }
0x1b96   :  { %v3814_v28 = vadd.f32 %v3811_v4, %v3736_v27 }
0x1b98   :  { %v6109_v32 = vmul.f32 -1.442695, %v3814_v28 }
0x1b9a   :  { %7228 = vpow2.f32 %v6109_v32 }
0x1b9b   :  { %v3906_v7 = vpop.f32.mrf.mxu1 }
0x1b9c   :  { %v3907_v20 = vadd.f32 %v8294_v35, %v3906_v7 }
0x1b9d   :  { %v6866_v21 = vpop.f32.mrf.mxu1 }
0x1b9e   :  { %v3911_v38 = vrot.slane %v3907_v20, 6 }
0x1ba0   :  { %3920 = vrot.lane.b32.xlu0 %v3911_v38, %s7544_s27  ;;  %v3913_v37 = vadd.f32 %v3911_v38, %v8456_v36 }
0x1ba2   :  { %v6111_v26 = vmul.f32 -1.442695, %v3913_v37 }
0x1ba7   :  { %v7229_v31 = vpop.eup %7228 }
0x1ba8   :  { %v3818_v42 = vadd.f32 1.0, %v7229_v31 }
0x1baa   :  { %7230 = vrcp.f32 %v3818_v42 }
0x1bab   :  { %7232 = vpow2.f32 %v6111_v26 }
0x1bb7   :  { %v7231_v29 = vpop.eup %7230 }
0x1bb8   :  { %v7233_v40 = vpop.eup %7232  ;;  %v3832_v49 = vsub.f32 1.0, %v7231_v29  ;;  %v3838_v50 = vmul.f32 %v7231_v29, %v8465_v57 }
0x1bb9   :  { %v3917_v23 = vadd.f32 1.0, %v7233_v40 }
0x1bbb   :  { %7234 = vrcp.f32 %v3917_v23 }
0x1bc8   :  { %v7235_v24 = vpop.eup %7234 }
0x1bc9   :  { %v3930_v54 = vsub.f32 1.0, %v7235_v24  ;;  %v3938_v60 = vmul.f32 %v7235_v24, %v3936_v52 }
0x1bf8   :  { %v3823_v30 = vpop.permute.xlu1 %3822 }
0x1bf9   :  { %v3825_v33 = vmul.f32 %v7231_v29, %v3823_v30 }
0x1bfb   :  { %3827 = vrot.lane.b32.xlu1 %v3825_v33, %s7544_s27 }
0x1c12   :  { %v3921_v43 = vpop.permute.xlu0 %3920 }
0x1c13   :  { %v3923_v41 = vmul.f32 %v7235_v24, %v3921_v43 }
0x1c15   :  { %3925 = vrot.lane.b32.xlu0 %v3923_v41, %s7544_s27 }
0x1c6d   :  { %v3828_v44 = vpop.permute.xlu1 %3827 }
0x1c6e   :  { %v3830_v45 = vadd.f32 %v3828_v44, %v3736_v27 }
0x1c70   :  { %7236 = vtanh.f32 %v3830_v45 }
0x1c7d   :  { %v7237_v53 = vpop.eup %7236 }
0x1c7e   :  { %3834 = vrot.lane.b32.xlu1 %v7237_v53, %s7545_s25 }
0x1c87   :  { %v3926_v47 = vpop.permute.xlu0 %3925 }
0x1c88   :  { %v3928_v46 = vadd.f32 %v3926_v47, %v8456_v36 }
0x1c8a   :  { %7238 = vtanh.f32 %v3928_v46 }
0x1c97   :  { %v7239_v48 = vpop.eup %7238 }
0x1c98   :  { %3932 = vrot.lane.b32.xlu0 %v7239_v48, %s7545_s25 }
0x1cf0   :  { %v3835_v55 = vpop.permute.xlu1 %3834 }
0x1cf1   :  { %v3837_v51 = vmul.f32 %v3835_v55, %v3832_v49 }
0x1cf3   :  { %v8520_v61 = vadd.f32 %v3838_v50, %v3837_v51 }
0x1cf5   :  { %4017 = vrot.lane.b32.xlu1 %v8520_v61, %s7545_s25 }
0x1d0a   :  { %v3933_v56 = vpop.permute.xlu0 %3932 }
0x1d0b   :  { %v3935_v58 = vmul.f32 %v3933_v56, %v3930_v54 }
0x1d0d   :  { %v8525_v12 = vadd.f32 %v3938_v60, %v3935_v58 }
0x1d0f   :  { %v3941_v63 = vrot.slane %v8525_v12, 2  ;;  %v4213_v51 = vrot.slane %v8525_v12, 6 }
0x1d11   :  { %3942 = vrot.lane.b32.xlu0 %v3941_v63, %s7545_s25 }
0x1d67   :  { %v4018_v2 = vpop.permute.xlu1 %4017 }
0x1d68   :  { %6887 = vmatmul.mubr.msk.f32.vlgmr.msra.gmra.mxu1 %vm1349_vm0, %v4018_v2 }
0x1d69   :  { %6901 = vmatpush3.msra.mxu1 %v8329_v8  ;;  %6908 = vmatprep.mubr.msk.f32.mxu1 %vm7543_vm13, %v7542_v0 }
0x1d6a   :  { %6902 = vmatprep.subr.mxu1 %v7542_v0 }
0x1d6b   :  { %6903 = vmatpush3.msra.mxu1 %v8338_v9 }
0x1d6c   :  { %6904 = vmatprep.subr.mxu1 %v7542_v0 }
0x1d6d   :  { %6905 = vmatpush3.msra.mxu1 %v8362_v15 }
0x1d6e   :  { %6906 = vmatprep.subr.mxu1 %v7542_v0 }
0x1d6f   :  { %6907 = vmatpush3.msra.mxu1 %v8376_v18 }
0x1d70   :  { %6922 = vmatprep.subr.mxu1 %v7542_v0 }
0x1d83   :  { %v3943_v57 = vpop.permute.xlu0 %3942 }
0x1d84   :  { %6876 = vmatmul.mubr.msk.f32.vlgmr.msra.gmra.mxu0 %vm1349_vm0, %v3943_v57 }
0x1d85   :  { %6890 = vmatpush3.msra.mxu0 %v8245_v22  ;;  %6897 = vmatprep.mubr.msk.f32.mxu0 %vm7543_vm13, %v7542_v0 }
0x1d86   :  { %6891 = vmatprep.subr.mxu0 %v7542_v0 }
0x1d87   :  { %6892 = vmatpush3.msra.mxu0 %v8254_v11 }
0x1d88   :  { %6893 = vmatprep.subr.mxu0 %v7542_v0 }
0x1d89   :  { %6894 = vmatpush3.msra.mxu0 %v8262_v14 }
0x1d8a   :  { %6895 = vmatprep.subr.mxu0 %v7542_v0 }
0x1d8b   :  { %6896 = vmatpush3.msra.mxu0 %v8271_v39 }
0x1d8c   :  { %6898 = vmatmul.mubr.msk.f32.vlgmr.msra.gmra.mxu0 %vm1349_vm0, %v3943_v57  ;;  %6911 = vmatprep.subr.mxu0 %v7542_v0 }
0x1d8d   :  { %6912 = vmatpush3.msra.mxu0 %v8346_v10  ;;  %6919 = vmatprep.mubr.msk.f32.mxu0 %vm7543_vm13, %v7542_v0 }
0x1d8e   :  { %6913 = vmatprep.subr.mxu0 %v7542_v0 }
0x1d8f   :  { %6914 = vmatpush3.msra.mxu0 %v8356_v13 }
0x1d90   :  { %6915 = vmatprep.subr.mxu0 %v7542_v0 }
0x1d91   :  { %6916 = vmatpush3.msra.mxu0 %v8370_v16 }
0x1d92   :  { %6917 = vmatprep.subr.mxu0 %v7542_v0 }
0x1d93   :  { %6918 = vmatpush3.msra.mxu0 %v8385_v19 }
0x1d94   :  { %6933 = vmatprep.subr.mxu0 %v7542_v0 }
0x1e28   :  { %v4087_v1 = vpop.f32.mrf.mxu1 }
0x1e29   :  { %v4088_v59 = vadd.f32 %v8390_v25, %v4087_v1 }
0x1e2a   :  { %v6888_v3 = vpop.f32.mrf.mxu1 }
0x1e2b   :  { %4099 = vrot.lane.b32.xlu1 %v4088_v59, %s7544_s27 }
0x1e44   :  { %v4012_v4 = vpop.f32.mrf.mxu0 }
0x1e45   :  { %v4013_v21 = vadd.f32 %v8396_v34, %v4012_v4 }
0x1e46   :  { %v6877_v5 = vpop.f32.mrf.mxu0 }
0x1e47   :  { %v4091_v38 = vadd.f32 %v4088_v59, %v4013_v21 }
0x1e49   :  { %v6114_v27 = vmul.f32 -1.442695, %v4091_v38 }
0x1e4b   :  { %7240 = vpow2.f32 %v6114_v27 }
0x1e4c   :  { %v4183_v62 = vpop.f32.mrf.mxu0 }
0x1e4d   :  { %v4184_v6 = vadd.f32 %v8294_v35, %v4183_v62 }
0x1e4e   :  { %v6899_v7 = vpop.f32.mrf.mxu0 }
0x1e4f   :  { %v4188_v20 = vrot.slane %v4184_v6, 4 }
0x1e51   :  { %4197 = vrot.lane.b32.xlu0 %v4188_v20, %s7544_s27  ;;  %v4190_v31 = vadd.f32 %v4188_v20, %v8456_v36 }
0x1e53   :  { %v6116_v26 = vmul.f32 -1.442695, %v4190_v31 }
0x1e58   :  { %v7241_v28 = vpop.eup %7240 }
0x1e59   :  { %v4095_v32 = vadd.f32 1.0, %v7241_v28 }
0x1e5b   :  { %7242 = vrcp.f32 %v4095_v32 }
0x1e5c   :  { %7244 = vpow2.f32 %v6116_v26 }
0x1e68   :  { %v7243_v42 = vpop.eup %7242 }
0x1e69   :  { %v7245_v30 = vpop.eup %7244  ;;  %v4109_v46 = vsub.f32 1.0, %v7243_v42  ;;  %v4115_v49 = vmul.f32 %v7243_v42, %v8520_v61 }
0x1e6a   :  { %v4194_v33 = vadd.f32 1.0, %v7245_v30 }
0x1e6c   :  { %7246 = vrcp.f32 %v4194_v33 }
0x1e79   :  { %v7247_v40 = vpop.eup %7246 }
0x1e7a   :  { %v4207_v52 = vsub.f32 1.0, %v7247_v40  ;;  %v4215_v56 = vmul.f32 %v7247_v40, %v4213_v51 }
0x1e9d   :  { %v4100_v37 = vpop.permute.xlu1 %4099 }
0x1e9e   :  { %v4102_v29 = vmul.f32 %v7243_v42, %v4100_v37 }
0x1ea0   :  { %4104 = vrot.lane.b32.xlu1 %v4102_v29, %s7544_s27 }
0x1ec3   :  { %v4198_v23 = vpop.permute.xlu0 %4197 }
0x1ec4   :  { %v4200_v24 = vmul.f32 %v7247_v40, %v4198_v23 }
0x1ec6   :  { %4202 = vrot.lane.b32.xlu0 %v4200_v24, %s7544_s27 }
0x1f12   :  { %v4105_v43 = vpop.permute.xlu1 %4104 }
0x1f13   :  { %v4107_v41 = vadd.f32 %v4105_v43, %v4013_v21 }
0x1f15   :  { %7248 = vtanh.f32 %v4107_v41 }
0x1f22   :  { %v7249_v44 = vpop.eup %7248 }
0x1f23   :  { %4111 = vrot.lane.b32.xlu1 %v7249_v44, %s7545_s25 }
0x1f38   :  { %v4203_v45 = vpop.permute.xlu0 %4202 }
0x1f39   :  { %v4205_v53 = vadd.f32 %v4203_v45, %v8456_v36 }
0x1f3b   :  { %7250 = vtanh.f32 %v4205_v53 }
0x1f48   :  { %v7251_v47 = vpop.eup %7250 }
0x1f49   :  { %4209 = vrot.lane.b32.xlu0 %v7251_v47, %s7545_s25 }
0x1f95   :  { %v4112_v48 = vpop.permute.xlu1 %4111 }
0x1f96   :  { %v4114_v55 = vmul.f32 %v4112_v48, %v4109_v46 }
0x1f98   :  { %v8574_v50 = vadd.f32 %v4115_v49, %v4114_v55 }
0x1f9a   :  { %4294 = vrot.lane.b32.xlu1 %v8574_v50, %s7545_s25 }
0x1fbb   :  { %v4210_v54 = vpop.permute.xlu0 %4209 }
0x1fbc   :  { %v4212_v58 = vmul.f32 %v4210_v54, %v4207_v52  ;;  %v8670_v52 = vld [vmem:[%s8983_s8 + $0x8] sm:$0xff]  ;;  %v8677_v54 = vld [vmem:[%s8983_s8] sm:$0xff] }
0x1fbe   :  { %v8579_v60 = vadd.f32 %v4215_v56, %v4212_v58 }
0x1fc0   :  { %v4218_v63 = vrot.slane %v8579_v60, 4  ;;  %v4490_v53 = vrot.slane %v8579_v60, 6 }
0x1fc2   :  { %4219 = vrot.lane.b32.xlu0 %v4218_v63, %s7545_s25 }
0x200c   :  { %v4295_v2 = vpop.permute.xlu1 %4294 }
0x200d   :  { %6920 = vmatmul.mubr.msk.f32.vlgmr.msra.gmra.mxu0 %vm1349_vm0, %v4295_v2 }
0x200e   :  { %6934 = vmatpush3.msra.mxu0 %v8329_v8  ;;  %6941 = vmatprep.mubr.msk.f32.mxu0 %vm7543_vm13, %v7542_v0 }
0x200f   :  { %6935 = vmatprep.subr.mxu0 %v7542_v0 }
0x2010   :  { %6936 = vmatpush3.msra.mxu0 %v8338_v9 }
0x2011   :  { %6937 = vmatprep.subr.mxu0 %v7542_v0 }
0x2012   :  { %6938 = vmatpush3.msra.mxu0 %v8362_v15 }
0x2013   :  { %6939 = vmatprep.subr.mxu0 %v7542_v0 }
0x2014   :  { %6940 = vmatpush3.msra.mxu0 %v8376_v18 }
0x2015   :  { %6955 = vmatprep.subr.mxu0 %v7542_v0 }
0x2034   :  { %v4220_v61 = vpop.permute.xlu0 %4219 }
0x2035   :  { %6909 = vmatmul.mubr.msk.f32.vlgmr.msra.gmra.mxu1 %vm1349_vm0, %v4220_v61 }
0x2036   :  { %6923 = vmatpush3.msra.mxu1 %v8245_v22  ;;  %6930 = vmatprep.mubr.msk.f32.mxu1 %vm7543_vm13, %v7542_v0 }
0x2037   :  { %6924 = vmatprep.subr.mxu1 %v7542_v0 }
0x2038   :  { %6925 = vmatpush3.msra.mxu1 %v8254_v11 }
0x2039   :  { %6926 = vmatprep.subr.mxu1 %v7542_v0 }
0x203a   :  { %6927 = vmatpush3.msra.mxu1 %v8262_v14 }
0x203b   :  { %6928 = vmatprep.subr.mxu1 %v7542_v0 }
0x203c   :  { %6929 = vmatpush3.msra.mxu1 %v8271_v39 }
0x203d   :  { %6931 = vmatmul.mubr.msk.f32.vlgmr.msra.gmra.mxu1 %vm1349_vm0, %v4220_v61  ;;  %6944 = vmatprep.subr.mxu1 %v7542_v0 }
0x203e   :  { %6945 = vmatpush3.msra.mxu1 %v8346_v10  ;;  %6952 = vmatprep.mubr.msk.f32.mxu1 %vm7543_vm13, %v7542_v0 }
0x203f   :  { %6946 = vmatprep.subr.mxu1 %v7542_v0 }
0x2040   :  { %6947 = vmatpush3.msra.mxu1 %v8356_v13 }
0x2041   :  { %6948 = vmatprep.subr.mxu1 %v7542_v0 }
0x2042   :  { %6949 = vmatpush3.msra.mxu1 %v8370_v16 }
0x2043   :  { %6950 = vmatprep.subr.mxu1 %v7542_v0 }
0x2044   :  { %6951 = vmatpush3.msra.mxu1 %v8385_v19 }
0x2045   :  { %6966 = vmatprep.subr.mxu1 %v7542_v0 }
0x20cd   :  { %v4364_v22 = vpop.f32.mrf.mxu0 }
0x20ce   :  { %v4365_v11 = vadd.f32 %v8390_v25, %v4364_v22 }
0x20cf   :  { %v6921_v14 = vpop.f32.mrf.mxu0 }
0x20d0   :  { %4376 = vrot.lane.b32.xlu1 %v4365_v11, %s7544_s27 }
0x20f5   :  { %v4289_v39 = vpop.f32.mrf.mxu1 }
0x20f6   :  { %v4290_v4 = vadd.f32 %v8396_v34, %v4289_v39 }
0x20f7   :  { %v6910_v12 = vpop.f32.mrf.mxu1 }
0x20f8   :  { %v4368_v5 = vadd.f32 %v4365_v11, %v4290_v4 }
0x20fa   :  { %v6119_v62 = vmul.f32 -1.442695, %v4368_v5 }
0x20fc   :  { %7252 = vpow2.f32 %v6119_v62 }
0x20fd   :  { %v4460_v57 = vpop.f32.mrf.mxu1 }
0x20fe   :  { %v4461_v1 = vadd.f32 %v8294_v35, %v4460_v57 }
0x20ff   :  { %v6932_v59 = vpop.f32.mrf.mxu1 }
0x2100   :  { %v4465_v3 = vrot.slane %v4461_v1, 2 }
0x2102   :  { %4474 = vrot.lane.b32.xlu0 %v4465_v3, %s7544_s27  ;;  %v4467_v27 = vadd.f32 %v4465_v3, %v8456_v36 }
0x2104   :  { %v6121_v35 = vmul.f32 -1.442695, %v4467_v27 }
0x2109   :  { %v7253_v6 = vpop.eup %7252 }
0x210a   :  { %v4372_v7 = vadd.f32 1.0, %v7253_v6 }
0x210c   :  { %7254 = vrcp.f32 %v4372_v7 }
0x210d   :  { %7256 = vpow2.f32 %v6121_v35 }
0x2119   :  { %v7255_v20 = vpop.eup %7254 }
0x211a   :  { %v7257_v28 = vpop.eup %7256  ;;  %v4386_v24 = vsub.f32 1.0, %v7255_v20  ;;  %v4392_v41 = vmul.f32 %v7255_v20, %v8574_v50 }
0x211b   :  { %v4471_v32 = vadd.f32 1.0, %v7257_v28 }
0x211d   :  { %7258 = vrcp.f32 %v4471_v32 }
0x212a   :  { %v7259_v31 = vpop.eup %7258 }
0x212b   :  { %v4484_v47 = vsub.f32 1.0, %v7259_v31  ;;  %v4492_v48 = vmul.f32 %v7259_v31, %v4490_v53  ;;  %v8779_v53 = vld [vmem:[#allocation15] ss:$0 sm:$0xff] }
0x2142   :  { %v4377_v21 = vpop.permute.xlu1 %4376 }
0x2143   :  { %v4379_v38 = vmul.f32 %v7255_v20, %v4377_v21 }
0x2145   :  { %4381 = vrot.lane.b32.xlu1 %v4379_v38, %s7544_s27 }
0x2174   :  { %v4475_v42 = vpop.permute.xlu0 %4474 }
0x2175   :  { %v4477_v37 = vmul.f32 %v7259_v31, %v4475_v42 }
0x2177   :  { %4479 = vrot.lane.b32.xlu0 %v4477_v37, %s7544_s27 }
0x21b7   :  { %v4382_v26 = vpop.permute.xlu1 %4381 }
0x21b8   :  { %v4384_v29 = vadd.f32 %v4382_v26, %v4290_v4 }
0x21ba   :  { %7260 = vtanh.f32 %v4384_v29 }
0x21c7   :  { %v7261_v30 = vpop.eup %7260 }
0x21c8   :  { %4388 = vrot.lane.b32.xlu1 %v7261_v30, %s7545_s25 }
0x21e9   :  { %v4480_v33 = vpop.permute.xlu0 %4479 }
0x21ea   :  { %v4482_v40 = vadd.f32 %v4480_v33, %v8456_v36 }
0x21ec   :  { %7262 = vtanh.f32 %v4482_v40 }
0x21f9   :  { %v7263_v23 = vpop.eup %7262 }
0x21fa   :  { %4486 = vrot.lane.b32.xlu0 %v7263_v23, %s7545_s25  ;;  %v8720_v23 = vld [vmem:[%s8986_s11 + $0x18] sm:$0xff] }
0x223a   :  { %v4389_v43 = vpop.permute.xlu1 %4388 }
0x223b   :  { %v4391_v44 = vmul.f32 %v4389_v43, %v4386_v24  ;;  %v8729_v24 = vld [vmem:[%s8986_s11 + $0x10] sm:$0xff] }
0x223d   :  { %v8628_v45 = vadd.f32 %v4392_v41, %v4391_v44  ;;  %v8768_v41 = vld [vmem:[%s8987_s12 + $0x8] sm:$0xff]  ;;  %v8775_v44 = vld [vmem:[%s8987_s12] sm:$0xff] }
0x223f   :  { %4571 = vrot.lane.b32.xlu1 %v8628_v45, %s7545_s25 }
0x226c   :  { %v4487_v46 = vpop.permute.xlu0 %4486 }
0x226d   :  { %v4489_v36 = vmul.f32 %v4487_v46, %v4484_v47 }
0x226f   :  { %v8633_v49 = vadd.f32 %v4492_v48, %v4489_v36 }
0x2271   :  { %v4495_v55 = vrot.slane %v8633_v49, 6 }
0x2273   :  { %4496 = vrot.lane.b32.xlu0 %v4495_v55, %s7545_s25 }
0x22b1   :  { %v4572_v50 = vpop.permute.xlu1 %4571 }
0x22b2   :  { %6953 = vmatmul.mubr.msk.f32.vlgmr.msra.gmra.mxu1 %vm1349_vm0, %v4572_v50 }
0x22b3   :  { %6967 = vmatpush3.msra.mxu1 %v8329_v8  ;;  %6974 = vmatprep.mubr.msk.f32.mxu1 %vm7543_vm13, %v7542_v0  ;;  %v8654_v8 = vld [vmem:[%s8983_s8 + $0x18] sm:$0xff] }
0x22b4   :  { %6968 = vmatprep.subr.mxu1 %v7542_v0 }
0x22b5   :  { %6969 = vmatpush3.msra.mxu1 %v8338_v9  ;;  %v8663_v9 = vld [vmem:[%s8983_s8 + $0x10] sm:$0xff] }
0x22b6   :  { %6970 = vmatprep.subr.mxu1 %v7542_v0 }
0x22b7   :  { %6971 = vmatpush3.msra.mxu1 %v8362_v15 }
0x22b8   :  { %6972 = vmatprep.subr.mxu1 %v7542_v0 }
0x22b9   :  { %6973 = vmatpush3.msra.mxu1 %v8376_v18 }
0x22ba   :  { %6988 = vmatprep.subr.mxu1 %v7542_v0 }
0x22e5   :  { %v4497_v51 = vpop.permute.xlu0 %4496 }
0x22e6   :  { %6942 = vmatmul.mubr.msk.f32.vlgmr.msra.gmra.mxu0 %vm1349_vm0, %v4497_v51 }
0x22e7   :  { %6956 = vmatpush3.msra.mxu0 %v8654_v8  ;;  %6963 = vmatprep.mubr.msk.f32.mxu0 %vm7543_vm13, %v7542_v0 }
0x22e8   :  { %6957 = vmatprep.subr.mxu0 %v7542_v0 }
0x22e9   :  { %6958 = vmatpush3.msra.mxu0 %v8663_v9 }
0x22ea   :  { %6959 = vmatprep.subr.mxu0 %v7542_v0 }
0x22eb   :  { %6960 = vmatpush3.msra.mxu0 %v8670_v52 }
0x22ec   :  { %6961 = vmatprep.subr.mxu0 %v7542_v0 }
0x22ed   :  { %6962 = vmatpush3.msra.mxu0 %v8677_v54 }
0x22ee   :  { %6964 = vmatmul.mubr.msk.f32.vlgmr.msra.gmra.mxu0 %vm1349_vm0, %v4497_v51  ;;  %6977 = vmatprep.subr.mxu0 %v7542_v0 }
0x22ef   :  { %6978 = vmatpush3.msra.mxu0 %v8346_v10  ;;  %6985 = vmatprep.mubr.msk.f32.mxu0 %vm7543_vm13, %v7542_v0 }
0x22f0   :  { %6979 = vmatprep.subr.mxu0 %v7542_v0 }
0x22f1   :  { %6980 = vmatpush3.msra.mxu0 %v8356_v13  ;;  %v8694_v13 = vld [vmem:[#allocation12] ss:$0 sm:$0xff] }
0x22f2   :  { %6981 = vmatprep.subr.mxu0 %v7542_v0 }
0x22f3   :  { %6982 = vmatpush3.msra.mxu0 %v8370_v16 }
0x22f4   :  { %6983 = vmatprep.subr.mxu0 %v7542_v0 }
0x22f5   :  { %6984 = vmatpush3.msra.mxu0 %v8385_v19 }
0x22f6   :  { %6999 = vmatprep.subr.mxu0 %v7542_v0 }
0x2372   :  { %v4641_v56 = vpop.f32.mrf.mxu1 }
0x2373   :  { %v4642_v10 = vadd.f32 %v8390_v25, %v4641_v56  ;;  %v8784_v56 = vld [vmem:[#allocation13] ss:$0 sm:$0xff] }
0x2374   :  { %v6954_v58 = vpop.f32.mrf.mxu1 }
0x2375   :  { %4653 = vrot.lane.b32.xlu1 %v4642_v10, %s7544_s27 }
0x23a6   :  { %v4566_v60 = vpop.f32.mrf.mxu0 }
0x23a7   :  { %v4567_v19 = vadd.f32 %v8396_v34, %v4566_v60 }
0x23a8   :  { %v6943_v63 = vpop.f32.mrf.mxu0 }
0x23a9   :  { %v4645_v22 = vadd.f32 %v4642_v10, %v4567_v19 }
0x23ab   :  { %v6124_v11 = vmul.f32 -1.442695, %v4645_v22 }
0x23ad   :  { %7264 = vpow2.f32 %v6124_v11 }
0x23ae   :  { %v4737_v2 = vpop.f32.mrf.mxu0 }
0x23af   :  { %v4738_v61 = vadd.f32 %v8694_v13, %v4737_v2 }
0x23b0   :  { %v6965_v16 = vpop.f32.mrf.mxu0 }
0x23b1   :  { %4749 = vrot.lane.b32.xlu0 %v4738_v61, %s7544_s27  ;;  %v4741_v1 = vadd.f32 %v4738_v61, %v7898_v17 }
0x23b3   :  { %v6126_v59 = vmul.f32 -1.442695, %v4741_v1 }
0x23ba   :  { %v7265_v14 = vpop.eup %7264 }
0x23bb   :  { %v4649_v25 = vadd.f32 1.0, %v7265_v14 }
0x23bd   :  { %7266 = vrcp.f32 %v4649_v25 }
0x23be   :  { %7268 = vpow2.f32 %v6126_v59 }
0x23ca   :  { %v7267_v39 = vpop.eup %7266 }
0x23cb   :  { %v7269_v3 = vpop.eup %7268  ;;  %v4663_v35 = vsub.f32 1.0, %v7267_v39  ;;  %v4669_v32 = vmul.f32 %v7267_v39, %v8628_v45 }
0x23cc   :  { %v4745_v4 = vadd.f32 1.0, %v7269_v3 }
0x23ce   :  { %7270 = vrcp.f32 %v4745_v4 }
0x23db   :  { %v7271_v5 = vpop.eup %7270 }
0x23dc   :  { %v4759_v37 = vsub.f32 1.0, %v7271_v5  ;;  %v4766_v29 = vmul.f32 %v7271_v5, %v4495_v55 }
0x23e7   :  { %v4654_v12 = vpop.permute.xlu1 %4653 }
0x23e8   :  { %v4656_v57 = vmul.f32 %v7267_v39, %v4654_v12 }
0x23ea   :  { %4658 = vrot.lane.b32.xlu1 %v4656_v57, %s7544_s27 }
0x2423   :  { %v4750_v34 = vpop.permute.xlu0 %4749 }
0x2424   :  { %v4752_v62 = vmul.f32 %v7271_v5, %v4750_v34 }
0x2426   :  { %4754 = vrot.lane.b32.xlu0 %v4752_v62, %s7544_s27 }
0x245c   :  { %v4659_v6 = vpop.permute.xlu1 %4658 }
0x245d   :  { %v4661_v7 = vadd.f32 %v4659_v6, %v4567_v19 }
0x245f   :  { %7272 = vtanh.f32 %v4661_v7 }
0x246c   :  { %v7273_v20 = vpop.eup %7272 }
0x246d   :  { %4665 = vrot.lane.b32.xlu1 %v7273_v20, %s7545_s25 }
0x2498   :  { %v4755_v21 = vpop.permute.xlu0 %4754 }
0x2499   :  { %v4757_v38 = vadd.f32 %v4755_v21, %v7898_v17 }
0x249b   :  { %7274 = vtanh.f32 %v4757_v38 }
0x24a8   :  { %v7275_v27 = vpop.eup %7274 }
0x24a9   :  { %4761 = vrot.lane.b32.xlu0 %v7275_v27, %s7545_s25 }
0x24df   :  { %v4666_v28 = vpop.permute.xlu1 %4665 }
0x24e0   :  { %v4668_v31 = vmul.f32 %v4666_v28, %v4663_v35 }
0x24e2   :  { %v8706_v42 = vadd.f32 %v4669_v32, %v4668_v31 }
0x24e4   :  { %4844 = vrot.lane.b32.xlu1 %v8706_v42, %s7545_s25 }
0x251b   :  { %v4762_v26 = vpop.permute.xlu0 %4761 }
0x251c   :  { %v4764_v30 = vmul.f32 %v4762_v26, %v4759_v37 }
0x251e   :  { %v8712_v33 = vadd.f32 %v4766_v29, %v4764_v30  ;;  %v8821_v29 = vld [vmem:[%s8986_s11] sm:$0xff] }
0x2520   :  { %4769 = vrot.lane.b32.xlu0 %v8712_v33, %s7545_s25  ;;  %v5040_v38 = vrot.slane %v8712_v33, 6 }
0x2556   :  { %v4845_v40 = vpop.permute.xlu1 %4844 }
0x2557   :  { %6986 = vmatmul.mubr.msk.f32.vlgmr.msra.gmra.mxu0 %vm1349_vm0, %v4845_v40 }
0x2558   :  { %7000 = vmatpush3.msra.mxu0 %v8720_v23  ;;  %7007 = vmatprep.mubr.msk.f32.mxu0 %vm7543_vm13, %v7542_v0 }
0x2559   :  { %7001 = vmatprep.subr.mxu0 %v7542_v0 }
0x255a   :  { %7002 = vmatpush3.msra.mxu0 %v8729_v24 }
0x255b   :  { %7003 = vmatprep.subr.mxu0 %v7542_v0 }
0x255c   :  { %7004 = vmatpush3.msra.mxu0 %v8362_v15  ;;  %v8752_v15 = vld [vmem:[%s8987_s12 + $0x18] sm:$0xff] }
0x255d   :  { %7005 = vmatprep.subr.mxu0 %v7542_v0 }
0x255e   :  { %7006 = vmatpush3.msra.mxu0 %v8376_v18  ;;  %v8761_v18 = vld [vmem:[%s8987_s12 + $0x10] sm:$0xff]  ;;  %s5980_s12 = sshll.u32 %s7546_s29, 4  ;;  %s5981_s12 = int_to_ptr.vmem [resolvable:$true] %s5980_s12 }
0x255f   :  { %7021 = vmatprep.subr.mxu0 %v7542_v0  ;;  %p7498_p8 = scmp.lt.s32.totalorder %s5981_s12, %s5981_s12 }
0x2592   :  { %v4770_v43 = vpop.permute.xlu0 %4769 }
0x2593   :  { %6975 = vmatmul.mubr.msk.f32.vlgmr.msra.gmra.mxu1 %vm1349_vm0, %v4770_v43 }
0x2594   :  { %6989 = vmatpush3.msra.mxu1 %v8654_v8  ;;  %6996 = vmatprep.mubr.msk.f32.mxu1 %vm7543_vm13, %v7542_v0 }
0x2595   :  { %6990 = vmatprep.subr.mxu1 %v7542_v0 }
0x2596   :  { %6991 = vmatpush3.msra.mxu1 %v8663_v9 }
0x2597   :  { %6992 = vmatprep.subr.mxu1 %v7542_v0 }
0x2598   :  { %6993 = vmatpush3.msra.mxu1 %v8670_v52 }
0x2599   :  { %6994 = vmatprep.subr.mxu1 %v7542_v0 }
0x259a   :  { %6995 = vmatpush3.msra.mxu1 %v8677_v54 }
0x259b   :  { %6997 = vmatmul.mubr.msk.f32.vlgmr.msra.gmra.mxu1 %vm1349_vm0, %v4770_v43  ;;  %7010 = vmatprep.subr.mxu1 %v7542_v0 }
0x259c   :  { %7011 = vmatpush3.msra.mxu1 %v8752_v15  ;;  %7018 = vmatprep.mubr.msk.f32.mxu1 %vm7543_vm13, %v7542_v0 }
0x259d   :  { %7012 = vmatprep.subr.mxu1 %v7542_v0 }
0x259e   :  { %7013 = vmatpush3.msra.mxu1 %v8761_v18 }
0x259f   :  { %7014 = vmatprep.subr.mxu1 %v7542_v0 }
0x25a0   :  { %7015 = vmatpush3.msra.mxu1 %v8768_v41 }
0x25a1   :  { %7016 = vmatprep.subr.mxu1 %v7542_v0 }
0x25a2   :  { %7017 = vmatpush3.msra.mxu1 %v8775_v44 }
0x25a3   :  { %7032 = vmatprep.subr.mxu1 %v7542_v0 }
0x2617   :  { %v4914_v45 = vpop.f32.mrf.mxu0 }
0x2618   :  { %v4915_v47 = vadd.f32 %v8779_v53, %v4914_v45 }
0x2619   :  { %v6987_v46 = vpop.f32.mrf.mxu0 }
0x261a   :  { %4926 = vrot.lane.b32.xlu0 %v4915_v47, %s7544_s27 }
0x2653   :  { %v4839_v48 = vpop.f32.mrf.mxu1 }
0x2654   :  { %v4840_v10 = vadd.f32 %v8784_v56, %v4839_v48 }
0x2655   :  { %v6976_v36 = vpop.f32.mrf.mxu1 }
0x2656   :  { %v4918_v58 = vadd.f32 %v4915_v47, %v4840_v10 }
0x2658   :  { %v6129_v60 = vmul.f32 -1.442695, %v4918_v58 }
0x265a   :  { %7276 = vpow2.f32 %v6129_v60 }
0x265b   :  { %v5010_v49 = vpop.f32.mrf.mxu1 }
0x265c   :  { %v5011_v55 = vadd.f32 %v8694_v13, %v5010_v49 }
0x265d   :  { %v6998_v50 = vpop.f32.mrf.mxu1 }
0x265e   :  { %v5015_v51 = vrot.slane %v5011_v55, 6 }
0x2660   :  { %5024 = vrot.lane.b32.xlu1 %v5015_v51, %s7544_s27  ;;  %v5017_v22 = vadd.f32 %v5015_v51, %v7898_v17 }
0x2662   :  { %v6131_v11 = vmul.f32 -1.442695, %v5017_v22 }
0x2667   :  { %v7277_v63 = vpop.eup %7276 }
0x2668   :  { %v4922_v2 = vadd.f32 1.0, %v7277_v63 }
0x266a   :  { %7278 = vrcp.f32 %v4922_v2 }
0x266b   :  { %7280 = vpow2.f32 %v6131_v11 }
0x2677   :  { %v7279_v61 = vpop.eup %7278 }
0x2678   :  { %v7281_v14 = vpop.eup %7280  ;;  %v4936_v62 = vsub.f32 1.0, %v7279_v61  ;;  %v4942_v7 = vmul.f32 %v7279_v61, %v8706_v42  ;;  %v8814_v42 = vld [vmem:[%s8986_s11 + $0x8] sm:$0xff] }
0x2679   :  { %v5021_v25 = vadd.f32 1.0, %v7281_v14 }
0x267b   :  { %7282 = vrcp.f32 %v5021_v25 }
0x2688   :  { %v7283_v39 = vpop.eup %7282 }
0x2689   :  { %v5034_v27 = vsub.f32 1.0, %v7283_v39  ;;  %v5042_v32 = vmul.f32 %v7283_v39, %v5040_v38 }
0x268c   :  { %v4927_v16 = vpop.permute.xlu0 %4926 }
0x268d   :  { %v4929_v19 = vmul.f32 %v7279_v61, %v4927_v16 }
0x268f   :  { %4931 = vrot.lane.b32.xlu0 %v4929_v19, %s7544_s27 }
0x26d2   :  { %v5025_v12 = vpop.permute.xlu1 %5024 }
0x26d3   :  { %v5027_v57 = vmul.f32 %v7283_v39, %v5025_v12 }
0x26d5   :  { %5029 = vrot.lane.b32.xlu1 %v5027_v57, %s7544_s27 }
0x2701   :  { %v4932_v1 = vpop.permute.xlu0 %4931 }
0x2702   :  { %v4934_v59 = vadd.f32 %v4932_v1, %v4840_v10 }
0x2704   :  { %7284 = vtanh.f32 %v4934_v59 }
0x2711   :  { %v7285_v3 = vpop.eup %7284 }
0x2712   :  { %4938 = vrot.lane.b32.xlu0 %v7285_v3, %s7545_s25 }
0x2747   :  { %v5030_v4 = vpop.permute.xlu1 %5029 }
0x2748   :  { %v5032_v5 = vadd.f32 %v5030_v4, %v7898_v17 }
0x274a   :  { %7286 = vtanh.f32 %v5032_v5 }
0x2757   :  { %v7287_v34 = vpop.eup %7286 }
0x2758   :  { %5036 = vrot.lane.b32.xlu1 %v7287_v34, %s7545_s25 }
0x2784   :  { %v4939_v6 = vpop.permute.xlu0 %4938 }
0x2785   :  { %v4941_v20 = vmul.f32 %v4939_v6, %v4936_v62 }
0x2787   :  { %v8795_v21 = vadd.f32 %v4942_v7, %v4941_v20 }
0x2789   :  { %5121 = vrot.lane.b32.xlu0 %v8795_v21, %s7545_s25 }
0x27ca   :  { %v5037_v35 = vpop.permute.xlu1 %5036 }
0x27cb   :  { %v5039_v28 = vmul.f32 %v5037_v35, %v5034_v27 }
0x27cd   :  { %v8800_v31 = vadd.f32 %v5042_v32, %v5039_v28 }
0x27cf   :  { %v5045_v37 = vrot.slane %v8800_v31, 2  ;;  %v5317_v7 = vrot.slane %v8800_v31, 6 }
0x27d1   :  { %5046 = vrot.lane.b32.xlu1 %v5045_v37, %s7545_s25 }
0x27fb   :  { %v5122_v26 = vpop.permute.xlu0 %5121 }
0x27fc   :  { %7019 = vmatmul.mubr.msk.f32.vlgmr.msra.gmra.mxu1 %vm1349_vm0, %v5122_v26 }
0x27fd   :  { %7033 = vmatpush3.msra.mxu1 %v8720_v23  ;;  %7040 = vmatprep.mubr.msk.f32.mxu1 %vm7543_vm13, %v7542_v0 }
0x27fe   :  { %7034 = vmatprep.subr.mxu1 %v7542_v0 }
0x27ff   :  { %7035 = vmatpush3.msra.mxu1 %v8729_v24 }
0x2800   :  { %7036 = vmatprep.subr.mxu1 %v7542_v0 }
0x2801   :  { %7037 = vmatpush3.msra.mxu1 %v8814_v42 }
0x2802   :  { %7038 = vmatprep.subr.mxu1 %v7542_v0 }
0x2803   :  { %7039 = vmatpush3.msra.mxu1 %v8821_v29 }
0x2804   :  { %7054 = vmatprep.subr.mxu1 %v7542_v0 }
0x2843   :  { %v5047_v30 = vpop.permute.xlu1 %5046 }
0x2844   :  { %7008 = vmatmul.mubr.msk.f32.vlgmr.msra.gmra.mxu0 %vm1349_vm0, %v5047_v30 }
0x2845   :  { %7022 = vmatpush3.msra.mxu0 %v8654_v8  ;;  %7029 = vmatprep.mubr.msk.f32.mxu0 %vm7543_vm13, %v7542_v0 }
0x2846   :  { %7023 = vmatprep.subr.mxu0 %v7542_v0 }
0x2847   :  { %7024 = vmatpush3.msra.mxu0 %v8663_v9 }
0x2848   :  { %7025 = vmatprep.subr.mxu0 %v7542_v0 }
0x2849   :  { %7026 = vmatpush3.msra.mxu0 %v8670_v52 }
0x284a   :  { %7027 = vmatprep.subr.mxu0 %v7542_v0 }
0x284b   :  { %7028 = vmatpush3.msra.mxu0 %v8677_v54 }
0x284c   :  { %7030 = vmatmul.mubr.msk.f32.vlgmr.msra.gmra.mxu0 %vm1349_vm0, %v5047_v30  ;;  %7043 = vmatprep.subr.mxu0 %v7542_v0 }
0x284d   :  { %7044 = vmatpush3.msra.mxu0 %v8752_v15  ;;  %7051 = vmatprep.mubr.msk.f32.mxu0 %vm7543_vm13, %v7542_v0 }
0x284e   :  { %7045 = vmatprep.subr.mxu0 %v7542_v0 }
0x284f   :  { %7046 = vmatpush3.msra.mxu0 %v8761_v18 }
0x2850   :  { %7047 = vmatprep.subr.mxu0 %v7542_v0 }
0x2851   :  { %7048 = vmatpush3.msra.mxu0 %v8768_v41 }
0x2852   :  { %7049 = vmatprep.subr.mxu0 %v7542_v0 }
0x2853   :  { %7050 = vmatpush3.msra.mxu0 %v8775_v44 }
0x2854   :  { %7065 = vmatprep.subr.mxu0 %v7542_v0 }
0x28bc   :  { %v5191_v33 = vpop.f32.mrf.mxu1 }
0x28bd   :  { %v5192_v40 = vadd.f32 %v8779_v53, %v5191_v33 }
0x28be   :  { %v7020_v43 = vpop.f32.mrf.mxu1 }
0x28bf   :  { %5203 = vrot.lane.b32.xlu0 %v5192_v40, %s7544_s27 }
0x2904   :  { %v5116_v45 = vpop.f32.mrf.mxu0 }
0x2905   :  { %v5117_v47 = vadd.f32 %v8784_v56, %v5116_v45 }
0x2906   :  { %v7009_v46 = vpop.f32.mrf.mxu0 }
0x2907   :  { %v5195_v48 = vadd.f32 %v5192_v40, %v5117_v47 }
0x2909   :  { %v6134_v36 = vmul.f32 -1.442695, %v5195_v48 }
0x290b   :  { %7288 = vpow2.f32 %v6134_v36 }
0x290c   :  { %v5287_v49 = vpop.f32.mrf.mxu0 }
0x290d   :  { %v5288_v55 = vadd.f32 %v8694_v13, %v5287_v49 }
0x290e   :  { %v7031_v50 = vpop.f32.mrf.mxu0 }
0x290f   :  { %v5292_v51 = vrot.slane %v5288_v55, 4 }
0x2911   :  { %5301 = vrot.lane.b32.xlu1 %v5292_v51, %s7544_s27  ;;  %v5294_v61 = vadd.f32 %v5292_v51, %v7898_v17 }
0x2913   :  { %v6136_v16 = vmul.f32 -1.442695, %v5294_v61 }
0x2918   :  { %v7289_v10 = vpop.eup %7288 }
0x2919   :  { %v5199_v58 = vadd.f32 1.0, %v7289_v10 }
0x291b   :  { %7290 = vrcp.f32 %v5199_v58 }
0x291c   :  { %7292 = vpow2.f32 %v6136_v16 }
0x2928   :  { %v7291_v60 = vpop.eup %7290 }
0x2929   :  { %v7293_v19 = vpop.eup %7292  ;;  %v5213_v4 = vsub.f32 1.0, %v7291_v60  ;;  %v5219_v34 = vmul.f32 %v7291_v60, %v8795_v21 }
0x292a   :  { %v5298_v22 = vadd.f32 1.0, %v7293_v19 }
0x292c   :  { %7294 = vrcp.f32 %v5298_v22 }
0x2931   :  { %v5204_v63 = vpop.permute.xlu0 %5203 }
0x2932   :  { %v5206_v2 = vmul.f32 %v7291_v60, %v5204_v63 }
0x2934   :  { %5208 = vrot.lane.b32.xlu0 %v5206_v2, %s7544_s27 }
0x2939   :  { %v7295_v11 = vpop.eup %7294 }
0x293a   :  { %v5311_v20 = vsub.f32 1.0, %v7295_v11  ;;  %v5319_v27 = vmul.f32 %v7295_v11, %v5317_v7 }
0x2983   :  { %v5302_v14 = vpop.permute.xlu1 %5301 }
0x2984   :  { %v5304_v25 = vmul.f32 %v7295_v11, %v5302_v14 }
0x2986   :  { %5306 = vrot.lane.b32.xlu1 %v5304_v25, %s7544_s27 }
0x29a6   :  { %v5209_v39 = vpop.permute.xlu0 %5208 }
0x29a7   :  { %v5211_v12 = vadd.f32 %v5209_v39, %v5117_v47 }
0x29a9   :  { %7296 = vtanh.f32 %v5211_v12 }
0x29b6   :  { %v7297_v57 = vpop.eup %7296 }
0x29b7   :  { %5215 = vrot.lane.b32.xlu0 %v7297_v57, %s7545_s25 }
0x29f8   :  { %v5307_v1 = vpop.permute.xlu1 %5306 }
0x29f9   :  { %v5309_v59 = vadd.f32 %v5307_v1, %v7898_v17 }
0x29fb   :  { %7298 = vtanh.f32 %v5309_v59 }
0x2a08   :  { %v7299_v3 = vpop.eup %7298 }
0x2a09   :  { %5313 = vrot.lane.b32.xlu1 %v7299_v3, %s7545_s25 }
0x2a29   :  { %v5216_v5 = vpop.permute.xlu0 %5215 }
0x2a2a   :  { %v5218_v62 = vmul.f32 %v5216_v5, %v5213_v4 }
0x2a2c   :  { %v8859_v6 = vadd.f32 %v5219_v34, %v5218_v62 }
0x2a2e   :  { %5398 = vrot.lane.b32.xlu0 %v8859_v6, %s7545_s25 }
0x2a7b   :  { %v5314_v38 = vpop.permute.xlu1 %5313 }
0x2a7c   :  { %v5316_v35 = vmul.f32 %v5314_v38, %v5311_v20 }
0x2a7e   :  { %v8864_v28 = vadd.f32 %v5319_v27, %v5316_v35 }
0x2a80   :  { %v5322_v32 = vrot.slane %v8864_v28, 4  ;;  %v5594_v19 = vrot.slane %v8864_v28, 6 }
0x2a82   :  { %5323 = vrot.lane.b32.xlu1 %v5322_v32, %s7545_s25  ;;  %v5778_v32 = vld [vmem:[%s8990_s15 + $0x18] sm:$0xff] }
0x2aa0   :  { %v5399_v37 = vpop.permute.xlu0 %5398 }
0x2aa1   :  { %7052 = vmatmul.mubr.msk.f32.vlgmr.msra.gmra.mxu0 %vm1349_vm0, %v5399_v37  ;;  %v5777_v37 = vld [vmem:[%s8990_s15 + $0x10] sm:$0xff] }
0x2aa2   :  { %7066 = vmatpush3.msra.mxu0 %v8720_v23  ;;  %7073 = vmatprep.mubr.msk.f32.mxu0 %vm7543_vm13, %v7542_v0 }
0x2aa3   :  { %7067 = vmatprep.subr.mxu0 %v7542_v0 }
0x2aa4   :  { %7068 = vmatpush3.msra.mxu0 %v8729_v24 }
0x2aa5   :  { %7069 = vmatprep.subr.mxu0 %v7542_v0 }
0x2aa6   :  { %7070 = vmatpush3.msra.mxu0 %v8814_v42 }
0x2aa7   :  { %7071 = vmatprep.subr.mxu0 %v7542_v0 }
0x2aa8   :  { %7072 = vmatpush3.msra.mxu0 %v8821_v29 }
0x2aa9   :  { %7087 = vmatprep.subr.mxu0 %v7542_v0 }
0x2af4   :  { %v5324_v21 = vpop.permute.xlu1 %5323 }
0x2af5   :  { %7041 = vmatmul.mubr.msk.f32.vlgmr.msra.gmra.mxu1 %vm1349_vm0, %v5324_v21 }
0x2af6   :  { %7055 = vmatpush3.msra.mxu1 %v8654_v8  ;;  %7062 = vmatprep.mubr.msk.f32.mxu1 %vm7543_vm13, %v7542_v0 }
0x2af7   :  { %7056 = vmatprep.subr.mxu1 %v7542_v0 }
0x2af8   :  { %7057 = vmatpush3.msra.mxu1 %v8663_v9 }
0x2af9   :  { %7058 = vmatprep.subr.mxu1 %v7542_v0 }
0x2afa   :  { %7059 = vmatpush3.msra.mxu1 %v8670_v52 }
0x2afb   :  { %7060 = vmatprep.subr.mxu1 %v7542_v0 }
0x2afc   :  { %7061 = vmatpush3.msra.mxu1 %v8677_v54 }
0x2afd   :  { %7063 = vmatmul.mubr.msk.f32.vlgmr.msra.gmra.mxu1 %vm1349_vm0, %v5324_v21  ;;  %7076 = vmatprep.subr.mxu1 %v7542_v0  ;;  %v5863_v21 = vld [vmem:[%s8992_s17 + $0x10] sm:$0xff] }
0x2afe   :  { %7077 = vmatpush3.msra.mxu1 %v8752_v15  ;;  %7084 = vmatprep.mubr.msk.f32.mxu1 %vm7543_vm13, %v7542_v0 }
0x2aff   :  { %7078 = vmatprep.subr.mxu1 %v7542_v0 }
0x2b00   :  { %7079 = vmatpush3.msra.mxu1 %v8761_v18 }
0x2b01   :  { %7080 = vmatprep.subr.mxu1 %v7542_v0 }
0x2b02   :  { %7081 = vmatpush3.msra.mxu1 %v8768_v41 }
0x2b03   :  { %7082 = vmatprep.subr.mxu1 %v7542_v0 }
0x2b04   :  { %7083 = vmatpush3.msra.mxu1 %v8775_v44 }
0x2b05   :  { %7098 = vmatprep.subr.mxu1 %v7542_v0 }
0x2b61   :  { %v5468_v8 = vpop.f32.mrf.mxu0 }
0x2b62   :  { %v5469_v9 = vadd.f32 %v8779_v53, %v5468_v8  ;;  %v5776_v8 = vld [vmem:[%s8990_s15 + $0x8] sm:$0xff] }
0x2b63   :  { %v7053_v52 = vpop.f32.mrf.mxu0 }
0x2b64   :  { %5480 = vrot.lane.b32.xlu0 %v5469_v9, %s7544_s27  ;;  %v5775_v52 = vld [vmem:[%s8990_s15] sm:$0xff] }
0x2bb5   :  { %v5393_v54 = vpop.f32.mrf.mxu1 }
0x2bb6   :  { %v5394_v23 = vadd.f32 %v8784_v56, %v5393_v54  ;;  %v5861_v54 = vld [vmem:[%s8992_s17] sm:$0xff] }
0x2bb7   :  { %v7042_v24 = vpop.f32.mrf.mxu1 }
0x2bb8   :  { %v5472_v15 = vadd.f32 %v5469_v9, %v5394_v23  ;;  %v5862_v9 = vld [vmem:[%s8992_s17 + $0x8] sm:$0xff] }
0x2bba   :  { %v6139_v18 = vmul.f32 -1.442695, %v5472_v15 }
0x2bbc   :  { %7300 = vpow2.f32 %v6139_v18 }
0x2bbd   :  { %v5564_v41 = vpop.f32.mrf.mxu1 }
0x2bbe   :  { %v5565_v31 = vadd.f32 %v8694_v13, %v5564_v41 }
0x2bbf   :  { %v7064_v26 = vpop.f32.mrf.mxu1 }
0x2bc0   :  { %v5569_v44 = vrot.slane %v5565_v31, 2 }
0x2bc2   :  { %5578 = vrot.lane.b32.xlu1 %v5569_v44, %s7544_s27  ;;  %v5571_v43 = vadd.f32 %v5569_v44, %v7898_v17 }
0x2bc4   :  { %v6141_v45 = vmul.f32 -1.442695, %v5571_v43 }
0x2bc9   :  { %v7301_v42 = vpop.eup %7300 }
0x2bca   :  { %v5476_v29 = vadd.f32 1.0, %v7301_v42 }
0x2bcc   :  { %7302 = vrcp.f32 %v5476_v29 }
0x2bcd   :  { %7304 = vpow2.f32 %v6141_v45 }
0x2bd6   :  { %v5481_v30 = vpop.permute.xlu0 %5480 }
0x2bd9   :  { %v7303_v33 = vpop.eup %7302 }
0x2bda   :  { %v5483_v40 = vmul.f32 %v7303_v33, %v5481_v30  ;;  %v7305_v47 = vpop.eup %7304  ;;  %v5490_v60 = vsub.f32 1.0, %v7303_v33  ;;  %v5496_v2 = vmul.f32 %v7303_v33, %v8859_v6 }
0x2bdb   :  { %v5575_v46 = vadd.f32 1.0, %v7305_v47 }
0x2bdc   :  { %5485 = vrot.lane.b32.xlu0 %v5483_v40, %s7544_s27 }
0x2bdd   :  { %7306 = vrcp.f32 %v5575_v46 }
0x2bea   :  { %v7307_v13 = vpop.eup %7306 }
0x2beb   :  { %v5588_v22 = vsub.f32 1.0, %v7307_v13  ;;  %v5596_v14 = vmul.f32 %v7307_v13, %v5594_v19 }
0x2c34   :  { %v5579_v48 = vpop.permute.xlu1 %5578 }
0x2c35   :  { %v5581_v36 = vmul.f32 %v7307_v13, %v5579_v48  ;;  %v6145_v13 = vld [vmem:[%s8991_s16] ss:$0 sm:$0xff]  ;;  %s7493_s16 = scalar_lea.vmem %s5981_s12, 32 }
0x2c36   :  { %p7494_p7 = scmp.ne.s32.totalorder %s5981_s12, %s7493_s16  ;;  %p7499_p9 = scmp.lt.s32.totalorder %s7493_s16, %s7493_s16 }
0x2c37   :  { %5583 = vrot.lane.b32.xlu1 %v5581_v36, %s7544_s27 }
0x2c38   :  { %p7500_p10 = por %p7499_p9, %p7498_p8 }
0x2c3a   :  { %p7501_p11 = pnand %p7500_p10, %p7494_p7 }
0x2c4e   :  { %v5486_v49 = vpop.permute.xlu0 %5485 }
0x2c4f   :  { %v5488_v55 = vadd.f32 %v5486_v49, %v5394_v23 }
0x2c51   :  { %7308 = vtanh.f32 %v5488_v55 }
0x2c5e   :  { %v7309_v50 = vpop.eup %7308 }
0x2c5f   :  { %5492 = vrot.lane.b32.xlu0 %v7309_v50, %s7545_s25 }
0x2ca9   :  { %v5584_v51 = vpop.permute.xlu1 %5583 }
0x2caa   :  { %v5586_v10 = vadd.f32 %v5584_v51, %v7898_v17  ;;  %v5968_v51 = vld [vmem:[%s8994_s19] sm:$0x3] }
0x2cac   :  { %7310 = vtanh.f32 %v5586_v10 }
0x2cb9   :  { %v7311_v58 = vpop.eup %7310 }
0x2cba   :  { %5590 = vrot.lane.b32.xlu1 %v7311_v58, %s7545_s25 }
0x2cd1   :  { %v5493_v63 = vpop.permute.xlu0 %5492 }
0x2cd2   :  { %v5495_v61 = vmul.f32 %v5493_v63, %v5490_v60 }
0x2cd4   :  { %v5497_v16 = vadd.f32 %v5496_v2, %v5495_v61 }
0x2cd6   :  { %5675 = vrot.lane.b32.xlu0 %v5497_v16, %s7545_s25 }
0x2d2c   :  { %v5591_v11 = vpop.permute.xlu1 %5590 }
0x2d2d   :  { %v5593_v25 = vmul.f32 %v5591_v11, %v5588_v22 }
0x2d2f   :  { %v5597_v39 = vadd.f32 %v5596_v14, %v5593_v25 }
0x2d31   :  { %v5599_v17 = vrot.slane %v5597_v39, 6 }
0x2d33   :  { %5600 = vrot.lane.b32.xlu1 %v5599_v17, %s7545_s25 }
0x2d48   :  { %v5676_v12 = vpop.permute.xlu0 %5675 }
0x2d49   :  { %7085 = vmatmul.mubr.msk.f32.vlgmr.msra.gmra.mxu1 %vm1349_vm0, %v5676_v12 }
0x2d4a   :  { %7106 = vmatprep.mubr.msk.f32.mxu1 %vm7543_vm13, %v7542_v0 }
0x2da5   :  { %v5601_v57 = vpop.permute.xlu1 %5600 }
0x2da6   :  { %7074 = vmatmul.mubr.msk.f32.vlgmr.msra.gmra.mxu0 %vm1349_vm0, %v5601_v57 }
0x2da7   :  { %7095 = vmatprep.mubr.msk.f32.mxu0 %vm7543_vm13, %v7542_v0  ;;  %7088 = vmatpush3.msra.mxu0 %v5778_v32 }
0x2da8   :  { %7089 = vmatprep.subr.mxu0 %v7542_v0 }
0x2da9   :  { %7090 = vmatpush3.msra.mxu0 %v5777_v37 }
0x2daa   :  { %7091 = vmatprep.subr.mxu0 %v7542_v0 }
0x2dab   :  { %7092 = vmatpush3.msra.mxu0 %v5776_v8 }
0x2dac   :  { %7093 = vmatprep.subr.mxu0 %v7542_v0 }
0x2dad   :  { %7094 = vmatpush3.msra.mxu0 %v5775_v52 }
0x2e09   :  { %v5745_v1 = vpop.f32.mrf.mxu1 }
0x2e0a   :  { %v5746_v59 = vadd.f32 %v8779_v53, %v5745_v1 }
0x2e0b   :  { %v7086_v3 = vpop.f32.mrf.mxu1 }
0x2e0c   :  { %5757 = vrot.lane.b32.xlu0 %v5746_v59, %s7544_s27 }
0x2e66   :  { %v5670_v4 = vpop.f32.mrf.mxu0 }
0x2e67   :  { %v5671_v5 = vadd.f32 %v8784_v56, %v5670_v4  ;;  %v5864_v56 = vld [vmem:[%s8992_s17 + $0x18] sm:$0xff] }
0x2e68   :  { %v7075_v34 = vpop.f32.mrf.mxu0  ;;  %7099 = vmatpush3.msra.mxu1 %v5864_v56 }
0x2e69   :  { %v5749_v62 = vadd.f32 %v5746_v59, %v5671_v5  ;;  %7100 = vmatprep.subr.mxu1 %v7542_v0 }
0x2e6a   :  { %7101 = vmatpush3.msra.mxu1 %v5863_v21 }
0x2e6b   :  { %v6144_v6 = vmul.f32 -1.442695, %v5749_v62  ;;  %7102 = vmatprep.subr.mxu1 %v7542_v0 }
0x2e6c   :  { %7103 = vmatpush3.msra.mxu1 %v5862_v9 }
0x2e6d   :  { %7312 = vpow2.f32 %v6144_v6  ;;  %7104 = vmatprep.subr.mxu1 %v7542_v0  ;;  %v6147_v0 = vld [vmem:[%s8993_s18] ss:$0 sm:$0xff] }
0x2e6e   :  { %7105 = vmatpush3.msra.mxu1 %v5861_v54 }
0x2e7a   :  { %v7313_v7 = vpop.eup %7312 }
0x2e7b   :  { %v5753_v20 = vadd.f32 1.0, %v7313_v7 }
0x2e7d   :  { %7314 = vrcp.f32 %v5753_v20 }
0x2e7e   :  { %v5758_v27 = vpop.permute.xlu0 %5757 }
0x2e8a   :  { %v7315_v38 = vpop.eup %7314 }
0x2e8b   :  { %v5760_v35 = vmul.f32 %v7315_v38, %v5758_v27  ;;  %v5767_v24 = vsub.f32 1.0, %v7315_v38  ;;  %v5773_v18 = vmul.f32 %v7315_v38, %v5497_v16 }
0x2e8d   :  { %5762 = vrot.lane.b32.xlu1 %v5760_v35, %s7544_s27 }
0x2eff   :  { %v5763_v28 = vpop.permute.xlu1 %5762 }
0x2f00   :  { %v5765_v53 = vadd.f32 %v5763_v28, %v5671_v5 }
0x2f02   :  { %7316 = vtanh.f32 %v5765_v53 }
0x2f0f   :  { %v7317_v23 = vpop.eup %7316 }
0x2f10   :  { %5769 = vrot.lane.b32.xlu0 %v7317_v23, %s7545_s25 }
0x2f82   :  { %v5770_v15 = vpop.permute.xlu0 %5769 }
0x2f83   :  { %v5772_v41 = vmul.f32 %v5770_v15, %v5767_v24 }
0x2f85   :  { %v5774_v31 = vadd.f32 %v5773_v18, %v5772_v41 }
0x2f87   :  { %5787 = vrot.lane.b32.xlu1 %v5774_v31, %s7545_s25 }
0x2ff9   :  { %v5788_v26 = vpop.permute.xlu1 %5787 }
0x2ffa   :  { %7096 = vmatmul.mubr.msk.f32.vlgmr.msra.gmra.mxu0 %vm1349_vm0, %v5788_v26  ;;  %7107 = vmatmul.mubr.msk.f32.vlgmr.msra.gmra.mxu1 %vm1349_vm0, %v5788_v26 }
0x30ba   :  { %v5857_v44 = vpop.f32.mrf.mxu0  ;;  %v5938_v42 = vpop.f32.mrf.mxu1 }
0x30bb   :  { %v5939_v29 = vadd.f32 %v6147_v0, %v5938_v42  ;;  %v5858_v48 = vadd.f32 %v6145_v13, %v5857_v44 }
0x30bc   :  { %v7097_v30 = vpop.f32.mrf.mxu0  ;;  %v7108_v33 = vpop.f32.mrf.mxu1 }
0x30bd   :  { %v5942_v40 = vand.u32 2147483647, %v5939_v29  ;;  %v5945_v49 = vmul.f32 %v5858_v48, %v5858_v48 }
0x30bf   :  { %v5943_v43 = vsub.f32 0.0, %v5942_v40 }
0x30c1   :  { %v5947_v45 = vmul.f32 1.442695, %v5943_v43  ;;  %v5965_v47 = vmul.f32 0.5, %v5943_v43  ;;  %v5944_v36 = vadd.f32 1.0, %v5943_v43 }
0x30c3   :  { %7318 = vpow2.f32 %v5947_v45  ;;  %v5966_v46 = vmul.f32 1.442695, %v5965_v47  ;;  %v5946_v55 = vsub.f32 %v5944_v36, %v5945_v49 }
0x30c5   :  { %7320 = vpow2.f32 %v5966_v46 }
0x30d0   :  { %v7319_v50 = vpop.eup %7318 }
0x30d1   :  { %v5949_v10 = vsub.f32 %v5946_v55, %v7319_v50 }
0x30d2   :  { %v7321_v58 = vpop.eup %7320 }
0x30d3   :  { %v5951_v60 = vsel %vm5950_vm3, %v5949_v10, 0.0  ;;  %v5969_v63 = vmul.f32 %v7321_v58, %v5968_v51 }
0x30d4   :  { %5952 = vadd.xlane.f32.xlu0 %v5951_v60 }
0x30d5   :  { %v5970_v2 = vadd.f32 %v5969_v63, %v5858_v48 }
0x30d7   :  { %5971 = vst.msk [vmem:[#allocation16] sm:$0x3] %vm5950_vm3, %v5970_v2 }
0x30d8   :  { %7504 = shalt.err (!%p7501_p11)
}
0x30d9   :  { %5983 = dma.vmem_to_hbm [thread:$0]  %s5981_s12, 32, %s8995_s20, [#allocation5]  }
0x30da   :  { %s7547_s4 = smov [#allocation17]  }
0x315d   :  { %v5953_v61 = vpop.xlane.xlu0 %5952 }
0x315e   :  { %v5954_v16 = vrot.slane %v5953_v61, 4 }
0x3160   :  { %v5955_v19 = vadd.f32 %v5954_v16, %v5953_v61 }
0x3162   :  { %v5956_v22 = vrot.slane %v5955_v19, 2 }
0x3164   :  { %v5957_v11 = vadd.f32 %v5956_v22, %v5955_v19 }
0x3166   :  { %v5958_v14 = vrot.slane %v5957_v11, 1 }
0x3168   :  { %v5959_v25 = vadd.f32 %v5958_v14, %v5957_v11 }
0x316a   :  { %7109 = vpush %v5959_v25 }
0x319b   :  { %s7110_s19 = spop %7109 }
0x319c   :  { %s5961_s14 = smul.f32 -0.5, %s7110_s19 }
0x319e   :  { %s5964_s11 = smul.f32 0.5, %s5961_s14 }
0x31a0   :  { %5973 = sst [smem:[#allocation17]] %s5964_s11 }
0x31a1   :  { %5991 = dma.smem_to_hbm %s7547_s4, 16, %s8996_s21, [#allocation6]  }
0x31a2   :  { %7529 = dma.done.wait [#allocation5], 32  }
0x31a3   :  { %7530 = vsyncadd [#allocation5], 4294967264 }
0x31a4   :  { %7531 = dma.done.wait [#allocation6], 16  }
0x31a5   :  { %7532 = vsyncadd [#allocation6], 4294967280 }
0x31a6   :  { %5998 = sfence }
0x31a7   :  { %5999 = vsyncpa [#allocation4], 1 }
0x31a8   :  { %6000 = vsyncpa [#allocation8], 1 }
0x31a9   :  { %6001 = vsyncpa [#allocation11], 1 }
0x31aa   :  { %6002 = vsyncpa [#allocation14], 1 }
0x31ab   :  { %6003 = vsyncpa [#allocation5], 1 }
0x31ac   :  { %6004 = vsyncpa [#allocation6], 1 }

</bundles_post_ra>
